<compile_context>
chip_gen: v5e
topology: v5e:2x2
jax: 0.10.0
libtpu: 0.0.40
codegen_flags: <defaults>
</compile_context>

<pallas_src>
import functools
import math

import jax
import jax.numpy as jnp
from jax import lax
from jax.experimental import pallas as pl
from jax.experimental.pallas import tpu as pltpu


def _round_up(n, m):
    return (n + m - 1) // m * m


def _pick_t_blk(T, cap=8):
    for tb in range(min(T, cap), 0, -1):
        if T % tb == 0:
            return tb
    return 1


# ----------------------------------------------------------------------------
# Pallas kernel: per-time-block Linear+input GEMM, bi-LSTM recurrence with
# scratch-carried state, online mean/max pooling.
# ----------------------------------------------------------------------------
def _comp_pool_kernel(xf_ref, xb_ref, wf_ref, wb_ref, bf_ref, bb_ref,
                      whf_ref, whb_ref, out_ref,
                      hf_ref, cf_ref, hb_ref, cb_ref,
                      sf_ref, sb_ref, mf_ref, mb_ref, *, total_t):
    """
    xf_ref / xb_ref : (T_blk, Bp, Din)  bf16, time-major blocks (fwd / reversed order)
    wf_ref / wb_ref : (Din, 4*Hp)       bf16, Linear folded into each direction's W_ih,
                                        gate-grouped [i | f | g | o], each lane-padded to Hp
    bf_ref / bb_ref : (1, 4*Hp)         f32 fused bias (bl@W_ih + b_ih + b_hh)
    whf_ref/whb_ref : (Hp, 4*Hp)        f32 per-direction recurrent weights
    out_ref         : (Bp, 4*Hp)        f32 [mean_f | mean_b | max_f | max_b]
    scratch         : h/c/sum/max per direction, (Bp, Hp) f32, persist across time blocks
    """
    j = pl.program_id(1)
    n_tb = pl.num_programs(1)
    t_blk, bp, din = xf_ref.shape
    hp4 = wf_ref.shape[1]
    hp = hp4 // 4

    # per-sequence state init at the first time block
    @pl.when(j == 0)
    def _():
        hf_ref[...] = jnp.zeros_like(hf_ref)
        cf_ref[...] = jnp.zeros_like(cf_ref)
        hb_ref[...] = jnp.zeros_like(hb_ref)
        cb_ref[...] = jnp.zeros_like(cb_ref)
        sf_ref[...] = jnp.zeros_like(sf_ref)
        sb_ref[...] = jnp.zeros_like(sb_ref)
        mf_ref[...] = jnp.full(mf_ref.shape, -jnp.inf, jnp.float32)
        mb_ref[...] = jnp.full(mb_ref.shape, -jnp.inf, jnp.float32)

    # input-projection GEMMs for this block (bf16 operands, f32 accumulate); these do not
    # depend on h, so they sit off the serial recurrence path.
    xf = xf_ref[...].reshape(t_blk * bp, din)
    xb = xb_ref[...].reshape(t_blk * bp, din)
    gxf = jnp.dot(xf, wf_ref[...], preferred_element_type=jnp.float32) + bf_ref[...]
    gxb = jnp.dot(xb, wb_ref[...], preferred_element_type=jnp.float32) + bb_ref[...]

    whh_f = whf_ref[...]   # loaded once per block, reused every timestep
    whh_b = whb_ref[...]

    # single-tanh gate activation constants (hoisted broadcasts):
    #   sigmoid(x) = 0.5*(tanh(x/2)+1);  cell gate 'g' (lanes [2Hp,3Hp)) uses tanh(x).
    lane = lax.broadcasted_iota(jnp.int32, (1, hp4), 1)
    is_cell = (lane >= 2 * hp) & (lane < 3 * hp)
    pre = jnp.broadcast_to(jnp.where(is_cell, 1.0, 0.5), (bp, hp4))
    post_m = pre
    post_a = jnp.broadcast_to(jnp.where(is_cell, 0.0, 0.5), (bp, hp4))

    h_f = hf_ref[...]; c_f = cf_ref[...]
    h_b = hb_ref[...]; c_b = cb_ref[...]
    s_f = sf_ref[...]; s_b = sb_ref[...]
    m_f = mf_ref[...]; m_b = mb_ref[...]

    def lstm_step(g_in, h, c, whh):
        # TODO(synk): optionally cast h/whh to bf16 here for single-pass MXU throughput.
        g = g_in + jnp.dot(h, whh, preferred_element_type=jnp.float32)
        t = jnp.tanh(g * pre)               # one EUP push for all 4 gate groups
        a = t * post_m + post_a             # == [sig(i) | sig(f) | tanh(g) | sig(o)]
        c = a[:, hp:2 * hp] * c + a[:, 0:hp] * a[:, 2 * hp:3 * hp]
        h = a[:, 3 * hp:4 * hp] * jnp.tanh(c)
        return h, c

    # bounded unroll over the time block; fwd walks its block forward, bwd walks its
    # (end-first) block backward.  Mean/max pooling is order-invariant, so both
    # directions' hidden states are folded into the accumulators as produced.
    for t in range(t_blk):
        h_f, c_f = lstm_step(gxf[t * bp:(t + 1) * bp, :], h_f, c_f, whh_f)
        h_b, c_b = lstm_step(gxb[(t_blk - 1 - t) * bp:(t_blk - t) * bp, :],
                             h_b, c_b, whh_b)
        s_f = s_f + h_f
        s_b = s_b + h_b
        m_f = jnp.maximum(m_f, h_f)
        m_b = jnp.maximum(m_b, h_b)

    hf_ref[...] = h_f; cf_ref[...] = c_f
    hb_ref[...] = h_b; cb_ref[...] = c_b
    sf_ref[...] = s_f; sb_ref[...] = s_b
    mf_ref[...] = m_f; mb_ref[...] = m_b

    # single lane-dense full-width store at the last time block
    @pl.when(j == n_tb - 1)
    def _():
        inv_t = 1.0 / total_t
        out_ref[...] = jnp.concatenate([s_f * inv_t, s_b * inv_t, m_f, m_b], axis=1)


# ----------------------------------------------------------------------------
# Weight fusion: fold Linear into the gate projections, pad each gate group to Hp
# (multiple of 128 lanes), keep per-direction (dense) recurrent weights.
# ----------------------------------------------------------------------------
def fuse_params(p):
    H = p["whh_f"].shape[0]
    Hp = _round_up(H, 128)

    def pad_gate_cols(w):
        # (rows, 4H) -> (rows, 4*Hp): each PyTorch gate block [i|f|g|o] lane-padded to Hp
        # so every gate group is an integral number of 128-lane vregs in the kernel.
        return jnp.concatenate(
            [jnp.pad(w[:, k * H:(k + 1) * H], ((0, 0), (0, Hp - H))) for k in range(4)],
            axis=1)

    # Linear folded into each direction's input projection (Dropout p=0 -> identity)
    w_in_f = pad_gate_cols(p["wl"] @ p["wih_f"])
    w_in_b = pad_gate_cols(p["wl"] @ p["wih_b"])
    b_in_f = pad_gate_cols(p["bl"] @ p["wih_f"] + p["bf"])
    b_in_b = pad_gate_cols(p["bl"] @ p["wih_b"] + p["bb"])

    # dense per-direction recurrent weights, row-padded to Hp (padded h lanes stay 0)
    whh_f = jnp.pad(pad_gate_cols(p["whh_f"]), ((0, Hp - H), (0, 0)))
    whh_b = jnp.pad(pad_gate_cols(p["whh_b"]), ((0, Hp - H), (0, 0)))

    return dict(
        w_in_f=w_in_f.astype(jnp.bfloat16),   # bf16 MXU operands, f32 accumulation
        w_in_b=w_in_b.astype(jnp.bfloat16),
        b_in_f=b_in_f.astype(jnp.float32),
        b_in_b=b_in_b.astype(jnp.float32),
        whh_f=whh_f.astype(jnp.float32),
        whh_b=whh_b.astype(jnp.float32),
    )


# ----------------------------------------------------------------------------
# Wrapper: one pallas_call, grid = (2 sequences [parallel], T/T_blk time blocks
# [arbitrary]).  Weights are DMA'd once (constant index_map); x blocks pipeline.
# ----------------------------------------------------------------------------
@functools.partial(jax.jit, static_argnames=("hidden_size", "t_blk"))
def inference_composition(m_p, m_h, fused, *, hidden_size, t_blk=None):
    B, T, Din = m_p.shape
    H = hidden_size
    Hp = fused["whh_f"].shape[0]
    Hp4 = fused["whh_f"].shape[1]

    if t_blk is None:
        t_blk = _pick_t_blk(T)
    if T % t_blk != 0:
        raise ValueError(f"t_blk={t_blk} must divide T={T}")
    n_tb = T // t_blk

    # per-core batch, padded to the bf16 sublane-packing tile (16 rows)
    Bp = _round_up(B, 16)

    # Single wrapper copy: stack the two sequences, pad batch, permute to time-major,
    # cast to bf16.  The pad+cast copy is unavoidable; the time-major permute rides the
    # same pass (no extra HBM round trip) and keeps every per-timestep gx slice
    # sublane-aligned and contiguous inside the kernel.
    x = jnp.stack([m_p, m_h], axis=0)                          # (2, B, T, Din)
    x = jnp.pad(x, ((0, 0), (0, Bp - B), (0, 0), (0, 0)))      # (2, Bp, T, Din)
    x = jnp.transpose(x, (0, 2, 1, 3)).astype(jnp.bfloat16)    # (2, T, Bp, Din)

    def xf_map(s, j):
        return (s, j, 0, 0)

    def xb_map(s, j):
        return (s, n_tb - 1 - j, 0, 0)

    def const_map(s, j):
        return (0, 0)

    kernel = functools.partial(_comp_pool_kernel, total_t=T)

    out = pl.pallas_call(
        kernel,
        out_shape=jax.ShapeDtypeStruct((2, Bp, Hp4), jnp.float32),
        grid=(2, n_tb),
        in_specs=[
            pl.BlockSpec((None, t_blk, Bp, Din), xf_map),   # x, forward-ordered block
            pl.BlockSpec((None, t_blk, Bp, Din), xb_map),   # x, reverse-ordered block
            pl.BlockSpec((Din, Hp4), const_map),            # w_in fwd (bf16)
            pl.BlockSpec((Din, Hp4), const_map),            # w_in bwd (bf16)
            pl.BlockSpec((1, Hp4), const_map),              # bias fwd
            pl.BlockSpec((1, Hp4), const_map),              # bias bwd
            pl.BlockSpec((Hp, Hp4), const_map),             # whh fwd
            pl.BlockSpec((Hp, Hp4), const_map),             # whh bwd
        ],
        out_specs=pl.BlockSpec((None, Bp, Hp4), lambda s, j: (s, 0, 0)),
        scratch_shapes=[
            pltpu.VMEM((Bp, Hp), jnp.float32),   # h_f
            pltpu.VMEM((Bp, Hp), jnp.float32),   # c_f
            pltpu.VMEM((Bp, Hp), jnp.float32),   # h_b
            pltpu.VMEM((Bp, Hp), jnp.float32),   # c_b
            pltpu.VMEM((Bp, Hp), jnp.float32),   # running sum fwd
            pltpu.VMEM((Bp, Hp), jnp.float32),   # running sum bwd
            pltpu.VMEM((Bp, Hp), jnp.float32),   # running max fwd
            pltpu.VMEM((Bp, Hp), jnp.float32),   # running max bwd
        ],
        compiler_params=pltpu.CompilerParams(
            dimension_semantics=("parallel", "arbitrary"),
            # sized with headroom for v7x's 64 MiB physical VMEM; ~28 MiB needed at
            # real ESIM shapes (B=32, T_blk=8, H=300, Din=2400) -- see header comment.
            vmem_limit_bytes=48 * 1024 * 1024,
        ),
    )(x, x, fused["w_in_f"], fused["w_in_b"], fused["b_in_f"], fused["b_in_b"],
      fused["whh_f"], fused["whh_b"])

    # unpad: per sequence -> (B, 4H) = [mean_f mean_b max_f max_b]; concat seqs -> (B, 8H)
    def pooled(o):
        mean = jnp.concatenate([o[:B, 0:H], o[:B, Hp:Hp + H]], axis=1)
        vmax = jnp.concatenate([o[:B, 2 * Hp:2 * Hp + H], o[:B, 3 * Hp:3 * Hp + H]], axis=1)
        return jnp.concatenate([mean, vmax], axis=1)

    return jnp.concatenate([pooled(out[0]), pooled(out[1])], axis=1)


# ----------------------------------------------------------------------------
# Deterministic parameter init (PyTorch-style uniform fan-in bounds).
# Weights stored pre-transposed; LSTM biases pre-summed (b_ih + b_hh).
# ----------------------------------------------------------------------------
def init_params(key, input_size, output_size, hidden_size):
    ks = jax.random.split(key, 10)
    kl = 1.0 / math.sqrt(input_size)
    kr = 1.0 / math.sqrt(hidden_size)
    u = lambda k, shape, b: jax.random.uniform(k, shape, jnp.float32, -b, b)
    return dict(
        wl=u(ks[0], (input_size, output_size), kl),             # Linear W^T
        bl=u(ks[1], (1, output_size), kl),                      # Linear b
        wih_f=u(ks[2], (output_size, 4 * hidden_size), kr),     # W_ih^T  (fwd)
        whh_f=u(ks[3], (hidden_size, 4 * hidden_size), kr),     # W_hh^T  (fwd)
        bf=u(ks[4], (1, 4 * hidden_size), kr) + u(ks[5], (1, 4 * hidden_size), kr),
        wih_b=u(ks[6], (output_size, 4 * hidden_size), kr),     # W_ih^T  (bwd)
        whh_b=u(ks[7], (hidden_size, 4 * hidden_size), kr),     # W_hh^T  (bwd)
        bb=u(ks[8], (1, 4 * hidden_size), kr) + u(ks[9], (1, 4 * hidden_size), kr),
    )


# ----------------------------------------------------------------------------
# Pure-JAX f32 reference (mirrors PyTorch semantics, unfused weights).
# ----------------------------------------------------------------------------
def _reference(x, p):
    B, T, _ = x.shape
    H = p["whh_f"].shape[0]
    y = x @ p["wl"] + p["bl"][0]

    def run_dir(y_in, wih, whh, b, reverse):
        ys = y_in[:, ::-1, :] if reverse else y_in
        gx = jnp.einsum("btd,dg->btg", ys, wih) + b[0]

        def step(carry, g_t):
            h, c = carry
            g = g_t + h @ whh
            i = jax.nn.sigmoid(g[:, :H])
            f = jax.nn.sigmoid(g[:, H:2 * H])
            gg = jnp.tanh(g[:, 2 * H:3 * H])
            o = jax.nn.sigmoid(g[:, 3 * H:])
            c = f * c + i * gg
            h = o * jnp.tanh(c)
            return (h, c), h

        init = (jnp.zeros((B, H), jnp.float32), jnp.zeros((B, H), jnp.float32))
        _, hs = lax.scan(step, init, jnp.transpose(gx, (1, 0, 2)))
        hs = jnp.transpose(hs, (1, 0, 2))
        return hs[:, ::-1, :] if reverse else hs

    hf = run_dir(y, p["wih_f"], p["whh_f"], p["bf"], False)
    hb = run_dir(y, p["wih_b"], p["whh_b"], p["bb"], True)
    out = jnp.concatenate([hf, hb], axis=-1)
    return jnp.concatenate([out.sum(1) / T, out.max(1)], axis=-1)


if __name__ == "__main__":
    B, T = 2, 8
    input_size, output_size, hidden_size = 32, 32, 32

    key = jax.random.PRNGKey(0)
    kp, kh, kw = jax.random.split(key, 3)
    m_p = jax.random.normal(kp, (B, T, input_size), jnp.float32)
    m_h = jax.random.normal(kh, (B, T, input_size), jnp.float32)
    params = init_params(kw, input_size, output_size, hidden_size)
    fused = fuse_params(params)

    # t_blk=4 -> 2 time blocks: exercises the scratch-carried state across grid steps
    # and the reversed bwd-block indexing, in addition to the 2-way parallel seq axis.
    out = inference_composition(m_p, m_h, fused, hidden_size=hidden_size, t_blk=4)
    out = jax.block_until_ready(out)

    ref = jnp.concatenate([_reference(m_p, params), _reference(m_h, params)], axis=1)
    assert out.shape == (B, 8 * hidden_size), out.shape
    err = float(jnp.abs(out - ref).max())
    # bf16 MXU operands vs f32 reference -> relaxed tolerance
    assert err < 5e-2, f"max abs err {err}"
    print("KERNEL_OK")
</pallas_src>

<mosaic_0001>
module attributes {stable_mosaic.version = 11 : i64} {
  func.func @_comp_pool_kernel(%arg0: i32, %arg1: i32, %arg2: memref<1x4x16x32xbf16, #tpu.memory_space<vmem>>, %arg3: memref<1x4x16x32xbf16, #tpu.memory_space<vmem>>, %arg4: memref<32x512xbf16, #tpu.memory_space<vmem>>, %arg5: memref<32x512xbf16, #tpu.memory_space<vmem>>, %arg6: memref<1x512xf32, #tpu.memory_space<vmem>>, %arg7: memref<1x512xf32, #tpu.memory_space<vmem>>, %arg8: memref<128x512xf32, #tpu.memory_space<vmem>>, %arg9: memref<128x512xf32, #tpu.memory_space<vmem>>, %arg10: memref<1x16x512xf32, #tpu.memory_space<vmem>>, %arg11: memref<16x128xf32, #tpu.memory_space<vmem>>, %arg12: memref<16x128xf32, #tpu.memory_space<vmem>>, %arg13: memref<16x128xf32, #tpu.memory_space<vmem>>, %arg14: memref<16x128xf32, #tpu.memory_space<vmem>>, %arg15: memref<16x128xf32, #tpu.memory_space<vmem>>, %arg16: memref<16x128xf32, #tpu.memory_space<vmem>>, %arg17: memref<16x128xf32, #tpu.memory_space<vmem>>, %arg18: memref<16x128xf32, #tpu.memory_space<vmem>>) attributes {dimension_semantics = [#tpu.dimension_semantics<parallel>, #tpu.dimension_semantics<arbitrary>], iteration_bounds = array<i64: 2, 2>, scalar_prefetch = 0 : i64, scratch_operands = 8 : i64, tpu.core_type = #tpu.core_type<tc>, window_params = [{transform_indices = @transform_0, window_bounds = array<i64: 1, 4, 16, 32>}, {transform_indices = @transform_1, window_bounds = array<i64: 1, 4, 16, 32>}, {pipeline_mode = #tpu.pipeline_mode<synchronous>, transform_indices = @transform_2, window_bounds = array<i64: 32, 512>}, {pipeline_mode = #tpu.pipeline_mode<synchronous>, transform_indices = @transform_3, window_bounds = array<i64: 32, 512>}, {pipeline_mode = #tpu.pipeline_mode<synchronous>, transform_indices = @transform_4, window_bounds = array<i64: 1, 512>}, {pipeline_mode = #tpu.pipeline_mode<synchronous>, transform_indices = @transform_5, window_bounds = array<i64: 1, 512>}, {pipeline_mode = #tpu.pipeline_mode<synchronous>, transform_indices = @transform_6, window_bounds = array<i64: 128, 512>}, {pipeline_mode = #tpu.pipeline_mode<synchronous>, transform_indices = @transform_7, window_bounds = array<i64: 128, 512>}, {transform_indices = @transform_8, window_bounds = array<i64: 1, 16, 512>}]} {
    %c0_i32 = arith.constant 0 : i32
    %0 = arith.cmpi eq, %arg1, %c0_i32 : i32
    %1 = arith.extui %0 : i1 to i32
    %c0_i32_0 = arith.constant 0 : i32
    %2 = arith.cmpi ne, %1, %c0_i32_0 : i32
    scf.if %2 {
      %cst_66 = arith.constant 0.000000e+00 : f32
      %200 = vector.broadcast %cst_66 : f32 to vector<16x128xf32>
      %c0_67 = arith.constant 0 : index
      %c0_68 = arith.constant 0 : index
      %201 = vector.load %arg11[%c0_67, %c0_68] : memref<16x128xf32, #tpu.memory_space<vmem>>, vector<16x128xf32>
      tpu.vector_store %arg11[%c0_67, %c0_68], %200 {strides = array<i32>} : memref<16x128xf32, #tpu.memory_space<vmem>>, vector<16x128xf32>,
      %cst_69 = arith.constant 0.000000e+00 : f32
      %202 = vector.broadcast %cst_69 : f32 to vector<16x128xf32>
      %c0_70 = arith.constant 0 : index
      %c0_71 = arith.constant 0 : index
      %203 = vector.load %arg12[%c0_70, %c0_71] : memref<16x128xf32, #tpu.memory_space<vmem>>, vector<16x128xf32>
      tpu.vector_store %arg12[%c0_70, %c0_71], %202 {strides = array<i32>} : memref<16x128xf32, #tpu.memory_space<vmem>>, vector<16x128xf32>,
      %cst_72 = arith.constant 0.000000e+00 : f32
      %204 = vector.broadcast %cst_72 : f32 to vector<16x128xf32>
      %c0_73 = arith.constant 0 : index
      %c0_74 = arith.constant 0 : index
      %205 = vector.load %arg13[%c0_73, %c0_74] : memref<16x128xf32, #tpu.memory_space<vmem>>, vector<16x128xf32>
      tpu.vector_store %arg13[%c0_73, %c0_74], %204 {strides = array<i32>} : memref<16x128xf32, #tpu.memory_space<vmem>>, vector<16x128xf32>,
      %cst_75 = arith.constant 0.000000e+00 : f32
      %206 = vector.broadcast %cst_75 : f32 to vector<16x128xf32>
      %c0_76 = arith.constant 0 : index
      %c0_77 = arith.constant 0 : index
      %207 = vector.load %arg14[%c0_76, %c0_77] : memref<16x128xf32, #tpu.memory_space<vmem>>, vector<16x128xf32>
      tpu.vector_store %arg14[%c0_76, %c0_77], %206 {strides = array<i32>} : memref<16x128xf32, #tpu.memory_space<vmem>>, vector<16x128xf32>,
      %cst_78 = arith.constant 0.000000e+00 : f32
      %208 = vector.broadcast %cst_78 : f32 to vector<16x128xf32>
      %c0_79 = arith.constant 0 : index
      %c0_80 = arith.constant 0 : index
      %209 = vector.load %arg15[%c0_79, %c0_80] : memref<16x128xf32, #tpu.memory_space<vmem>>, vector<16x128xf32>
      tpu.vector_store %arg15[%c0_79, %c0_80], %208 {strides = array<i32>} : memref<16x128xf32, #tpu.memory_space<vmem>>, vector<16x128xf32>,
      %cst_81 = arith.constant 0.000000e+00 : f32
      %210 = vector.broadcast %cst_81 : f32 to vector<16x128xf32>
      %c0_82 = arith.constant 0 : index
      %c0_83 = arith.constant 0 : index
      %211 = vector.load %arg16[%c0_82, %c0_83] : memref<16x128xf32, #tpu.memory_space<vmem>>, vector<16x128xf32>
      tpu.vector_store %arg16[%c0_82, %c0_83], %210 {strides = array<i32>} : memref<16x128xf32, #tpu.memory_space<vmem>>, vector<16x128xf32>,
      %cst_84 = arith.constant 0xFF800000 : f32
      %212 = vector.broadcast %cst_84 : f32 to vector<16x128xf32>
      %c0_85 = arith.constant 0 : index
      %c0_86 = arith.constant 0 : index
      %213 = vector.load %arg17[%c0_85, %c0_86] : memref<16x128xf32, #tpu.memory_space<vmem>>, vector<16x128xf32>
      tpu.vector_store %arg17[%c0_85, %c0_86], %212 {strides = array<i32>} : memref<16x128xf32, #tpu.memory_space<vmem>>, vector<16x128xf32>,
      %cst_87 = arith.constant 0xFF800000 : f32
      %214 = vector.broadcast %cst_87 : f32 to vector<16x128xf32>
      %c0_88 = arith.constant 0 : index
      %c0_89 = arith.constant 0 : index
      %215 = vector.load %arg18[%c0_88, %c0_89] : memref<16x128xf32, #tpu.memory_space<vmem>>, vector<16x128xf32>
      tpu.vector_store %arg18[%c0_88, %c0_89], %214 {strides = array<i32>} : memref<16x128xf32, #tpu.memory_space<vmem>>, vector<16x128xf32>,
    } else {
    }
    %c0 = arith.constant 0 : index
    %c0_1 = arith.constant 0 : index
    %c0_2 = arith.constant 0 : index
    %c0_3 = arith.constant 0 : index
    %3 = vector.load %arg2[%c0, %c0_1, %c0_2, %c0_3] : memref<1x4x16x32xbf16, #tpu.memory_space<vmem>>, vector<1x4x16x32xbf16>
    %4 = vector.shape_cast %3 : vector<1x4x16x32xbf16> to vector<4x16x32xbf16>
    %5 = vector.shape_cast %4 : vector<4x16x32xbf16> to vector<64x32xbf16>
    %c0_4 = arith.constant 0 : index
    %c0_5 = arith.constant 0 : index
    %c0_6 = arith.constant 0 : index
    %c0_7 = arith.constant 0 : index
    %6 = vector.load %arg3[%c0_4, %c0_5, %c0_6, %c0_7] : memref<1x4x16x32xbf16, #tpu.memory_space<vmem>>, vector<1x4x16x32xbf16>
    %7 = vector.shape_cast %6 : vector<1x4x16x32xbf16> to vector<4x16x32xbf16>
    %8 = vector.shape_cast %7 : vector<4x16x32xbf16> to vector<64x32xbf16>
    %c0_8 = arith.constant 0 : index
    %c0_9 = arith.constant 0 : index
    %9 = vector.load %arg4[%c0_8, %c0_9] : memref<32x512xbf16, #tpu.memory_space<vmem>>, vector<32x512xbf16>
    %cst = arith.constant dense<0.000000e+00> : vector<64x512xf32>
    %10 = tpu.matmul %5, %9, %cst {dimension_numbers = #tpu.dot_dimension_numbers<[1], [0], [0], [1], [0, 0, 1, 1], [], []>} : vector<64x32xbf16>, vector<32x512xbf16>, vector<64x512xf32> -> vector<64x512xf32>
    %c0_10 = arith.constant 0 : index
    %c0_11 = arith.constant 0 : index
    %11 = vector.load %arg6[%c0_10, %c0_11] : memref<1x512xf32, #tpu.memory_space<vmem>>, vector<1x512xf32>
    %12 = vector.broadcast %11 : vector<1x512xf32> to vector<64x512xf32>
    %13 = arith.addf %10, %12 : vector<64x512xf32>
    %c0_12 = arith.constant 0 : index
    %c0_13 = arith.constant 0 : index
    %14 = vector.load %arg5[%c0_12, %c0_13] : memref<32x512xbf16, #tpu.memory_space<vmem>>, vector<32x512xbf16>
    %cst_14 = arith.constant dense<0.000000e+00> : vector<64x512xf32>
    %15 = tpu.matmul %8, %14, %cst_14 {dimension_numbers = #tpu.dot_dimension_numbers<[1], [0], [0], [1], [0, 0, 1, 1], [], []>} : vector<64x32xbf16>, vector<32x512xbf16>, vector<64x512xf32> -> vector<64x512xf32>
    %c0_15 = arith.constant 0 : index
    %c0_16 = arith.constant 0 : index
    %16 = vector.load %arg7[%c0_15, %c0_16] : memref<1x512xf32, #tpu.memory_space<vmem>>, vector<1x512xf32>
    %17 = vector.broadcast %16 : vector<1x512xf32> to vector<64x512xf32>
    %18 = arith.addf %15, %17 : vector<64x512xf32>
    %c0_17 = arith.constant 0 : index
    %c0_18 = arith.constant 0 : index
    %19 = vector.load %arg8[%c0_17, %c0_18] : memref<128x512xf32, #tpu.memory_space<vmem>>, vector<128x512xf32>
    %c0_19 = arith.constant 0 : index
    %c0_20 = arith.constant 0 : index
    %20 = vector.load %arg9[%c0_19, %c0_20] : memref<128x512xf32, #tpu.memory_space<vmem>>, vector<128x512xf32>
    %21 = tpu.iota {dimensions = array<i32: 1>} : vector<1x512xi32>
    %c256_i32 = arith.constant 256 : i32
    %22 = vector.broadcast %c256_i32 : i32 to vector<1x512xi32>
    %23 = arith.cmpi sge, %21, %22 : vector<1x512xi32>
    %c384_i32 = arith.constant 384 : i32
    %24 = vector.broadcast %c384_i32 : i32 to vector<1x512xi32>
    %25 = arith.cmpi slt, %21, %24 : vector<1x512xi32>
    %26 = arith.andi %23, %25 : vector<1x512xi1>
    %cst_21 = arith.constant 1.000000e+00 : f32
    %cst_22 = arith.constant 5.000000e-01 : f32
    %27 = vector.broadcast %cst_21 : f32 to vector<1x512xf32>
    %28 = vector.broadcast %cst_22 : f32 to vector<1x512xf32>
    %29 = arith.select %26, %27, %28 : vector<1x512xi1>, vector<1x512xf32>
    %30 = vector.shape_cast %29 : vector<1x512xf32> to vector<1x512xf32>
    %31 = vector.broadcast %30 : vector<1x512xf32> to vector<16x512xf32>
    %cst_23 = arith.constant 0.000000e+00 : f32
    %cst_24 = arith.constant 5.000000e-01 : f32
    %32 = vector.broadcast %cst_23 : f32 to vector<1x512xf32>
    %33 = vector.broadcast %cst_24 : f32 to vector<1x512xf32>
    %34 = arith.select %26, %32, %33 : vector<1x512xi1>, vector<1x512xf32>
    %35 = vector.shape_cast %34 : vector<1x512xf32> to vector<1x512xf32>
    %36 = vector.broadcast %35 : vector<1x512xf32> to vector<16x512xf32>
    %c0_25 = arith.constant 0 : index
    %c0_26 = arith.constant 0 : index
    %37 = vector.load %arg11[%c0_25, %c0_26] : memref<16x128xf32, #tpu.memory_space<vmem>>, vector<16x128xf32>
    %c0_27 = arith.constant 0 : index
    %c0_28 = arith.constant 0 : index
    %38 = vector.load %arg12[%c0_27, %c0_28] : memref<16x128xf32, #tpu.memory_space<vmem>>, vector<16x128xf32>
    %c0_29 = arith.constant 0 : index
    %c0_30 = arith.constant 0 : index
    %39 = vector.load %arg13[%c0_29, %c0_30] : memref<16x128xf32, #tpu.memory_space<vmem>>, vector<16x128xf32>
    %c0_31 = arith.constant 0 : index
    %c0_32 = arith.constant 0 : index
    %40 = vector.load %arg14[%c0_31, %c0_32] : memref<16x128xf32, #tpu.memory_space<vmem>>, vector<16x128xf32>
    %c0_33 = arith.constant 0 : index
    %c0_34 = arith.constant 0 : index
    %41 = vector.load %arg15[%c0_33, %c0_34] : memref<16x128xf32, #tpu.memory_space<vmem>>, vector<16x128xf32>
    %c0_35 = arith.constant 0 : index
    %c0_36 = arith.constant 0 : index
    %42 = vector.load %arg16[%c0_35, %c0_36] : memref<16x128xf32, #tpu.memory_space<vmem>>, vector<16x128xf32>
    %c0_37 = arith.constant 0 : index
    %c0_38 = arith.constant 0 : index
    %43 = vector.load %arg17[%c0_37, %c0_38] : memref<16x128xf32, #tpu.memory_space<vmem>>, vector<16x128xf32>
    %c0_39 = arith.constant 0 : index
    %c0_40 = arith.constant 0 : index
    %44 = vector.load %arg18[%c0_39, %c0_40] : memref<16x128xf32, #tpu.memory_space<vmem>>, vector<16x128xf32>
    %45 = vector.extract_strided_slice %13 {offsets = [0, 0], sizes = [16, 512], strides = [1, 1]} : vector<64x512xf32> to vector<16x512xf32>
    %cst_41 = arith.constant dense<0.000000e+00> : vector<16x512xf32>
    %46 = tpu.matmul %37, %19, %cst_41 {dimension_numbers = #tpu.dot_dimension_numbers<[1], [0], [0], [1], [0, 0, 1, 1], [], []>} : vector<16x128xf32>, vector<128x512xf32>, vector<16x512xf32> -> vector<16x512xf32>
    %47 = arith.addf %45, %46 : vector<16x512xf32>
    %48 = arith.mulf %47, %31 : vector<16x512xf32>
    %49 = math.tanh %48 : vector<16x512xf32>
    %50 = arith.mulf %49, %31 : vector<16x512xf32>
    %51 = arith.addf %50, %36 : vector<16x512xf32>
    %52 = vector.extract_strided_slice %51 {offsets = [0, 128], sizes = [16, 128], strides = [1, 1]} : vector<16x512xf32> to vector<16x128xf32>
    %53 = arith.mulf %52, %38 : vector<16x128xf32>
    %54 = vector.extract_strided_slice %51 {offsets = [0, 0], sizes = [16, 128], strides = [1, 1]} : vector<16x512xf32> to vector<16x128xf32>
    %55 = vector.extract_strided_slice %51 {offsets = [0, 256], sizes = [16, 128], strides = [1, 1]} : vector<16x512xf32> to vector<16x128xf32>
    %56 = arith.mulf %54, %55 : vector<16x128xf32>
    %57 = arith.addf %53, %56 : vector<16x128xf32>
    %58 = vector.extract_strided_slice %51 {offsets = [0, 384], sizes = [16, 128], strides = [1, 1]} : vector<16x512xf32> to vector<16x128xf32>
    %59 = math.tanh %57 : vector<16x128xf32>
    %60 = arith.mulf %58, %59 : vector<16x128xf32>
    %61 = vector.extract_strided_slice %18 {offsets = [48, 0], sizes = [16, 512], strides = [1, 1]} : vector<64x512xf32> to vector<16x512xf32>
    %cst_42 = arith.constant dense<0.000000e+00> : vector<16x512xf32>
    %62 = tpu.matmul %39, %20, %cst_42 {dimension_numbers = #tpu.dot_dimension_numbers<[1], [0], [0], [1], [0, 0, 1, 1], [], []>} : vector<16x128xf32>, vector<128x512xf32>, vector<16x512xf32> -> vector<16x512xf32>
    %63 = arith.addf %61, %62 : vector<16x512xf32>
    %64 = arith.mulf %63, %31 : vector<16x512xf32>
    %65 = math.tanh %64 : vector<16x512xf32>
    %66 = arith.mulf %65, %31 : vector<16x512xf32>
    %67 = arith.addf %66, %36 : vector<16x512xf32>
    %68 = vector.extract_strided_slice %67 {offsets = [0, 128], sizes = [16, 128], strides = [1, 1]} : vector<16x512xf32> to vector<16x128xf32>
    %69 = arith.mulf %68, %40 : vector<16x128xf32>
    %70 = vector.extract_strided_slice %67 {offsets = [0, 0], sizes = [16, 128], strides = [1, 1]} : vector<16x512xf32> to vector<16x128xf32>
    %71 = vector.extract_strided_slice %67 {offsets = [0, 256], sizes = [16, 128], strides = [1, 1]} : vector<16x512xf32> to vector<16x128xf32>
    %72 = arith.mulf %70, %71 : vector<16x128xf32>
    %73 = arith.addf %69, %72 : vector<16x128xf32>
    %74 = vector.extract_strided_slice %67 {offsets = [0, 384], sizes = [16, 128], strides = [1, 1]} : vector<16x512xf32> to vector<16x128xf32>
    %75 = math.tanh %73 : vector<16x128xf32>
    %76 = arith.mulf %74, %75 : vector<16x128xf32>
    %77 = arith.addf %41, %60 : vector<16x128xf32>
    %78 = arith.addf %42, %76 : vector<16x128xf32>
    %79 = arith.maximumf %43, %60 : vector<16x128xf32>
    %80 = arith.maximumf %44, %76 : vector<16x128xf32>
    %81 = vector.extract_strided_slice %13 {offsets = [16, 0], sizes = [16, 512], strides = [1, 1]} : vector<64x512xf32> to vector<16x512xf32>
    %cst_43 = arith.constant dense<0.000000e+00> : vector<16x512xf32>
    %82 = tpu.matmul %60, %19, %cst_43 {dimension_numbers = #tpu.dot_dimension_numbers<[1], [0], [0], [1], [0, 0, 1, 1], [], []>} : vector<16x128xf32>, vector<128x512xf32>, vector<16x512xf32> -> vector<16x512xf32>
    %83 = arith.addf %81, %82 : vector<16x512xf32>
    %84 = arith.mulf %83, %31 : vector<16x512xf32>
    %85 = math.tanh %84 : vector<16x512xf32>
    %86 = arith.mulf %85, %31 : vector<16x512xf32>
    %87 = arith.addf %86, %36 : vector<16x512xf32>
    %88 = vector.extract_strided_slice %87 {offsets = [0, 128], sizes = [16, 128], strides = [1, 1]} : vector<16x512xf32> to vector<16x128xf32>
    %89 = arith.mulf %88, %57 : vector<16x128xf32>
    %90 = vector.extract_strided_slice %87 {offsets = [0, 0], sizes = [16, 128], strides = [1, 1]} : vector<16x512xf32> to vector<16x128xf32>
    %91 = vector.extract_strided_slice %87 {offsets = [0, 256], sizes = [16, 128], strides = [1, 1]} : vector<16x512xf32> to vector<16x128xf32>
    %92 = arith.mulf %90, %91 : vector<16x128xf32>
    %93 = arith.addf %89, %92 : vector<16x128xf32>
    %94 = vector.extract_strided_slice %87 {offsets = [0, 384], sizes = [16, 128], strides = [1, 1]} : vector<16x512xf32> to vector<16x128xf32>
    %95 = math.tanh %93 : vector<16x128xf32>
    %96 = arith.mulf %94, %95 : vector<16x128xf32>
    %97 = vector.extract_strided_slice %18 {offsets = [32, 0], sizes = [16, 512], strides = [1, 1]} : vector<64x512xf32> to vector<16x512xf32>
    %cst_44 = arith.constant dense<0.000000e+00> : vector<16x512xf32>
    %98 = tpu.matmul %76, %20, %cst_44 {dimension_numbers = #tpu.dot_dimension_numbers<[1], [0], [0], [1], [0, 0, 1, 1], [], []>} : vector<16x128xf32>, vector<128x512xf32>, vector<16x512xf32> -> vector<16x512xf32>
    %99 = arith.addf %97, %98 : vector<16x512xf32>
    %100 = arith.mulf %99, %31 : vector<16x512xf32>
    %101 = math.tanh %100 : vector<16x512xf32>
    %102 = arith.mulf %101, %31 : vector<16x512xf32>
    %103 = arith.addf %102, %36 : vector<16x512xf32>
    %104 = vector.extract_strided_slice %103 {offsets = [0, 128], sizes = [16, 128], strides = [1, 1]} : vector<16x512xf32> to vector<16x128xf32>
    %105 = arith.mulf %104, %73 : vector<16x128xf32>
    %106 = vector.extract_strided_slice %103 {offsets = [0, 0], sizes = [16, 128], strides = [1, 1]} : vector<16x512xf32> to vector<16x128xf32>
    %107 = vector.extract_strided_slice %103 {offsets = [0, 256], sizes = [16, 128], strides = [1, 1]} : vector<16x512xf32> to vector<16x128xf32>
    %108 = arith.mulf %106, %107 : vector<16x128xf32>
    %109 = arith.addf %105, %108 : vector<16x128xf32>
    %110 = vector.extract_strided_slice %103 {offsets = [0, 384], sizes = [16, 128], strides = [1, 1]} : vector<16x512xf32> to vector<16x128xf32>
    %111 = math.tanh %109 : vector<16x128xf32>
    %112 = arith.mulf %110, %111 : vector<16x128xf32>
    %113 = arith.addf %77, %96 : vector<16x128xf32>
    %114 = arith.addf %78, %112 : vector<16x128xf32>
    %115 = arith.maximumf %79, %96 : vector<16x128xf32>
    %116 = arith.maximumf %80, %112 : vector<16x128xf32>
    %117 = vector.extract_strided_slice %13 {offsets = [32, 0], sizes = [16, 512], strides = [1, 1]} : vector<64x512xf32> to vector<16x512xf32>
    %cst_45 = arith.constant dense<0.000000e+00> : vector<16x512xf32>
    %118 = tpu.matmul %96, %19, %cst_45 {dimension_numbers = #tpu.dot_dimension_numbers<[1], [0], [0], [1], [0, 0, 1, 1], [], []>} : vector<16x128xf32>, vector<128x512xf32>, vector<16x512xf32> -> vector<16x512xf32>
    %119 = arith.addf %117, %118 : vector<16x512xf32>
    %120 = arith.mulf %119, %31 : vector<16x512xf32>
    %121 = math.tanh %120 : vector<16x512xf32>
    %122 = arith.mulf %121, %31 : vector<16x512xf32>
    %123 = arith.addf %122, %36 : vector<16x512xf32>
    %124 = vector.extract_strided_slice %123 {offsets = [0, 128], sizes = [16, 128], strides = [1, 1]} : vector<16x512xf32> to vector<16x128xf32>
    %125 = arith.mulf %124, %93 : vector<16x128xf32>
    %126 = vector.extract_strided_slice %123 {offsets = [0, 0], sizes = [16, 128], strides = [1, 1]} : vector<16x512xf32> to vector<16x128xf32>
    %127 = vector.extract_strided_slice %123 {offsets = [0, 256], sizes = [16, 128], strides = [1, 1]} : vector<16x512xf32> to vector<16x128xf32>
    %128 = arith.mulf %126, %127 : vector<16x128xf32>
    %129 = arith.addf %125, %128 : vector<16x128xf32>
    %130 = vector.extract_strided_slice %123 {offsets = [0, 384], sizes = [16, 128], strides = [1, 1]} : vector<16x512xf32> to vector<16x128xf32>
    %131 = math.tanh %129 : vector<16x128xf32>
    %132 = arith.mulf %130, %131 : vector<16x128xf32>
    %133 = vector.extract_strided_slice %18 {offsets = [16, 0], sizes = [16, 512], strides = [1, 1]} : vector<64x512xf32> to vector<16x512xf32>
    %cst_46 = arith.constant dense<0.000000e+00> : vector<16x512xf32>
    %134 = tpu.matmul %112, %20, %cst_46 {dimension_numbers = #tpu.dot_dimension_numbers<[1], [0], [0], [1], [0, 0, 1, 1], [], []>} : vector<16x128xf32>, vector<128x512xf32>, vector<16x512xf32> -> vector<16x512xf32>
    %135 = arith.addf %133, %134 : vector<16x512xf32>
    %136 = arith.mulf %135, %31 : vector<16x512xf32>
    %137 = math.tanh %136 : vector<16x512xf32>
    %138 = arith.mulf %137, %31 : vector<16x512xf32>
    %139 = arith.addf %138, %36 : vector<16x512xf32>
    %140 = vector.extract_strided_slice %139 {offsets = [0, 128], sizes = [16, 128], strides = [1, 1]} : vector<16x512xf32> to vector<16x128xf32>
    %141 = arith.mulf %140, %109 : vector<16x128xf32>
    %142 = vector.extract_strided_slice %139 {offsets = [0, 0], sizes = [16, 128], strides = [1, 1]} : vector<16x512xf32> to vector<16x128xf32>
    %143 = vector.extract_strided_slice %139 {offsets = [0, 256], sizes = [16, 128], strides = [1, 1]} : vector<16x512xf32> to vector<16x128xf32>
    %144 = arith.mulf %142, %143 : vector<16x128xf32>
    %145 = arith.addf %141, %144 : vector<16x128xf32>
    %146 = vector.extract_strided_slice %139 {offsets = [0, 384], sizes = [16, 128], strides = [1, 1]} : vector<16x512xf32> to vector<16x128xf32>
    %147 = math.tanh %145 : vector<16x128xf32>
    %148 = arith.mulf %146, %147 : vector<16x128xf32>
    %149 = arith.addf %113, %132 : vector<16x128xf32>
    %150 = arith.addf %114, %148 : vector<16x128xf32>
    %151 = arith.maximumf %115, %132 : vector<16x128xf32>
    %152 = arith.maximumf %116, %148 : vector<16x128xf32>
    %153 = vector.extract_strided_slice %13 {offsets = [48, 0], sizes = [16, 512], strides = [1, 1]} : vector<64x512xf32> to vector<16x512xf32>
    %cst_47 = arith.constant dense<0.000000e+00> : vector<16x512xf32>
    %154 = tpu.matmul %132, %19, %cst_47 {dimension_numbers = #tpu.dot_dimension_numbers<[1], [0], [0], [1], [0, 0, 1, 1], [], []>} : vector<16x128xf32>, vector<128x512xf32>, vector<16x512xf32> -> vector<16x512xf32>
    %155 = arith.addf %153, %154 : vector<16x512xf32>
    %156 = arith.mulf %155, %31 : vector<16x512xf32>
    %157 = math.tanh %156 : vector<16x512xf32>
    %158 = arith.mulf %157, %31 : vector<16x512xf32>
    %159 = arith.addf %158, %36 : vector<16x512xf32>
    %160 = vector.extract_strided_slice %159 {offsets = [0, 128], sizes = [16, 128], strides = [1, 1]} : vector<16x512xf32> to vector<16x128xf32>
    %161 = arith.mulf %160, %129 : vector<16x128xf32>
    %162 = vector.extract_strided_slice %159 {offsets = [0, 0], sizes = [16, 128], strides = [1, 1]} : vector<16x512xf32> to vector<16x128xf32>
    %163 = vector.extract_strided_slice %159 {offsets = [0, 256], sizes = [16, 128], strides = [1, 1]} : vector<16x512xf32> to vector<16x128xf32>
    %164 = arith.mulf %162, %163 : vector<16x128xf32>
    %165 = arith.addf %161, %164 : vector<16x128xf32>
    %166 = vector.extract_strided_slice %159 {offsets = [0, 384], sizes = [16, 128], strides = [1, 1]} : vector<16x512xf32> to vector<16x128xf32>
    %167 = math.tanh %165 : vector<16x128xf32>
    %168 = arith.mulf %166, %167 : vector<16x128xf32>
    %169 = vector.extract_strided_slice %18 {offsets = [0, 0], sizes = [16, 512], strides = [1, 1]} : vector<64x512xf32> to vector<16x512xf32>
    %cst_48 = arith.constant dense<0.000000e+00> : vector<16x512xf32>
    %170 = tpu.matmul %148, %20, %cst_48 {dimension_numbers = #tpu.dot_dimension_numbers<[1], [0], [0], [1], [0, 0, 1, 1], [], []>} : vector<16x128xf32>, vector<128x512xf32>, vector<16x512xf32> -> vector<16x512xf32>
    %171 = arith.addf %169, %170 : vector<16x512xf32>
    %172 = arith.mulf %171, %31 : vector<16x512xf32>
    %173 = math.tanh %172 : vector<16x512xf32>
    %174 = arith.mulf %173, %31 : vector<16x512xf32>
    %175 = arith.addf %174, %36 : vector<16x512xf32>
    %176 = vector.extract_strided_slice %175 {offsets = [0, 128], sizes = [16, 128], strides = [1, 1]} : vector<16x512xf32> to vector<16x128xf32>
    %177 = arith.mulf %176, %145 : vector<16x128xf32>
    %178 = vector.extract_strided_slice %175 {offsets = [0, 0], sizes = [16, 128], strides = [1, 1]} : vector<16x512xf32> to vector<16x128xf32>
    %179 = vector.extract_strided_slice %175 {offsets = [0, 256], sizes = [16, 128], strides = [1, 1]} : vector<16x512xf32> to vector<16x128xf32>
    %180 = arith.mulf %178, %179 : vector<16x128xf32>
    %181 = arith.addf %177, %180 : vector<16x128xf32>
    %182 = vector.extract_strided_slice %175 {offsets = [0, 384], sizes = [16, 128], strides = [1, 1]} : vector<16x512xf32> to vector<16x128xf32>
    %183 = math.tanh %181 : vector<16x128xf32>
    %184 = arith.mulf %182, %183 : vector<16x128xf32>
    %185 = arith.addf %149, %168 : vector<16x128xf32>
    %186 = arith.addf %150, %184 : vector<16x128xf32>
    %187 = arith.maximumf %151, %168 : vector<16x128xf32>
    %188 = arith.maximumf %152, %184 : vector<16x128xf32>
    %c0_49 = arith.constant 0 : index
    %c0_50 = arith.constant 0 : index
    %189 = vector.load %arg11[%c0_49, %c0_50] : memref<16x128xf32, #tpu.memory_space<vmem>>, vector<16x128xf32>
    tpu.vector_store %arg11[%c0_49, %c0_50], %168 {strides = array<i32>} : memref<16x128xf32, #tpu.memory_space<vmem>>, vector<16x128xf32>,
    %c0_51 = arith.constant 0 : index
    %c0_52 = arith.constant 0 : index
    %190 = vector.load %arg12[%c0_51, %c0_52] : memref<16x128xf32, #tpu.memory_space<vmem>>, vector<16x128xf32>
    tpu.vector_store %arg12[%c0_51, %c0_52], %165 {strides = array<i32>} : memref<16x128xf32, #tpu.memory_space<vmem>>, vector<16x128xf32>,
    %c0_53 = arith.constant 0 : index
    %c0_54 = arith.constant 0 : index
    %191 = vector.load %arg13[%c0_53, %c0_54] : memref<16x128xf32, #tpu.memory_space<vmem>>, vector<16x128xf32>
    tpu.vector_store %arg13[%c0_53, %c0_54], %184 {strides = array<i32>} : memref<16x128xf32, #tpu.memory_space<vmem>>, vector<16x128xf32>,
    %c0_55 = arith.constant 0 : index
    %c0_56 = arith.constant 0 : index
    %192 = vector.load %arg14[%c0_55, %c0_56] : memref<16x128xf32, #tpu.memory_space<vmem>>, vector<16x128xf32>
    tpu.vector_store %arg14[%c0_55, %c0_56], %181 {strides = array<i32>} : memref<16x128xf32, #tpu.memory_space<vmem>>, vector<16x128xf32>,
    %c0_57 = arith.constant 0 : index
    %c0_58 = arith.constant 0 : index
    %193 = vector.load %arg15[%c0_57, %c0_58] : memref<16x128xf32, #tpu.memory_space<vmem>>, vector<16x128xf32>
    tpu.vector_store %arg15[%c0_57, %c0_58], %185 {strides = array<i32>} : memref<16x128xf32, #tpu.memory_space<vmem>>, vector<16x128xf32>,
    %c0_59 = arith.constant 0 : index
    %c0_60 = arith.constant 0 : index
    %194 = vector.load %arg16[%c0_59, %c0_60] : memref<16x128xf32, #tpu.memory_space<vmem>>, vector<16x128xf32>
    tpu.vector_store %arg16[%c0_59, %c0_60], %186 {strides = array<i32>} : memref<16x128xf32, #tpu.memory_space<vmem>>, vector<16x128xf32>,
    %c0_61 = arith.constant 0 : index
    %c0_62 = arith.constant 0 : index
    %195 = vector.load %arg17[%c0_61, %c0_62] : memref<16x128xf32, #tpu.memory_space<vmem>>, vector<16x128xf32>
    tpu.vector_store %arg17[%c0_61, %c0_62], %187 {strides = array<i32>} : memref<16x128xf32, #tpu.memory_space<vmem>>, vector<16x128xf32>,
    %c0_63 = arith.constant 0 : index
    %c0_64 = arith.constant 0 : index
    %196 = vector.load %arg18[%c0_63, %c0_64] : memref<16x128xf32, #tpu.memory_space<vmem>>, vector<16x128xf32>
    tpu.vector_store %arg18[%c0_63, %c0_64], %188 {strides = array<i32>} : memref<16x128xf32, #tpu.memory_space<vmem>>, vector<16x128xf32>,
    %c1_i32 = arith.constant 1 : i32
    %197 = arith.cmpi eq, %arg1, %c1_i32 : i32
    %198 = arith.extui %197 : i1 to i32
    %c0_i32_65 = arith.constant 0 : i32
    %199 = arith.cmpi ne, %198, %c0_i32_65 : i32
    scf.if %199 {
      %cst_66 = arith.constant 1.250000e-01 : f32
      %200 = vector.broadcast %cst_66 : f32 to vector<16x128xf32>
      %201 = arith.mulf %185, %200 : vector<16x128xf32>
      %cst_67 = arith.constant 1.250000e-01 : f32
      %202 = vector.broadcast %cst_67 : f32 to vector<16x128xf32>
      %203 = arith.mulf %186, %202 : vector<16x128xf32>
      %204 = tpu.concatenate %201, %203, %187, %188 in 1 : vector<16x128xf32>, vector<16x128xf32>, vector<16x128xf32>, vector<16x128xf32> -> vector<16x512xf32>
      %c0_68 = arith.constant 0 : index
      %c0_69 = arith.constant 0 : index
      %c0_70 = arith.constant 0 : index
      %205 = vector.load %arg10[%c0_68, %c0_69, %c0_70] : memref<1x16x512xf32, #tpu.memory_space<vmem>>, vector<1x16x512xf32>
      %206 = vector.shape_cast %205 : vector<1x16x512xf32> to vector<16x512xf32>
      %207 = vector.shape_cast %204 : vector<16x512xf32> to vector<1x16x512xf32>
      tpu.vector_store %arg10[%c0_68, %c0_69, %c0_70], %207 {strides = array<i32>} : memref<1x16x512xf32, #tpu.memory_space<vmem>>, vector<1x16x512xf32>,
    } else {
    }
    return
  }
  func.func @transform_0(%arg0: i32, %arg1: i32) -> (i32, i32, i32, i32) {
    %c0_i32 = arith.constant 0 : i32
    %c0_i32_0 = arith.constant 0 : i32
    %c0_i32_1 = arith.constant 0 : i32
    return %arg0, %arg1, %c0_i32, %c0_i32_0 : i32, i32, i32, i32
  }
  func.func @transform_1(%arg0: i32, %arg1: i32) -> (i32, i32, i32, i32) {
    %c1_i32 = arith.constant 1 : i32
    %0 = arith.subi %c1_i32, %arg1 : i32
    %c0_i32 = arith.constant 0 : i32
    %c0_i32_0 = arith.constant 0 : i32
    %c0_i32_1 = arith.constant 0 : i32
    return %arg0, %0, %c0_i32, %c0_i32_0 : i32, i32, i32, i32
  }
  func.func @transform_2(%arg0: i32, %arg1: i32) -> (i32, i32) {
    %c0_i32 = arith.constant 0 : i32
    %c0_i32_0 = arith.constant 0 : i32
    %c0_i32_1 = arith.constant 0 : i32
    return %c0_i32, %c0_i32_0 : i32, i32
  }
  func.func @transform_3(%arg0: i32, %arg1: i32) -> (i32, i32) {
    %c0_i32 = arith.constant 0 : i32
    %c0_i32_0 = arith.constant 0 : i32
    %c0_i32_1 = arith.constant 0 : i32
    return %c0_i32, %c0_i32_0 : i32, i32
  }
  func.func @transform_4(%arg0: i32, %arg1: i32) -> (i32, i32) {
    %c0_i32 = arith.constant 0 : i32
    %c0_i32_0 = arith.constant 0 : i32
    %c0_i32_1 = arith.constant 0 : i32
    return %c0_i32, %c0_i32_0 : i32, i32
  }
  func.func @transform_5(%arg0: i32, %arg1: i32) -> (i32, i32) {
    %c0_i32 = arith.constant 0 : i32
    %c0_i32_0 = arith.constant 0 : i32
    %c0_i32_1 = arith.constant 0 : i32
    return %c0_i32, %c0_i32_0 : i32, i32
  }
  func.func @transform_6(%arg0: i32, %arg1: i32) -> (i32, i32) {
    %c0_i32 = arith.constant 0 : i32
    %c0_i32_0 = arith.constant 0 : i32
    %c0_i32_1 = arith.constant 0 : i32
    return %c0_i32, %c0_i32_0 : i32, i32
  }
  func.func @transform_7(%arg0: i32, %arg1: i32) -> (i32, i32) {
    %c0_i32 = arith.constant 0 : i32
    %c0_i32_0 = arith.constant 0 : i32
    %c0_i32_1 = arith.constant 0 : i32
    return %c0_i32, %c0_i32_0 : i32, i32
  }
  func.func @transform_8(%arg0: i32, %arg1: i32) -> (i32, i32, i32) {
    %c0_i32 = arith.constant 0 : i32
    %c0_i32_0 = arith.constant 0 : i32
    %c0_i32_1 = arith.constant 0 : i32
    return %arg0, %c0_i32, %c0_i32_0 : i32, i32, i32
  }
}

</mosaic_0001>

<bundles_post_ra>
// kernel: inference_composition.1
= control target key start
LH: loop header
LB: loop body
LE: loop exit
PB: predicated region body
PF: predicated region fallthrough
CT: control target
= control target key end

     0   :  { %s4750_s0 = inlined_call_operand.vmem [shape: bf16[2,8,16,32], index: 0, kind: input, shape index: {}, may-alias: {0,1}]   ;;  %s4751_s1 = inlined_call_operand.vmem [shape: bf16[2,8,16,32], index: 1, kind: input, shape index: {}, may-alias: {0,1}]   ;;  %s4752_s2 = inlined_call_operand.vmem [shape: bf16[32,512], index: 2, kind: input, shape index: {}]   ;;  %s4753_s3 = inlined_call_operand.vmem [shape: bf16[32,512], index: 3, kind: input, shape index: {}]   ;;  %s4754_s4 = inlined_call_operand.vmem [shape: f32[1,512], index: 4, kind: input, shape index: {}]   ;;  %s4755_s5 = inlined_call_operand.vmem [shape: f32[1,512], index: 5, kind: input, shape index: {}]   ;;  %s4756_s6 = inlined_call_operand.hbm [shape: f32[128,512], index: 6, kind: input, shape index: {}]   ;;  %s4757_s7 = inlined_call_operand.hbm [shape: f32[128,512], index: 7, kind: input, shape index: {}]   ;;  %s4758_s8 = inlined_call_operand.vmem [shape: f32[2,16,512], index: 8, kind: output, shape index: {}]  }
   0x1   :  { %4938 = sst [smem:[#allocation156_spill]] %s4756_s6 }
   0x2   :  { %4939 = sst [smem:[#allocation157_spill]] %s4757_s7 }
   0x3   :  { %13 = vsyncpa [#allocation11], 0 }
   0x4   :  { %14 = vsyncpa [#allocation13], 0  ;;  %s3043_s27 = smov 0   ;;  %s3045_s28 = smov 0  }
   0x5   :  { %s3047_s29 = smov 0   ;;  %s3049_s30 = smov 0  }
   0x6   :  { %s3051_s9 = smov 0  }
   0x7 LB: > { %s2355_s10 = sadd.s32 4294967295, %s2990_s9   ;;  %s29_s11 = sadd.s32 1, %s2982_s29  ;;  %s2990_s9 = sphi %s3051_s9, %s20_s9   ;;  %s2986_s30 = sphi %s3049_s30, %s5369_s30   ;;  %s2982_s29 = sphi %s3047_s29, %s5368_s29   ;;  %s2978_s28 = sphi %s3045_s28, %s5367_s28   ;;  %s2974_s27 = sphi %s3043_s27, %s5366_s27  }
   0x8   : > { %p30_p0 = scmp.ge.s32.totalorder %s29_s11, 2  ;;  %s32_s12 = sadd.s32 1, %s2986_s30 }
   0x9   : > { %p2357_p1 = scmp.ge.s32.totalorder %s2990_s9, 1  ;;  %p247_p2 = scmp.lt.s32.totalorder %s2990_s9, 5 }
   0xa   : > { %s5371_s11 = smov (%p30_p0, %s29_s11), 0  ;;  %s5373_s12 = smov (!%p30_p0, %s32_s12), %s2986_s30 }
   0xb   : > { %p3076_p3 = pnand %p2357_p1, %p247_p2  ;;  %p34_p4 = scmp.ge.s32.totalorder %s5373_s12, 2 }
   0xc   : > { %p3080_p5 = scmp.eq.s32.totalorder %s2355_s10, 0  ;;  %s4942_s6 = sld [smem:[#allocation156_spill]] }
   0xd   : > { %p2539_p6 = pneg %p3076_p3  ;;  %s5375_s12 = smov (%p34_p4, %s5373_s12), 0 }
   0xe   : > { %s2992_s18 = smov [#allocation10]   ;;  %s2993_s20 = smov 512  }
   0xf   : > { %s272_s19 = sshll.u32 %s2992_s18, 4  ;;  %p2540_p7 = pnand %p3080_p5, %p2539_p6  ;;  %s273_s19 = int_to_ptr.vmem [resolvable:$true] %s272_s19 }
  0x10   : > { %s2994_s21 = smov 32   ;;  %s4943_s7 = sld [smem:[#allocation157_spill]] }
  0x11   : > { %s2995_s25 = smov [#allocation12]  }
  0x12   : > { %s270_s17 = sshll.u32 %s4942_s6, 4  ;;  %s286_s26 = sshll.u32 %s2995_s25, 4  ;;  %s271_s17 = int_to_ptr.hbm [resolvable:$true] %s270_s17  ;;  %s287_s26 = int_to_ptr.vmem [resolvable:$true] %s286_s26 }
  0x13   : > { %2542 = dma.hbm_to_vmem [thread:$0]  (!%p2540_p7), %s271_s17, 8192, %s273_s19, [#allocation11], %s2993_s20, %s2993_s20, %s2994_s21  }
  0x14   : > { %332 = sbr.rel (%p3076_p3) target bundleno = 858 (0x35a), region = 52 }
  0x16   : > { %s284_s24 = sshll.u32 %s4943_s7, 4  ;;  %s285_s24 = int_to_ptr.hbm [resolvable:$true] %s284_s24 }
  0x17   : > { %2545 = dma.hbm_to_vmem [thread:$0]  (!%p2540_p7), %s285_s24, 8192, %s287_s26, [#allocation13], %s2993_s20, %s2993_s20, %s2994_s21  }
  0x19   : > { %2965 = dma.done.wait (%p3080_p5), [#allocation11], 8192  }
  0x1a   : > { %2967 = vsyncadd (%p3080_p5), [#allocation11], 4294959104 }
  0x1b   : > { %2969 = dma.done.wait (%p3080_p5), [#allocation13], 8192  }
  0x1c   : > { %2971 = vsyncadd (%p3080_p5), [#allocation13], 4294959104  ;;  %s2364_s10 = sshll.u32 %s2974_s27, 2  ;;  %p389_p8 = scmp.lt.s32.totalorder %s2978_s28, 1 }
  0x1d   : > { %p391_p9 = scmp.lt.s32.totalorder %s2364_s10, 7  ;;  %s399_s13 = ssub.s32 1, %s2974_s27 }
  0x1e   : > { %s5377_s28 = smov (!%p389_p8, %s2978_s28), 1  ;;  %s2368_s16 = sshll.u32 %s399_s13, 2 }
  0x1f   : > { %s5379_s10 = smov (!%p391_p9, %s2364_s10), 7  ;;  %s2366_s15 = sshll.u32 %s5377_s28, 4 }
  0x20   : > { %s2365_s17 = sshll.u32 %s5379_s10, 1  ;;  %p403_p10 = scmp.lt.s32.totalorder %s2368_s16, 7 }
  0x21   : > { %s395_s18 = sadd.s32 %s2366_s15, %s2365_s17  ;;  %s2506_s19 = sshll.u32 %s5377_s28, 6 }
  0x22   : > { %s2367_s20 = sshll.u32 %s395_s18, 2  ;;  %s3113_s22 = scalar_lea.vmem %s4758_s8, %s2506_s19 }
  0x23   : > { %s3118_s25 = scalar_lea.vmem %s4750_s0, %s2367_s20  ;;  %s5381_s16 = smov (!%p403_p10, %s2368_s16), 7 }
  0x24   : > { %s2369_s26 = sshll.u32 %s5381_s16, 1  ;;  %p2374_p11 = scmp.ne.s32.totalorder %s2974_s27, 0 }
  0x25   : > { %s407_s6 = sadd.s32 %s2369_s26, %s2366_s15 }
  0x26   : > { %s2371_s7 = sshll.u32 %s407_s6, 2  ;;  %421 = sbr.rel (%p2374_p11) target bundleno = 60 (0x3c), region = 64 }
  0x27   : > { %s3123_s17 = scalar_lea.vmem %s4751_s1, %s2371_s7 }
  0x2b   : > { %v2996_v0 = vmov 0.0   ;;  %v2997_v1 = vmov -inf  }
  0x2c   : > { %422 = vst [vmem:[#allocation2] sm:$0xff] %v2996_v0 }
  0x2d   : > { %423 = vst [vmem:[#allocation2 + $0x8] sm:$0xff] %v2996_v0 }
  0x2e   : > { %424 = vst [vmem:[#allocation3 + $0x8] sm:$0xff] %v2996_v0 }
  0x2f   : > { %425 = vst [vmem:[#allocation3] sm:$0xff] %v2996_v0 }
  0x30   : > { %426 = vst [vmem:[#allocation4 + $0x8] sm:$0xff] %v2996_v0 }
  0x31   : > { %427 = vst [vmem:[#allocation4] sm:$0xff] %v2996_v0 }
  0x32   : > { %428 = vst [vmem:[#allocation5] sm:$0xff] %v2996_v0 }
  0x33   : > { %429 = vst [vmem:[#allocation5 + $0x8] sm:$0xff] %v2996_v0 }
  0x34   : > { %430 = vst [vmem:[#allocation6] sm:$0xff] %v2996_v0 }
  0x35   : > { %431 = vst [vmem:[#allocation6 + $0x8] sm:$0xff] %v2996_v0 }
  0x36   : > { %432 = vst [vmem:[#allocation7 + $0x8] sm:$0xff] %v2996_v0 }
  0x37   : > { %433 = vst [vmem:[#allocation7] sm:$0xff] %v2996_v0 }
  0x38   : > { %434 = vst [vmem:[#allocation8] sm:$0xff] %v2997_v1 }
  0x39   : > { %435 = vst [vmem:[#allocation8 + $0x8] sm:$0xff] %v2997_v1 }
  0x3a   : > { %436 = vst [vmem:[#allocation9] sm:$0xff] %v2997_v1 }
  0x3b   : > { %437 = vst [vmem:[#allocation9 + $0x8] sm:$0xff] %v2997_v1 }
  0x3c PF: > { %v2409_v2 = vld [vmem:[%s4752_s2 + $0x20] sm:$0xf]  ;;  %v2521_v3 = vld [vmem:[%s4752_s2 + $0x2c] sm:$0xf0]  ;;  %v2519_v4 = vld [vmem:[%s4752_s2 + $0x24] sm:$0xf] }
  0x3d   : > { %v2410_v5 = vor.u32 %v2521_v3, %v2409_v2  ;;  %v2411_v6 = vld [vmem:[%s4752_s2 + $0x30] sm:$0xf0]  ;;  %v2417_v7 = vld [vmem:[%s4752_s2 + $0x28] sm:$0xf]  ;;  %v2522_v8 = vld [vmem:[%s4752_s2 + $0x34] sm:$0xf0] }
  0x3e   : > { %v2414_v9 = vor.u32 %v2519_v4, %v2411_v6  ;;  %v2418_v10 = vor.u32 %v2522_v8, %v2417_v7  ;;  %v2520_v11 = vld [vmem:[%s4752_s2 + $0x2c] sm:$0xf]  ;;  %v2419_v12 = vld [vmem:[%s4752_s2 + $0x38] sm:$0xf0]  ;;  %v2393_v13 = vld [vmem:[%s4752_s2] sm:$0xf] }
  0x3f   : > { %551 = vmatpush.bf16.msra.mxu0 %v2410_v5  ;;  %v2422_v14 = vor.u32 %v2520_v11, %v2419_v12  ;;  %v2517_v15 = vld [vmem:[%s4752_s2 + $0xc] sm:$0xf0]  ;;  %v2515_v16 = vld [vmem:[%s4752_s2 + $0x4] sm:$0xf]  ;;  %v2395_v17 = vld [vmem:[%s4752_s2 + $0x10] sm:$0xf0] }
  0x40   : > { %580 = vmatpush.bf16.msra.mxu1 %v2414_v9  ;;  %609 = vmatpush.bf16.msra.mxu2 %v2418_v10  ;;  %v2394_v18 = vor.u32 %v2517_v15, %v2393_v13  ;;  %v2398_v19 = vor.u32 %v2515_v16, %v2395_v17  ;;  %v2401_v20 = vld [vmem:[%s4752_s2 + $0x8] sm:$0xf]  ;;  %v2518_v21 = vld [vmem:[%s4752_s2 + $0x14] sm:$0xf0]  ;;  %v2516_v22 = vld [vmem:[%s4752_s2 + $0xc] sm:$0xf] }
  0x41   : > { %638 = vmatpush.bf16.msra.mxu3 %v2422_v14  ;;  %v2402_v23 = vor.u32 %v2518_v21, %v2401_v20  ;;  %v2403_v24 = vld [vmem:[%s4752_s2 + $0x18] sm:$0xf0]  ;;  %v2507_v25 = vld [vmem:[%s3118_s25] sm:$0xff]  ;;  %vm532_vm0 = vcmask 261120   ;;  %v2529_v28 = vld [vmem:[%s4753_s3 + $0x2c] sm:$0xf0] }
  0x42   : > { %v2473_v26 = vld [vmem:[%s4753_s3 + $0x20] sm:$0xf]  ;;  %v2406_v27 = vor.u32 %v2516_v22, %v2403_v24  ;;  %v2527_v29 = vld [vmem:[%s4753_s3 + $0x24] sm:$0xf]  ;;  %v2475_v30 = vld [vmem:[%s4753_s3 + $0x30] sm:$0xf0] }
  0x43   : > { %552 = vmatpush.bf16.msra.mxu0 %v2394_v18  ;;  %v2474_v31 = vor.u32 %v2529_v28, %v2473_v26  ;;  %v2478_v32 = vor.u32 %v2527_v29, %v2475_v30  ;;  %v2481_v33 = vld [vmem:[%s4753_s3 + $0x28] sm:$0xf]  ;;  %v2530_v34 = vld [vmem:[%s4753_s3 + $0x34] sm:$0xf0]  ;;  %v2528_v35 = vld [vmem:[%s4753_s3 + $0x2c] sm:$0xf] }
  0x44   : > { %581 = vmatpush.bf16.msra.mxu1 %v2398_v19  ;;  %610 = vmatpush.bf16.msra.mxu2 %v2402_v23  ;;  %v2482_v36 = vor.u32 %v2530_v34, %v2481_v33  ;;  %v2483_v37 = vld [vmem:[%s4753_s3 + $0x38] sm:$0xf0]  ;;  %v2457_v39 = vld [vmem:[%s4753_s3] sm:$0xf]  ;;  %v2525_v40 = vld [vmem:[%s4753_s3 + $0xc] sm:$0xf0] }
  0x45   : > { %639 = vmatpush.bf16.msra.mxu3 %v2406_v27  ;;  %v2486_v38 = vor.u32 %v2528_v35, %v2483_v37  ;;  %v2523_v41 = vld [vmem:[%s4753_s3 + $0x4] sm:$0xf]  ;;  %v2458_v42 = vor.u32 %v2525_v40, %v2457_v39  ;;  %v2459_v43 = vld [vmem:[%s4753_s3 + $0x10] sm:$0xf0]  ;;  %v2465_v44 = vld [vmem:[%s4753_s3 + $0x8] sm:$0xf] }
  0x46   : > { %2423 = vmatmul.msk.bf16.vlgmr.msra.gmra.mxu0 %vm532_vm0, %v2507_v25  ;;  %v2526_v45 = vld [vmem:[%s4753_s3 + $0x14] sm:$0xf0]  ;;  %v2462_v46 = vor.u32 %v2523_v41, %v2459_v43  ;;  %v2524_v48 = vld [vmem:[%s4753_s3 + $0xc] sm:$0xf]  ;;  %v2467_v49 = vld [vmem:[%s4753_s3 + $0x18] sm:$0xf0] }
  0x47   : > { %757 = vmatpush.bf16.msrb.mxu0 %v2474_v31  ;;  %2427 = vmatmul.msk.bf16.vlgmr.msra.gmra.mxu1 %vm532_vm0, %v2507_v25  ;;  %v2466_v47 = vor.u32 %v2526_v45, %v2465_v44  ;;  %v2470_v50 = vor.u32 %v2524_v48, %v2467_v49  ;;  %v2508_v51 = vld [vmem:[%s3118_s25 + $0x8] sm:$0xff]  ;;  %v2509_v52 = vld [vmem:[%s3118_s25 + $0x10] sm:$0xff]  ;;  %v3237_v53 = vld [vmem:[#allocation10 + $0x1e0] sm:$0xff]  ;;  %p2503_p12 = scmp.ne.s32.totalorder %s2974_s27, 1 }
  0x48   : > { %786 = vmatpush.bf16.msrb.mxu1 %v2478_v32  ;;  %2431 = vmatmul.msk.bf16.vlgmr.msra.gmra.mxu2 %vm532_vm0, %v2507_v25  ;;  %v3239_v54 = vld [vmem:[#allocation10 + $0x1e8] sm:$0xff]  ;;  %v3241_v55 = vld [vmem:[#allocation10 + $0x1f0] sm:$0xff]  ;;  %v3245_v56 = vld [vmem:[#allocation10 + $0x1c0] sm:$0xff] }
  0x49   : > { %2435 = vmatmul.msk.bf16.vlgmr.msra.gmra.mxu3 %vm532_vm0, %v2507_v25  ;;  %815 = vmatpush.bf16.msrb.mxu2 %v2482_v36  ;;  %v3247_v57 = vld [vmem:[#allocation10 + $0x1c8] sm:$0xff]  ;;  %v3249_v58 = vld [vmem:[#allocation10 + $0x1d0] sm:$0xff]  ;;  %v3252_v59 = vld [vmem:[#allocation10 + $0x1f8] sm:$0xff] }
  0x4a   : > { %844 = vmatpush.bf16.msrb.mxu3 %v2486_v38  ;;  %v3254_v60 = vld [vmem:[#allocation10 + $0x1a0] sm:$0xff]  ;;  %v3256_v61 = vld [vmem:[#allocation10 + $0x1a8] sm:$0xff]  ;;  %v3260_v62 = vld [vmem:[#allocation10 + $0x1b0] sm:$0xff] }
  0x4b   : > { %758 = vmatpush.bf16.msrb.mxu0 %v2458_v42  ;;  %v3262_v63 = vld [vmem:[#allocation10 + $0x1d8] sm:$0xff]  ;;  %v3266_v0 = vld [vmem:[#allocation10 + $0x180] sm:$0xff]  ;;  %v3268_v1 = vld [vmem:[#allocation10 + $0x188] sm:$0xff] }
  0x4c   : > { %787 = vmatpush.bf16.msrb.mxu1 %v2462_v46  ;;  %v3272_v2 = vld [vmem:[#allocation10 + $0x190] sm:$0xff]  ;;  %v3274_v3 = vld [vmem:[#allocation10 + $0x1b8] sm:$0xff]  ;;  %v3287_v5 = vld [vmem:[#allocation10 + $0x160] sm:$0xff] }
  0x4d   : > { %816 = vmatpush.bf16.msrb.mxu2 %v2466_v47  ;;  %v2510_v4 = vld [vmem:[%s3118_s25 + $0x18] sm:$0xff]  ;;  %v3289_v6 = vld [vmem:[#allocation10 + $0x168] sm:$0xff]  ;;  %v3291_v7 = vld [vmem:[#allocation10 + $0x170] sm:$0xff] }
  0x4e   : > { %845 = vmatpush.bf16.msrb.mxu3 %v2470_v50  ;;  %v3295_v8 = vld [vmem:[#allocation10 + $0x198] sm:$0xff]  ;;  %v3297_v9 = vld [vmem:[#allocation10 + $0x140] sm:$0xff]  ;;  %v3299_v10 = vld [vmem:[#allocation10 + $0x148] sm:$0xff] }
  0x4f   : > { %1036 = vmatpush.msra.mxu0 %v3237_v53  ;;  %v3303_v11 = vld [vmem:[#allocation10 + $0x150] sm:$0xff]  ;;  %v3305_v12 = vld [vmem:[#allocation10 + $0x178] sm:$0xff]  ;;  %v3307_v13 = vld [vmem:[#allocation10 + $0x120] sm:$0xff] }
  0x50   : > { %1059 = vmatpush.msra.mxu1 %v3239_v54  ;;  %v3311_v14 = vld [vmem:[#allocation10 + $0x128] sm:$0xff]  ;;  %v3313_v15 = vld [vmem:[#allocation10 + $0x130] sm:$0xff]  ;;  %v3315_v16 = vld [vmem:[#allocation10 + $0x158] sm:$0xff] }
  0x51   : > { %1082 = vmatpush.msra.mxu2 %v3241_v55  ;;  %1037 = vmatpush.msra.mxu0 %v3245_v56  ;;  %v3319_v17 = vld [vmem:[#allocation10 + $0x100] sm:$0xff]  ;;  %v3321_v18 = vld [vmem:[#allocation10 + $0x108] sm:$0xff]  ;;  %v3325_v19 = vld [vmem:[#allocation10 + $0x110] sm:$0xff] }
  0x52   : > { %1060 = vmatpush.msra.mxu1 %v3247_v57  ;;  %1105 = vmatpush.msra.mxu3 %v3252_v59  ;;  %v3327_v20 = vld [vmem:[#allocation10 + $0x138] sm:$0xff]  ;;  %v2511_v21 = vld [vmem:[%s3123_s17] sm:$0xff]  ;;  %v3344_v24 = vld [vmem:[#allocation10 + $0xe8] sm:$0xff] }
  0x53   : > { %1083 = vmatpush.msra.mxu2 %v3249_v58  ;;  %1038 = vmatpush.msra.mxu0 %v3254_v60  ;;  %v3339_v22 = vld [vmem:[#allocation10 + $0x118] sm:$0xff]  ;;  %v3342_v23 = vld [vmem:[#allocation10 + $0xe0] sm:$0xff]  ;;  %v3346_v25 = vld [vmem:[#allocation10 + $0xf0] sm:$0xff] }
  0x54   : > { %1061 = vmatpush.msra.mxu1 %v3256_v61  ;;  %1106 = vmatpush.msra.mxu3 %v3262_v63  ;;  %v3350_v26 = vld [vmem:[#allocation10 + $0xf8] sm:$0xff]  ;;  %v3352_v27 = vld [vmem:[#allocation10 + $0xc0] sm:$0xff]  ;;  %v3354_v28 = vld [vmem:[#allocation10 + $0xc8] sm:$0xff] }
  0x55   : > { %1084 = vmatpush.msra.mxu2 %v3260_v62  ;;  %1039 = vmatpush.msra.mxu0 %v3266_v0  ;;  %v3358_v29 = vld [vmem:[#allocation10 + $0xd0] sm:$0xff]  ;;  %v3360_v30 = vld [vmem:[#allocation10 + $0xa0] sm:$0xff]  ;;  %v3364_v31 = vld [vmem:[#allocation10 + $0xd8] sm:$0xff] }
  0x56   : > { %2424 = vmatmul.msk.bf16.gmra.mxu0 %vm532_vm0, %v2508_v51  ;;  %1062 = vmatpush.msra.mxu1 %v3268_v1  ;;  %v3366_v32 = vld [vmem:[#allocation10 + $0xa8] sm:$0xff]  ;;  %v3368_v33 = vld [vmem:[#allocation10 + $0xb0] sm:$0xff]  ;;  %v3372_v34 = vld [vmem:[#allocation10 + $0x80] sm:$0xff] }
  0x57   : > { %2428 = vmatmul.msk.bf16.gmra.mxu1 %vm532_vm0, %v2508_v51  ;;  %1085 = vmatpush.msra.mxu2 %v3272_v2  ;;  %v3374_v35 = vld [vmem:[#allocation10 + $0x88] sm:$0xff]  ;;  %v3378_v36 = vld [vmem:[#allocation10 + $0xb8] sm:$0xff]  ;;  %v3380_v37 = vld [vmem:[#allocation10 + $0x90] sm:$0xff] }
  0x58   : > { %2432 = vmatmul.msk.bf16.gmra.mxu2 %vm532_vm0, %v2508_v51  ;;  %1107 = vmatpush.msra.mxu3 %v3274_v3  ;;  %v3384_v38 = vld [vmem:[#allocation10 + $0x60] sm:$0xff]  ;;  %v3386_v39 = vld [vmem:[#allocation10 + $0x68] sm:$0xff]  ;;  %v3390_v40 = vld [vmem:[#allocation10 + $0x98] sm:$0xff] }
  0x59   : > { %2436 = vmatmul.msk.bf16.gmra.mxu3 %vm532_vm0, %v2508_v51  ;;  %1040 = vmatpush.msra.mxu0 %v3287_v5  ;;  %v3392_v41 = vld [vmem:[#allocation10 + $0x70] sm:$0xff]  ;;  %v3396_v42 = vld [vmem:[#allocation10 + $0x40] sm:$0xff]  ;;  %v3398_v43 = vld [vmem:[#allocation10 + $0x48] sm:$0xff] }
  0x5a   : > { %1063 = vmatpush.msra.mxu1 %v3289_v6  ;;  %1086 = vmatpush.msra.mxu2 %v3291_v7  ;;  %4944 = vst [vmem:[#allocation16_spill] sm:$0xff] %v3398_v43  ;;  %v3402_v44 = vld [vmem:[#allocation10 + $0x78] sm:$0xff]  ;;  %v3404_v45 = vld [vmem:[#allocation10 + $0x50] sm:$0xff]  ;;  %v2512_v46 = vld [vmem:[%s3123_s17 + $0x8] sm:$0xff] }
  0x5b   : > { %1108 = vmatpush.msra.mxu3 %v3295_v8  ;;  %1041 = vmatpush.msra.mxu0 %v3297_v9  ;;  %4945 = vst [vmem:[#allocation17_spill] sm:$0xff] %v3404_v45  ;;  %v3409_v47 = vld [vmem:[#allocation10 + $0x20] sm:$0xff]  ;;  %v3411_v48 = vld [vmem:[#allocation10 + $0x28] sm:$0xff]  ;;  %v3415_v49 = vld [vmem:[#allocation10 + $0x58] sm:$0xff] }
  0x5c   : > { %1064 = vmatpush.msra.mxu1 %v3299_v10  ;;  %1087 = vmatpush.msra.mxu2 %v3303_v11  ;;  %4946 = vst [vmem:[#allocation18_spill] sm:$0xff] %v3409_v47  ;;  %v3421_v50 = vld [vmem:[#allocation10 + $0x30] sm:$0xff]  ;;  %v3425_v51 = vld [vmem:[#allocation10 + $0x38] sm:$0xff] }
  0x5d   : > { %1109 = vmatpush.msra.mxu3 %v3305_v12  ;;  %1042 = vmatpush.msra.mxu0 %v3307_v13  ;;  %4947 = vst [vmem:[#allocation19_spill] sm:$0xff] %v3411_v48 }
  0x5e   : > { %1065 = vmatpush.msra.mxu1 %v3311_v14  ;;  %1088 = vmatpush.msra.mxu2 %v3313_v15  ;;  %4948 = vst [vmem:[#allocation20_spill] sm:$0xff] %v3415_v49 }
  0x5f   : > { %1110 = vmatpush.msra.mxu3 %v3315_v16  ;;  %1043 = vmatpush.msra.mxu0 %v3319_v17  ;;  %4949 = vst [vmem:[#allocation21_spill] sm:$0xff] %v3421_v50 }
  0x60   : > { %1066 = vmatpush.msra.mxu1 %v3321_v18  ;;  %1089 = vmatpush.msra.mxu2 %v3325_v19  ;;  %4950 = vst [vmem:[#allocation22_spill] sm:$0xff] %v3425_v51 }
  0x61   : > { %1111 = vmatpush.msra.mxu3 %v3327_v20  ;;  %1044 = vmatpush.msra.mxu0 %v3342_v23 }
  0x62   : > { %1067 = vmatpush.msra.mxu1 %v3344_v24  ;;  %1090 = vmatpush.msra.mxu2 %v3346_v25 }
  0x63   : > { %1112 = vmatpush.msra.mxu3 %v3339_v22  ;;  %1045 = vmatpush.msra.mxu0 %v3352_v27 }
  0x64   : > { %1068 = vmatpush.msra.mxu1 %v3354_v28  ;;  %1091 = vmatpush.msra.mxu2 %v3358_v29 }
  0x65   : > { %1113 = vmatpush.msra.mxu3 %v3350_v26  ;;  %1046 = vmatpush.msra.mxu0 %v3360_v30 }
  0x66   : > { %2425 = vmatmul.msk.bf16.gmra.mxu0 %vm532_vm0, %v2509_v52  ;;  %1069 = vmatpush.msra.mxu1 %v3366_v32 }
  0x67   : > { %2429 = vmatmul.msk.bf16.gmra.mxu1 %vm532_vm0, %v2509_v52  ;;  %1114 = vmatpush.msra.mxu3 %v3364_v31 }
  0x68   : > { %2433 = vmatmul.msk.bf16.gmra.mxu2 %vm532_vm0, %v2509_v52  ;;  %1047 = vmatpush.msra.mxu0 %v3372_v34 }
  0x69   : > { %2437 = vmatmul.msk.bf16.gmra.mxu3 %vm532_vm0, %v2509_v52  ;;  %1092 = vmatpush.msra.mxu2 %v3368_v33  ;;  %v3429_v52 = vld [vmem:[#allocation10] sm:$0xff] }
  0x6a   : > { %1070 = vmatpush.msra.mxu1 %v3374_v35  ;;  %1115 = vmatpush.msra.mxu3 %v3378_v36  ;;  %4951 = vst [vmem:[#allocation23_spill] sm:$0xff] %v3429_v52 }
  0x6b   : > { %1093 = vmatpush.msra.mxu2 %v3380_v37  ;;  %1048 = vmatpush.msra.mxu0 %v3384_v38 }
  0x6c   : > { %1071 = vmatpush.msra.mxu1 %v3386_v39  ;;  %1116 = vmatpush.msra.mxu3 %v3390_v40 }
  0x6d   : > { %1094 = vmatpush.msra.mxu2 %v3392_v41  ;;  %1049 = vmatpush.msra.mxu0 %v3396_v42 }
  0x6e   : > { %1072 = vmatpush.msra.mxu1 %v3398_v43  ;;  %1117 = vmatpush.msra.mxu3 %v3402_v44  ;;  %v3449_v43 = vld [vmem:[#allocation12 + $0x1f8] sm:$0xff] }
  0x6f   : > { %1095 = vmatpush.msra.mxu2 %v3404_v45  ;;  %1050 = vmatpush.msra.mxu0 %v3409_v47  ;;  %v3439_v47 = vld [vmem:[#allocation12 + $0x1e0] sm:$0xff]  ;;  %v3445_v45 = vld [vmem:[#allocation12 + $0x1f0] sm:$0xff]  ;;  %4958 = vst [vmem:[#allocation30_spill] sm:$0xff] %v3449_v43 }
  0x70   : > { %1073 = vmatpush.msra.mxu1 %v3411_v48  ;;  %1118 = vmatpush.msra.mxu3 %v3415_v49  ;;  %v3437_v48 = vld [vmem:[#allocation10 + $0x18] sm:$0xff]  ;;  %4955 = vst [vmem:[#allocation27_spill] sm:$0xff] %v3439_v47  ;;  %v3443_v49 = vld [vmem:[#allocation12 + $0x1e8] sm:$0xff] }
  0x71   : > { %1096 = vmatpush.msra.mxu2 %v3421_v50  ;;  %4954 = vst [vmem:[#allocation26_spill] sm:$0xff] %v3437_v48  ;;  %1051 = vmatpush.msra.mxu0 %v3429_v52  ;;  %v3455_v50 = vld [vmem:[#allocation12 + $0x1c8] sm:$0xff]  ;;  %v3461_v52 = vld [vmem:[#allocation12 + $0x1d8] sm:$0xff] }
  0x72   : > { %1119 = vmatpush.msra.mxu3 %v3425_v51  ;;  %4956 = vst [vmem:[#allocation28_spill] sm:$0xff] %v3443_v49  ;;  %v3457_v51 = vld [vmem:[#allocation12 + $0x1d0] sm:$0xff] }
  0x73   : > { %4957 = vst [vmem:[#allocation29_spill] sm:$0xff] %v3445_v45 }
  0x74   : > { %1120 = vmatpush.msra.mxu3 %v3437_v48  ;;  %4960 = vst [vmem:[#allocation32_spill] sm:$0xff] %v3455_v50  ;;  %v3469_v48 = vld [vmem:[#allocation12 + $0x1b0] sm:$0xff] }
  0x75   : > { %4961 = vst [vmem:[#allocation33_spill] sm:$0xff] %v3457_v51 }
  0x76   : > { %2426 = vmatmul.msk.bf16.gmra.mxu0 %vm532_vm0, %v2510_v4  ;;  %4962 = vst [vmem:[#allocation34_spill] sm:$0xff] %v3461_v52 }
  0x77   : > { %2430 = vmatmul.msk.bf16.gmra.mxu1 %vm532_vm0, %v2510_v4  ;;  %4965 = vst [vmem:[#allocation37_spill] sm:$0xff] %v3469_v48 }
  0x78   : > { %2434 = vmatmul.msk.bf16.gmra.mxu2 %vm532_vm0, %v2510_v4 }
  0x79   : > { %2438 = vmatmul.msk.bf16.gmra.mxu3 %vm532_vm0, %v2510_v4  ;;  %v3431_v4 = vld [vmem:[#allocation10 + $0x8] sm:$0xff] }
  0x7a   : > { %4952 = vst [vmem:[#allocation24_spill] sm:$0xff] %v3431_v4  ;;  %1074 = vmatpush.msra.mxu1 %v3431_v4  ;;  %v3463_v4 = vld [vmem:[#allocation12 + $0x1a0] sm:$0xff] }
  0x7b   : > { %4963 = vst [vmem:[#allocation35_spill] sm:$0xff] %v3463_v4 }
  0x86   : > { %2487 = vmatmul.msk.bf16.vlgmr.msrb.gmra.mxu0 %vm532_vm0, %v2511_v21 }
  0x87   : > { %2491 = vmatmul.msk.bf16.vlgmr.msrb.gmra.mxu1 %vm532_vm0, %v2511_v21  ;;  %1178 = vmatpush.msrb.mxu0 %v3439_v47  ;;  %v3487_v47 = vld [vmem:[#allocation12 + $0x160] sm:$0xff] }
  0x88   : > { %2495 = vmatmul.msk.bf16.vlgmr.msrb.gmra.mxu2 %vm532_vm0, %v2511_v21  ;;  %1201 = vmatpush.msrb.mxu1 %v3443_v49  ;;  %v3473_v49 = vld [vmem:[#allocation12 + $0x1b8] sm:$0xff]  ;;  %4971 = vst [vmem:[#allocation43_spill] sm:$0xff] %v3487_v47 }
  0x89   : > { %2499 = vmatmul.msk.bf16.vlgmr.msrb.gmra.mxu3 %vm532_vm0, %v2511_v21  ;;  %v3433_v21 = vld [vmem:[#allocation10 + $0x10] sm:$0xff]  ;;  %4966 = vst [vmem:[#allocation38_spill] sm:$0xff] %v3473_v49 }
  0x8a   : > { %4953 = vst [vmem:[#allocation25_spill] sm:$0xff] %v3433_v21  ;;  %1097 = vmatpush.msra.mxu2 %v3433_v21  ;;  %1247 = vmatpush.msrb.mxu3 %v3449_v43  ;;  %v3467_v21 = vld [vmem:[#allocation12 + $0x1a8] sm:$0xff] }
  0x8b   : > { %4964 = vst [vmem:[#allocation36_spill] sm:$0xff] %v3467_v21  ;;  %1202 = vmatpush.msrb.mxu1 %v3455_v50  ;;  %v3479_v43 = vld [vmem:[#allocation12 + $0x188] sm:$0xff]  ;;  %v3485_v50 = vld [vmem:[#allocation12 + $0x198] sm:$0xff] }
  0x8c   : > { %1224 = vmatpush.msrb.mxu2 %v3445_v45  ;;  %v3475_v45 = vld [vmem:[#allocation12 + $0x180] sm:$0xff]  ;;  %1248 = vmatpush.msrb.mxu3 %v3461_v52  ;;  %4968 = vst [vmem:[#allocation40_spill] sm:$0xff] %v3479_v43  ;;  %v3493_v52 = vld [vmem:[#allocation12 + $0x170] sm:$0xff] }
  0x8d   : > { %4967 = vst [vmem:[#allocation39_spill] sm:$0xff] %v3475_v45  ;;  %1203 = vmatpush.msrb.mxu1 %v3467_v21  ;;  %v3498_v21 = vld [vmem:[#allocation12 + $0x178] sm:$0xff] }
  0x8e   : > { %1225 = vmatpush.msrb.mxu2 %v3457_v51  ;;  %4970 = vst [vmem:[#allocation42_spill] sm:$0xff] %v3485_v50  ;;  %1249 = vmatpush.msrb.mxu3 %v3473_v49  ;;  %v3491_v51 = vld [vmem:[#allocation12 + $0x168] sm:$0xff] }
  0x8f   : > { %4972 = vst [vmem:[#allocation44_spill] sm:$0xff] %v3491_v51  ;;  %1204 = vmatpush.msrb.mxu1 %v3479_v43  ;;  %v3504_v49 = vld [vmem:[#allocation12 + $0x148] sm:$0xff]  ;;  %v3510_v43 = vld [vmem:[#allocation12 + $0x150] sm:$0xff] }
  0x90   : > { %1226 = vmatpush.msrb.mxu2 %v3469_v48  ;;  %4973 = vst [vmem:[#allocation45_spill] sm:$0xff] %v3493_v52  ;;  %v3500_v48 = vld [vmem:[#allocation12 + $0x140] sm:$0xff]  ;;  %1250 = vmatpush.msrb.mxu3 %v3485_v50 }
  0x91   : > { %4974 = vst [vmem:[#allocation46_spill] sm:$0xff] %v3498_v21  ;;  %1205 = vmatpush.msrb.mxu1 %v3491_v51  ;;  %v3516_v50 = vld [vmem:[#allocation12 + $0x120] sm:$0xff]  ;;  %v3520_v51 = vld [vmem:[#allocation12 + $0x128] sm:$0xff] }
  0x92   : > { %4975 = vst [vmem:[#allocation47_spill] sm:$0xff] %v3500_v48  ;;  %1251 = vmatpush.msrb.mxu3 %v3498_v21  ;;  %v3528_v21 = vld [vmem:[#allocation12 + $0x100] sm:$0xff] }
  0x93   : > { %4976 = vst [vmem:[#allocation48_spill] sm:$0xff] %v3504_v49  ;;  %1206 = vmatpush.msrb.mxu1 %v3504_v49  ;;  %v3532_v49 = vld [vmem:[#allocation12 + $0x108] sm:$0xff] }
  0x94   : > { %4977 = vst [vmem:[#allocation49_spill] sm:$0xff] %v3510_v43 }
  0x95   : > { %4979 = vst [vmem:[#allocation51_spill] sm:$0xff] %v3516_v50  ;;  %1207 = vmatpush.msrb.mxu1 %v3520_v51 }
  0x96   : > { %2488 = vmatmul.msk.bf16.gmra.mxu0 %vm532_vm0, %v2512_v46  ;;  %4980 = vst [vmem:[#allocation52_spill] sm:$0xff] %v3520_v51  ;;  %v3552_v51 = vld [vmem:[#allocation12 + $0xc0] sm:$0xff] }
  0x97   : > { %2492 = vmatmul.msk.bf16.gmra.mxu1 %vm532_vm0, %v2512_v46  ;;  %4983 = vst [vmem:[#allocation55_spill] sm:$0xff] %v3528_v21 }
  0x98   : > { %2496 = vmatmul.msk.bf16.gmra.mxu2 %vm532_vm0, %v2512_v46  ;;  %4984 = vst [vmem:[#allocation56_spill] sm:$0xff] %v3532_v49  ;;  %1208 = vmatpush.msrb.mxu1 %v3532_v49  ;;  %v3562_v49 = vld [vmem:[#allocation12 + $0xd8] sm:$0xff] }
  0x99   : > { %2500 = vmatmul.msk.bf16.gmra.mxu3 %vm532_vm0, %v2512_v46  ;;  %v3451_v46 = vld [vmem:[#allocation12 + $0x1c0] sm:$0xff]  ;;  %4991 = vst [vmem:[#allocation63_spill] sm:$0xff] %v3552_v51 }
  0x9a   : > { %4959 = vst [vmem:[#allocation31_spill] sm:$0xff] %v3451_v46  ;;  %1179 = vmatpush.msrb.mxu0 %v3451_v46  ;;  %v3481_v46 = vld [vmem:[#allocation12 + $0x190] sm:$0xff] }
  0x9b   : > { %4969 = vst [vmem:[#allocation41_spill] sm:$0xff] %v3481_v46  ;;  %1227 = vmatpush.msrb.mxu2 %v3481_v46  ;;  %v3514_v46 = vld [vmem:[#allocation12 + $0x158] sm:$0xff] }
  0x9c   : > { %1180 = vmatpush.msrb.mxu0 %v3463_v4  ;;  %v2513_v4 = vld [vmem:[%s3123_s17 + $0x10] sm:$0xff]  ;;  %4978 = vst [vmem:[#allocation50_spill] sm:$0xff] %v3514_v46  ;;  %1252 = vmatpush.msrb.mxu3 %v3514_v46 }
  0x9d   : > { %1228 = vmatpush.msrb.mxu2 %v3493_v52  ;;  %v3522_v52 = vld [vmem:[#allocation12 + $0x130] sm:$0xff]  ;;  %4994 = vst [vmem:[#allocation66_spill] sm:$0xff] %v3562_v49 }
  0x9e   : > { %1181 = vmatpush.msrb.mxu0 %v3475_v45  ;;  %4981 = vst [vmem:[#allocation53_spill] sm:$0xff] %v3522_v52  ;;  %v3538_v45 = vld [vmem:[#allocation12 + $0x118] sm:$0xff]  ;;  %v3546_v46 = vld [vmem:[#allocation12 + $0xf0] sm:$0xff] }
  0x9f   : > { %1229 = vmatpush.msrb.mxu2 %v3510_v43  ;;  %4986 = vst [vmem:[#allocation58_spill] sm:$0xff] %v3538_v45  ;;  %v3544_v43 = vld [vmem:[#allocation12 + $0xe8] sm:$0xff] }
  0xa0   : > { %1182 = vmatpush.msrb.mxu0 %v3487_v47  ;;  %v3534_v47 = vld [vmem:[#allocation12 + $0x110] sm:$0xff]  ;;  %4988 = vst [vmem:[#allocation60_spill] sm:$0xff] %v3544_v43  ;;  %1209 = vmatpush.msrb.mxu1 %v3544_v43  ;;  %v3574_v43 = vld [vmem:[#allocation12 + $0xb8] sm:$0xff] }
  0xa1   : > { %4985 = vst [vmem:[#allocation57_spill] sm:$0xff] %v3534_v47  ;;  %1230 = vmatpush.msrb.mxu2 %v3522_v52  ;;  %v3556_v52 = vld [vmem:[#allocation12 + $0xc8] sm:$0xff] }
  0xa2   : > { %1183 = vmatpush.msrb.mxu0 %v3500_v48  ;;  %v3526_v48 = vld [vmem:[#allocation12 + $0x138] sm:$0xff]  ;;  %4989 = vst [vmem:[#allocation61_spill] sm:$0xff] %v3546_v46  ;;  %1210 = vmatpush.msrb.mxu1 %v3556_v52 }
  0xa3   : > { %4982 = vst [vmem:[#allocation54_spill] sm:$0xff] %v3526_v48  ;;  %1253 = vmatpush.msrb.mxu3 %v3526_v48  ;;  %1231 = vmatpush.msrb.mxu2 %v3534_v47  ;;  %v3558_v48 = vld [vmem:[#allocation12 + $0xd0] sm:$0xff]  ;;  %v3564_v47 = vld [vmem:[#allocation12 + $0xa0] sm:$0xff] }
  0xa4   : > { %1184 = vmatpush.msrb.mxu0 %v3516_v50  ;;  %v3550_v50 = vld [vmem:[#allocation12 + $0xf8] sm:$0xff]  ;;  %4992 = vst [vmem:[#allocation64_spill] sm:$0xff] %v3556_v52 }
  0xa5   : > { %4990 = vst [vmem:[#allocation62_spill] sm:$0xff] %v3550_v50  ;;  %1254 = vmatpush.msrb.mxu3 %v3538_v45  ;;  %1232 = vmatpush.msrb.mxu2 %v3546_v46  ;;  %v3568_v45 = vld [vmem:[#allocation12 + $0xa8] sm:$0xff]  ;;  %v3587_v52 = vld [vmem:[#allocation12 + $0x98] sm:$0xff] }
  0xa6   : > { %2489 = vmatmul.msk.bf16.gmra.mxu0 %vm532_vm0, %v2513_v4  ;;  %4993 = vst [vmem:[#allocation65_spill] sm:$0xff] %v3558_v48  ;;  %v3580_v46 = vld [vmem:[#allocation12 + $0x88] sm:$0xff]  ;;  %1211 = vmatpush.msrb.mxu1 %v3568_v45 }
  0xa7   : > { %2493 = vmatmul.msk.bf16.gmra.mxu1 %vm532_vm0, %v2513_v4  ;;  %1185 = vmatpush.msrb.mxu0 %v3528_v21  ;;  %4995 = vst [vmem:[#allocation67_spill] sm:$0xff] %v3564_v47  ;;  %v3576_v21 = vld [vmem:[#allocation12 + $0x80] sm:$0xff] }
  0xa8   : > { %2497 = vmatmul.msk.bf16.gmra.mxu2 %vm532_vm0, %v2513_v4  ;;  %1255 = vmatpush.msrb.mxu3 %v3550_v50  ;;  %4996 = vst [vmem:[#allocation68_spill] sm:$0xff] %v3568_v45  ;;  %v3582_v50 = vld [vmem:[#allocation12 + $0x90] sm:$0xff] }
  0xa9   : > { %2501 = vmatmul.msk.bf16.gmra.mxu3 %vm532_vm0, %v2513_v4  ;;  %v3540_v4 = vld [vmem:[#allocation12 + $0xe0] sm:$0xff]  ;;  %1233 = vmatpush.msrb.mxu2 %v3558_v48  ;;  %4998 = vst [vmem:[#allocation70_spill] sm:$0xff] %v3574_v43  ;;  %v3599_v45 = vld [vmem:[#allocation12 + $0x70] sm:$0xff] }
  0xaa   : > { %4987 = vst [vmem:[#allocation59_spill] sm:$0xff] %v3540_v4  ;;  %1186 = vmatpush.msrb.mxu0 %v3540_v4  ;;  %v3570_v4 = vld [vmem:[#allocation12 + $0xb0] sm:$0xff]  ;;  %1256 = vmatpush.msrb.mxu3 %v3562_v49  ;;  %v3589_v48 = vld [vmem:[#allocation12 + $0x60] sm:$0xff]  ;;  %v3593_v49 = vld [vmem:[#allocation12 + $0x68] sm:$0xff] }
  0xab   : > { %4997 = vst [vmem:[#allocation69_spill] sm:$0xff] %v3570_v4  ;;  %1234 = vmatpush.msrb.mxu2 %v3570_v4  ;;  %1212 = vmatpush.msrb.mxu1 %v3580_v46  ;;  %v3603_v4 = vld [vmem:[#allocation12 + $0x78] sm:$0xff] }
  0xac   : > { %1187 = vmatpush.msrb.mxu0 %v3552_v51  ;;  %4999 = vst [vmem:[#allocation71_spill] sm:$0xff] %v3576_v21  ;;  %v2514_v51 = vld [vmem:[%s3123_s17 + $0x18] sm:$0xff]  ;;  %1257 = vmatpush.msrb.mxu3 %v3574_v43  ;;  %v3605_v43 = vld [vmem:[#allocation12 + $0x40] sm:$0xff] }
  0xad   : > { %5000 = vst [vmem:[#allocation72_spill] sm:$0xff] %v3580_v46  ;;  %1235 = vmatpush.msrb.mxu2 %v3582_v50  ;;  %1213 = vmatpush.msrb.mxu1 %v3593_v49  ;;  %v3609_v46 = vld [vmem:[#allocation12 + $0x48] sm:$0xff] }
  0xae   : > { %1188 = vmatpush.msrb.mxu0 %v3564_v47  ;;  %5001 = vst [vmem:[#allocation73_spill] sm:$0xff] %v3582_v50  ;;  %1258 = vmatpush.msrb.mxu3 %v3587_v52  ;;  %v3611_v50 = vld [vmem:[#allocation12 + $0x50] sm:$0xff]  ;;  %v3627_v47 = vld [vmem:[#allocation12 + $0x38] sm:$0xff] }
  0xaf   : > { %5002 = vst [vmem:[#allocation74_spill] sm:$0xff] %v3587_v52  ;;  %1236 = vmatpush.msrb.mxu2 %v3599_v45  ;;  %v3617_v52 = vld [vmem:[#allocation12 + $0x20] sm:$0xff]  ;;  %1214 = vmatpush.msrb.mxu1 %v3609_v46 }
  0xb0   : > { %5003 = vst [vmem:[#allocation75_spill] sm:$0xff] %v3589_v48  ;;  %1189 = vmatpush.msrb.mxu0 %v3576_v21  ;;  %1259 = vmatpush.msrb.mxu3 %v3603_v4  ;;  %v3623_v21 = vld [vmem:[#allocation12 + $0x30] sm:$0xff] }
  0xb1   : > { %5004 = vst [vmem:[#allocation76_spill] sm:$0xff] %v3593_v49  ;;  %v3621_v49 = vld [vmem:[#allocation12 + $0x28] sm:$0xff]  ;;  %1237 = vmatpush.msrb.mxu2 %v3611_v50 }
  0xb2   : > { %1190 = vmatpush.msrb.mxu0 %v3589_v48  ;;  %5005 = vst [vmem:[#allocation77_spill] sm:$0xff] %v3599_v45  ;;  %v3615_v48 = vld [vmem:[#allocation12 + $0x58] sm:$0xff]  ;;  %v3633_v45 = vld [vmem:[#allocation12 + $0x8] sm:$0xff]  ;;  %1215 = vmatpush.msrb.mxu1 %v3621_v49 }
  0xb3   : > { %5006 = vst [vmem:[#allocation78_spill] sm:$0xff] %v3603_v4  ;;  %1260 = vmatpush.msrb.mxu3 %v3615_v48  ;;  %v3635_v4 = vld [vmem:[#allocation12 + $0x10] sm:$0xff]  ;;  %1238 = vmatpush.msrb.mxu2 %v3623_v21 }
  0xb4   : > { %5007 = vst [vmem:[#allocation79_spill] sm:$0xff] %v3605_v43  ;;  %1191 = vmatpush.msrb.mxu0 %v3605_v43  ;;  %v3639_v43 = vld [vmem:[#allocation12 + $0x18] sm:$0xff]  ;;  %1216 = vmatpush.msrb.mxu1 %v3633_v45 }
  0xb5   : > { %5008 = vst [vmem:[#allocation80_spill] sm:$0xff] %v3611_v50  ;;  %1261 = vmatpush.msrb.mxu3 %v3627_v47  ;;  %1239 = vmatpush.msrb.mxu2 %v3635_v4 }
  0xb6   : > { %2490 = vmatmul.msk.bf16.gmra.mxu0 %vm532_vm0, %v2514_v51  ;;  %5009 = vst [vmem:[#allocation81_spill] sm:$0xff] %v3615_v48  ;;  %v1020_v48 = vld [vmem:[#allocation2] sm:$0xff] }
  0xb7   : > { %2494 = vmatmul.msk.bf16.gmra.mxu1 %vm532_vm0, %v2514_v51  ;;  %5010 = vst [vmem:[#allocation82_spill] sm:$0xff] %v3617_v52  ;;  %1192 = vmatpush.msrb.mxu0 %v3617_v52 }
  0xb8   : > { %2498 = vmatmul.msk.bf16.gmra.mxu2 %vm532_vm0, %v2514_v51  ;;  %5011 = vst [vmem:[#allocation83_spill] sm:$0xff] %v3633_v45  ;;  %1262 = vmatpush.msrb.mxu3 %v3639_v43 }
  0xb9   : > { %2502 = vmatmul.msk.bf16.gmra.mxu3 %vm532_vm0, %v2514_v51  ;;  %v3629_v51 = vld [vmem:[#allocation12] sm:$0xff]  ;;  %5012 = vst [vmem:[#allocation84_spill] sm:$0xff] %v3639_v43 }
  0xba   : > { %1193 = vmatpush.msrb.mxu0 %v3629_v51 }
  0xc3   : > { %v3646_v52 = vpop.f32.mrf.mxu0 }
  0xc4   : > { %5013 = vst [vmem:[#allocation85_spill] sm:$0xff] %v3646_v52  ;;  %v3648_v50 = vpop.f32.mrf.mxu1 }
  0xc5   : > { %5014 = vst [vmem:[#allocation86_spill] sm:$0xff] %v3648_v50  ;;  %v1021_v50 = vld [vmem:[#allocation2 + $0x8] sm:$0xff] }
  0xc6   : > { %1052 = vmatmul.f32.vlgmr.msra.gmra.mxu0 %v1020_v48 }
  0xc7   : > { %1075 = vmatmul.f32.vlgmr.msra.gmra.mxu1 %v1020_v48  ;;  %1328 = vmatpush.msra.mxu0 %v3237_v53 }
  0xc8   : > { %1098 = vmatmul.f32.vlgmr.msra.gmra.mxu2 %v1020_v48  ;;  %1351 = vmatpush.msra.mxu1 %v3239_v54 }
  0xc9   : > { %1121 = vmatmul.f32.vlgmr.msra.gmra.mxu3 %v1020_v48  ;;  %1374 = vmatpush.msra.mxu2 %v3241_v55  ;;  %v5055_v48 = vld [vmem:[#allocation46_spill] sm:$0xff] }
  0xca   : > { %1397 = vmatpush.msra.mxu3 %v3252_v59  ;;  %1329 = vmatpush.msra.mxu0 %v3245_v56 }
  0xcb   : > { %v3653_v45 = vpop.f32.mrf.mxu2  ;;  %v3659_v43 = vpop.f32.mrf.mxu0  ;;  %1352 = vmatpush.msra.mxu1 %v3247_v57  ;;  %1375 = vmatpush.msra.mxu2 %v3249_v58  ;;  %v1024_v57 = vld [vmem:[#allocation4 + $0x8] sm:$0xff] }
  0xcc   : > { %v3657_v52 = vpop.f32.mrf.mxu3  ;;  %v3663_v53 = vpop.f32.mrf.mxu1  ;;  %1398 = vmatpush.msra.mxu3 %v3262_v63  ;;  %1330 = vmatpush.msra.mxu0 %v3254_v60 }
  0xcd   : > { %1353 = vmatpush.msra.mxu1 %v3256_v61  ;;  %1376 = vmatpush.msra.mxu2 %v3260_v62  ;;  %v1025_v62 = vld [vmem:[#allocation4] sm:$0xff] }
  0xce   : > { %1055 = vmatmul.f32.gmra.mxu0 %v1021_v50  ;;  %1399 = vmatpush.msra.mxu3 %v3274_v3 }
  0xcf   : > { %1078 = vmatmul.f32.gmra.mxu1 %v1021_v50  ;;  %1331 = vmatpush.msra.mxu0 %v3266_v0 }
  0xd0   : > { %1101 = vmatmul.f32.gmra.mxu2 %v1021_v50  ;;  %1354 = vmatpush.msra.mxu1 %v3268_v1 }
  0xd1   : > { %1124 = vmatmul.f32.gmra.mxu3 %v1021_v50  ;;  %1377 = vmatpush.msra.mxu2 %v3272_v2  ;;  %v5056_v50 = vld [vmem:[#allocation47_spill] sm:$0xff] }
  0xd2   : > { %1400 = vmatpush.msra.mxu3 %v3295_v8  ;;  %1332 = vmatpush.msra.mxu0 %v3287_v5  ;;  %v5017_v5 = vld [vmem:[#allocation16_spill] sm:$0xff] }
  0xd3   : > { %v3673_v54 = vpop.f32.mrf.mxu2  ;;  %v3679_v56 = vpop.f32.mrf.mxu0  ;;  %1355 = vmatpush.msra.mxu1 %v3289_v6  ;;  %1378 = vmatpush.msra.mxu2 %v3291_v7  ;;  %v5018_v6 = vld [vmem:[#allocation17_spill] sm:$0xff]  ;;  %v5020_v8 = vld [vmem:[#allocation20_spill] sm:$0xff] }
  0xd4   : > { %v3677_v55 = vpop.f32.mrf.mxu3  ;;  %v3683_v58 = vpop.f32.mrf.mxu1  ;;  %1401 = vmatpush.msra.mxu3 %v3305_v12  ;;  %1333 = vmatpush.msra.mxu0 %v3297_v9  ;;  %v5021_v9 = vld [vmem:[#allocation18_spill] sm:$0xff]  ;;  %v5024_v12 = vld [vmem:[#allocation19_spill] sm:$0xff] }
  0xd5   : > { %1356 = vmatpush.msra.mxu1 %v3299_v10  ;;  %1379 = vmatpush.msra.mxu2 %v3303_v11 }
  0xd6   : > { %1194 = vmatmul.f32.vlgmr.msrb.gmra.mxu0 %v1024_v57  ;;  %1402 = vmatpush.msra.mxu3 %v3315_v16  ;;  %v5028_v16 = vld [vmem:[#allocation23_spill] sm:$0xff] }
  0xd7   : > { %1217 = vmatmul.f32.vlgmr.msrb.gmra.mxu1 %v1024_v57  ;;  %1334 = vmatpush.msra.mxu0 %v3307_v13  ;;  %v5025_v13 = vld [vmem:[#allocation21_spill] sm:$0xff] }
  0xd8   : > { %1240 = vmatmul.f32.vlgmr.msrb.gmra.mxu2 %v1024_v57  ;;  %1357 = vmatpush.msra.mxu1 %v3311_v14 }
  0xd9   : > { %1263 = vmatmul.f32.vlgmr.msrb.gmra.mxu3 %v1024_v57  ;;  %1380 = vmatpush.msra.mxu2 %v3313_v15  ;;  %v5027_v15 = vld [vmem:[#allocation22_spill] sm:$0xff]  ;;  %v5057_v57 = vld [vmem:[#allocation48_spill] sm:$0xff] }
  0xda   : > { %1403 = vmatpush.msra.mxu3 %v3327_v20  ;;  %1335 = vmatpush.msra.mxu0 %v3319_v17  ;;  %v5029_v17 = vld [vmem:[#allocation24_spill] sm:$0xff]  ;;  %v5032_v20 = vld [vmem:[#allocation27_spill] sm:$0xff] }
  0xdb   : > { %v3693_v59 = vpop.f32.mrf.mxu2  ;;  %v3699_v61 = vpop.f32.mrf.mxu0  ;;  %1358 = vmatpush.msra.mxu1 %v3321_v18  ;;  %1381 = vmatpush.msra.mxu2 %v3325_v19  ;;  %v5030_v18 = vld [vmem:[#allocation25_spill] sm:$0xff]  ;;  %v5031_v19 = vld [vmem:[#allocation26_spill] sm:$0xff] }
  0xdc   : > { %v3697_v60 = vpop.f32.mrf.mxu3  ;;  %v3703_v63 = vpop.f32.mrf.mxu1  ;;  %1404 = vmatpush.msra.mxu3 %v3339_v22  ;;  %1336 = vmatpush.msra.mxu0 %v3342_v23  ;;  %v5033_v22 = vld [vmem:[#allocation28_spill] sm:$0xff]  ;;  %v5034_v23 = vld [vmem:[#allocation29_spill] sm:$0xff] }
  0xdd   : > { %1359 = vmatpush.msra.mxu1 %v3344_v24  ;;  %1382 = vmatpush.msra.mxu2 %v3346_v25  ;;  %v5035_v24 = vld [vmem:[#allocation30_spill] sm:$0xff]  ;;  %v5036_v25 = vld [vmem:[#allocation31_spill] sm:$0xff] }
  0xde   : > { %1197 = vmatmul.f32.gmra.mxu0 %v1025_v62  ;;  %1405 = vmatpush.msra.mxu3 %v3350_v26  ;;  %v5037_v26 = vld [vmem:[#allocation32_spill] sm:$0xff] }
  0xdf   : > { %1220 = vmatmul.f32.gmra.mxu1 %v1025_v62  ;;  %1337 = vmatpush.msra.mxu0 %v3352_v27  ;;  %v5038_v27 = vld [vmem:[#allocation33_spill] sm:$0xff] }
  0xe0   : > { %1243 = vmatmul.f32.gmra.mxu2 %v1025_v62  ;;  %1360 = vmatpush.msra.mxu1 %v3354_v28 }
  0xe1   : > { %1266 = vmatmul.f32.gmra.mxu3 %v1025_v62  ;;  %1383 = vmatpush.msra.mxu2 %v3358_v29  ;;  %v5040_v29 = vld [vmem:[#allocation34_spill] sm:$0xff]  ;;  %v5058_v62 = vld [vmem:[#allocation49_spill] sm:$0xff] }
  0xe2   : > { %1406 = vmatpush.msra.mxu3 %v3364_v31  ;;  %1338 = vmatpush.msra.mxu0 %v3360_v30  ;;  %v5041_v30 = vld [vmem:[#allocation35_spill] sm:$0xff] }
  0xe3   : > { %v3713_v0 = vpop.f32.mrf.mxu2  ;;  %v3719_v2 = vpop.f32.mrf.mxu0  ;;  %1361 = vmatpush.msra.mxu1 %v3366_v32  ;;  %1384 = vmatpush.msra.mxu2 %v3368_v33  ;;  %v5044_v33 = vld [vmem:[#allocation36_spill] sm:$0xff] }
  0xe4   : > { %v3717_v1 = vpop.f32.mrf.mxu3  ;;  %5015 = vst [vmem:[#allocation87_spill] sm:$0xff] %v3719_v2  ;;  %v3723_v3 = vpop.f32.mrf.mxu1  ;;  %1407 = vmatpush.msra.mxu3 %v3378_v36  ;;  %1339 = vmatpush.msra.mxu0 %v3372_v34  ;;  %v5045_v34 = vld [vmem:[#allocation37_spill] sm:$0xff]  ;;  %v5047_v36 = vld [vmem:[#allocation38_spill] sm:$0xff] }
  0xe5   : > { %5016 = vst [vmem:[#allocation88_spill] sm:$0xff] %v3723_v3  ;;  %1362 = vmatpush.msra.mxu1 %v3374_v35  ;;  %1385 = vmatpush.msra.mxu2 %v3380_v37  ;;  %v5048_v37 = vld [vmem:[#allocation39_spill] sm:$0xff]  ;;  %v4103_v3 = vld [vmem:[#allocation10 + $0xe8] sm:$0xff] }
  0xe6   : > { %1408 = vmatpush.msra.mxu3 %v3390_v40  ;;  %1340 = vmatpush.msra.mxu0 %v3384_v38  ;;  %v5049_v38 = vld [vmem:[#allocation40_spill] sm:$0xff]  ;;  %v5051_v40 = vld [vmem:[#allocation42_spill] sm:$0xff] }
  0xe7   : > { %1363 = vmatpush.msra.mxu1 %v3386_v39  ;;  %1386 = vmatpush.msra.mxu2 %v3392_v41  ;;  %v5050_v39 = vld [vmem:[#allocation41_spill] sm:$0xff]  ;;  %v5052_v41 = vld [vmem:[#allocation43_spill] sm:$0xff] }
  0xe8   : > { %1409 = vmatpush.msra.mxu3 %v3402_v44  ;;  %1341 = vmatpush.msra.mxu0 %v3396_v42  ;;  %v5053_v42 = vld [vmem:[#allocation44_spill] sm:$0xff]  ;;  %v5054_v44 = vld [vmem:[#allocation45_spill] sm:$0xff] }
  0xe9   : > { %1364 = vmatpush.msra.mxu1 %v5017_v5  ;;  %1387 = vmatpush.msra.mxu2 %v5018_v6  ;;  %v5060_v6 = vld [vmem:[#allocation50_spill] sm:$0xff] }
  0xea   : > { %1410 = vmatpush.msra.mxu3 %v5020_v8  ;;  %1342 = vmatpush.msra.mxu0 %v5021_v9  ;;  %v5061_v8 = vld [vmem:[#allocation51_spill] sm:$0xff] }
  0xeb   : > { %v3737_v7 = vpop.f32.mrf.mxu2  ;;  %v3743_v11 = vpop.f32.mrf.mxu0  ;;  %1365 = vmatpush.msra.mxu1 %v5024_v12  ;;  %1388 = vmatpush.msra.mxu2 %v5025_v13  ;;  %v5064_v13 = vld [vmem:[#allocation52_spill] sm:$0xff] }
  0xec   : > { %5019 = vst [vmem:[#allocation16_spill] sm:$0xff] %v3737_v7  ;;  %v3741_v10 = vpop.f32.mrf.mxu3  ;;  %v3747_v14 = vpop.f32.mrf.mxu1  ;;  %1411 = vmatpush.msra.mxu3 %v5027_v15  ;;  %1343 = vmatpush.msra.mxu0 %v5028_v16  ;;  %v5065_v15 = vld [vmem:[#allocation53_spill] sm:$0xff]  ;;  %v4100_v7 = vld [vmem:[#allocation10 + $0xe0] sm:$0xff] }
  0xed   : > { %5022 = vst [vmem:[#allocation17_spill] sm:$0xff] %v3741_v10  ;;  %1366 = vmatpush.msra.mxu1 %v5029_v17  ;;  %1389 = vmatpush.msra.mxu2 %v5030_v18  ;;  %v5067_v17 = vld [vmem:[#allocation54_spill] sm:$0xff]  ;;  %v5068_v18 = vld [vmem:[#allocation55_spill] sm:$0xff] }
  0xee   : > { %5023 = vst [vmem:[#allocation20_spill] sm:$0xff] %v3743_v11  ;;  %1412 = vmatpush.msra.mxu3 %v5031_v19  ;;  %1470 = vmatpush.msrb.mxu0 %v5032_v20  ;;  %v669_v19 = vld [vmem:[%s4755_s5] sm:$0xf]  ;;  %v4094_v11 = vld [vmem:[#allocation10 + $0x110] sm:$0xff] }
  0xef   : > { %5026 = vst [vmem:[#allocation18_spill] sm:$0xff] %v3747_v14  ;;  %1493 = vmatpush.msrb.mxu1 %v5033_v22  ;;  %1516 = vmatpush.msrb.mxu2 %v5034_v23  ;;  %v5069_v20 = vld [vmem:[#allocation56_spill] sm:$0xff]  ;;  %v5070_v22 = vld [vmem:[#allocation57_spill] sm:$0xff]  ;;  %v5071_v23 = vld [vmem:[#allocation58_spill] sm:$0xff] }
  0xf0   : > { %1539 = vmatpush.msrb.mxu3 %v5035_v24  ;;  %1471 = vmatpush.msrb.mxu0 %v5036_v25  ;;  %v5072_v24 = vld [vmem:[#allocation59_spill] sm:$0xff]  ;;  %v5073_v25 = vld [vmem:[#allocation60_spill] sm:$0xff]  ;;  %v4091_v14 = vld [vmem:[#allocation10 + $0x108] sm:$0xff]  ;;  %5127 = vst [vmem:[#allocation55_spill] sm:$0xff] %v4094_v11 }
  0xf1   : > { %1494 = vmatpush.msrb.mxu1 %v5037_v26  ;;  %1517 = vmatpush.msrb.mxu2 %v5038_v27  ;;  %v5074_v26 = vld [vmem:[#allocation61_spill] sm:$0xff]  ;;  %v3808_v27 = vperm.slane %v669_v19, 0  ;;  %5126 = vst [vmem:[#allocation54_spill] sm:$0xff] %v4091_v14 }
  0xf2   : > { %1540 = vmatpush.msrb.mxu3 %v5040_v29  ;;  %1472 = vmatpush.msrb.mxu0 %v5041_v30  ;;  %v5075_v29 = vld [vmem:[#allocation62_spill] sm:$0xff]  ;;  %v5076_v30 = vld [vmem:[#allocation63_spill] sm:$0xff]  ;;  %5129 = vst [vmem:[#allocation57_spill] sm:$0xff] %v4100_v7 }
  0xf3   : > { %v3761_v28 = vpop.f32.mrf.mxu2  ;;  %v3767_v32 = vpop.f32.mrf.mxu0  ;;  %1495 = vmatpush.msrb.mxu1 %v5044_v33  ;;  %1518 = vmatpush.msrb.mxu2 %v5045_v34  ;;  %v3812_v33 = vperm.slane %v669_v19, 1  ;;  %v5077_v34 = vld [vmem:[#allocation64_spill] sm:$0xff]  ;;  %5130 = vst [vmem:[#allocation58_spill] sm:$0xff] %v4103_v3 }
  0xf4   : > { %5039 = vst [vmem:[#allocation19_spill] sm:$0xff] %v3761_v28  ;;  %v3765_v31 = vpop.f32.mrf.mxu3  ;;  %v3771_v35 = vpop.f32.mrf.mxu1  ;;  %1541 = vmatpush.msrb.mxu3 %v5047_v36  ;;  %1473 = vmatpush.msrb.mxu0 %v5048_v37  ;;  %v5078_v36 = vld [vmem:[#allocation65_spill] sm:$0xff] }
  0xf5   : > { %5042 = vst [vmem:[#allocation21_spill] sm:$0xff] %v3765_v31  ;;  %1496 = vmatpush.msrb.mxu1 %v5049_v38  ;;  %1519 = vmatpush.msrb.mxu2 %v5050_v39  ;;  %v5080_v38 = vld [vmem:[#allocation66_spill] sm:$0xff]  ;;  %v5081_v39 = vld [vmem:[#allocation67_spill] sm:$0xff]  ;;  %v4071_v31 = vld [vmem:[#allocation10 + $0x120] sm:$0xff] }
  0xf6   : > { %5043 = vst [vmem:[#allocation22_spill] sm:$0xff] %v3767_v32  ;;  %1542 = vmatpush.msrb.mxu3 %v5051_v40  ;;  %1474 = vmatpush.msrb.mxu0 %v5052_v41  ;;  %v4074_v28 = vld [vmem:[#allocation10 + $0x128] sm:$0xff] }
  0xf7   : > { %5046 = vst [vmem:[#allocation23_spill] sm:$0xff] %v3771_v35  ;;  %1497 = vmatpush.msrb.mxu1 %v5053_v42  ;;  %1520 = vmatpush.msrb.mxu2 %v5054_v44  ;;  %v5083_v42 = vld [vmem:[#allocation68_spill] sm:$0xff]  ;;  %v5084_v44 = vld [vmem:[#allocation69_spill] sm:$0xff] }
  0xf8   : > { %1543 = vmatpush.msrb.mxu3 %v5055_v48  ;;  %1475 = vmatpush.msrb.mxu0 %v5056_v50  ;;  %5121 = vst [vmem:[#allocation49_spill] sm:$0xff] %v4071_v31 }
  0xf9   : > { %1498 = vmatpush.msrb.mxu1 %v5057_v57  ;;  %1521 = vmatpush.msrb.mxu2 %v5058_v62  ;;  %v5086_v57 = vld [vmem:[#allocation70_spill] sm:$0xff]  ;;  %v5087_v62 = vld [vmem:[#allocation71_spill] sm:$0xff]  ;;  %5122 = vst [vmem:[#allocation50_spill] sm:$0xff] %v4074_v28 }
  0xfa   : > { %1544 = vmatpush.msrb.mxu3 %v5060_v6  ;;  %1476 = vmatpush.msrb.mxu0 %v5061_v8  ;;  %v5089_v8 = vld [vmem:[#allocation72_spill] sm:$0xff] }
  0xfb   : > { %v3785_v5 = vpop.f32.mrf.mxu2  ;;  %v3791_v12 = vpop.f32.mrf.mxu0  ;;  %1499 = vmatpush.msrb.mxu1 %v5064_v13  ;;  %1522 = vmatpush.msrb.mxu2 %v5065_v15  ;;  %v5090_v13 = vld [vmem:[#allocation73_spill] sm:$0xff]  ;;  %v5091_v15 = vld [vmem:[#allocation74_spill] sm:$0xff] }
  0xfc   : > { %5059 = vst [vmem:[#allocation24_spill] sm:$0xff] %v3785_v5  ;;  %v3789_v9 = vpop.f32.mrf.mxu3  ;;  %v3795_v16 = vpop.f32.mrf.mxu1  ;;  %1545 = vmatpush.msrb.mxu3 %v5067_v17  ;;  %1477 = vmatpush.msrb.mxu0 %v5068_v18  ;;  %v5092_v17 = vld [vmem:[#allocation75_spill] sm:$0xff]  ;;  %v3836_v18 = vperm.slane %v669_v19, 2 }
  0xfd   : > { %5062 = vst [vmem:[#allocation25_spill] sm:$0xff] %v3789_v9  ;;  %1500 = vmatpush.msrb.mxu1 %v5069_v20  ;;  %1523 = vmatpush.msrb.mxu2 %v5070_v22  ;;  %v5093_v20 = vld [vmem:[#allocation76_spill] sm:$0xff]  ;;  %v5094_v22 = vld [vmem:[#allocation77_spill] sm:$0xff] }
  0xfe   : > { %5063 = vst [vmem:[#allocation26_spill] sm:$0xff] %v3791_v12  ;;  %1546 = vmatpush.msrb.mxu3 %v5071_v23  ;;  %1478 = vmatpush.msrb.mxu0 %v5072_v24  ;;  %v3840_v23 = vperm.slane %v669_v19, 3  ;;  %v5095_v24 = vld [vmem:[#allocation78_spill] sm:$0xff] }
  0xff   : > { %5066 = vst [vmem:[#allocation27_spill] sm:$0xff] %v3795_v16  ;;  %1501 = vmatpush.msrb.mxu1 %v5073_v25  ;;  %1524 = vmatpush.msrb.mxu2 %v5074_v26  ;;  %v5096_v25 = vld [vmem:[#allocation79_spill] sm:$0xff]  ;;  %v5097_v26 = vld [vmem:[#allocation80_spill] sm:$0xff] }
 0x100   : > { %1547 = vmatpush.msrb.mxu3 %v5075_v29  ;;  %1479 = vmatpush.msrb.mxu0 %v5076_v30  ;;  %v5098_v30 = vld [vmem:[#allocation81_spill] sm:$0xff] }
 0x101   : > { %1502 = vmatpush.msrb.mxu1 %v5077_v34  ;;  %1525 = vmatpush.msrb.mxu2 %v5078_v36  ;;  %v5099_v34 = vld [vmem:[#allocation82_spill] sm:$0xff] }
 0x102   : > { %1548 = vmatpush.msrb.mxu3 %v5080_v38  ;;  %1480 = vmatpush.msrb.mxu0 %v5081_v39 }
 0x103   : > { %v3816_v37 = vpop.f32.mrf.mxu2  ;;  %v760_v41 = vpop.f32.mrf.mxu0  ;;  %1503 = vmatpush.msrb.mxu1 %v5083_v42  ;;  %1526 = vmatpush.msrb.mxu2 %v5084_v44  ;;  %v5104_v44 = vld [vmem:[#allocation83_spill] sm:$0xff] }
 0x104   : > { %5079 = vst [vmem:[#allocation28_spill] sm:$0xff] %v3816_v37  ;;  %v3820_v40 = vpop.f32.mrf.mxu3  ;;  %v3825_v48 = vadd.f32 %v760_v41, %v3808_v27  ;;  %v789_v50 = vpop.f32.mrf.mxu1  ;;  %1549 = vmatpush.msrb.mxu3 %v5086_v57  ;;  %1481 = vmatpush.msrb.mxu0 %v5087_v62 }
 0x105   : > { %5082 = vst [vmem:[#allocation29_spill] sm:$0xff] %v3820_v40  ;;  %v3830_v6 = vadd.f32 %v789_v50, %v3812_v33  ;;  %1504 = vmatpush.msrb.mxu1 %v5089_v8  ;;  %1527 = vmatpush.msrb.mxu2 %v5090_v13 }
 0x106   : > { %5085 = vst [vmem:[#allocation30_spill] sm:$0xff] %v3825_v48  ;;  %1550 = vmatpush.msrb.mxu3 %v5091_v15  ;;  %1482 = vmatpush.msrb.mxu0 %v5092_v17 }
 0x107   : > { %5088 = vst [vmem:[#allocation31_spill] sm:$0xff] %v3830_v6  ;;  %1505 = vmatpush.msrb.mxu1 %v5093_v20  ;;  %1528 = vmatpush.msrb.mxu2 %v5094_v22  ;;  %v5117_v6 = vld [vmem:[#allocation86_spill] sm:$0xff] }
 0x108   : > { %1551 = vmatpush.msrb.mxu3 %v5095_v24  ;;  %1483 = vmatpush.msrb.mxu0 %v5096_v25 }
 0x109   : > { %1506 = vmatpush.msrb.mxu1 %v3609_v46  ;;  %1529 = vmatpush.msrb.mxu2 %v5097_v26 }
 0x10a   : > { %1552 = vmatpush.msrb.mxu3 %v5098_v30  ;;  %1484 = vmatpush.msrb.mxu0 %v5099_v34 }
 0x10b   : > { %v818_v29 = vpop.f32.mrf.mxu2  ;;  %v762_v39 = vpop.f32.mrf.mxu0  ;;  %1507 = vmatpush.msrb.mxu1 %v3621_v49  ;;  %1530 = vmatpush.msrb.mxu2 %v3623_v21  ;;  %v5105_v49 = vld [vmem:[#allocation84_spill] sm:$0xff] }
 0x10c   : > { %v3849_v36 = vadd.f32 %v818_v29, %v3836_v18  ;;  %v847_v38 = vpop.f32.mrf.mxu3  ;;  %v3857_v46 = vadd.f32 %v762_v39, %v3808_v27  ;;  %v791_v41 = vpop.f32.mrf.mxu1  ;;  %1553 = vmatpush.msrb.mxu3 %v3627_v47  ;;  %1485 = vmatpush.msrb.mxu0 %v3629_v51 }
 0x10d   : > { %v3854_v19 = vadd.f32 %v847_v38, %v3840_v23  ;;  %v3862_v42 = vadd.f32 %v791_v41, %v3812_v33  ;;  %1508 = vmatpush.msrb.mxu1 %v5104_v44  ;;  %1531 = vmatpush.msrb.mxu2 %v3635_v4 }
 0x10e   : > { %5100 = vst [vmem:[#allocation32_spill] sm:$0xff] %v3849_v36  ;;  %1554 = vmatpush.msrb.mxu3 %v5105_v49 }
 0x10f   : > { %5101 = vst [vmem:[#allocation33_spill] sm:$0xff] %v3854_v19 }
 0x110   : > { %5102 = vst [vmem:[#allocation34_spill] sm:$0xff] %v3857_v46 }
 0x111   : > { %5103 = vst [vmem:[#allocation35_spill] sm:$0xff] %v3862_v42 }
 0x113   : > { %v820_v21 = vpop.f32.mrf.mxu2  ;;  %v765_v62 = vpop.f32.mrf.mxu0 }
 0x114   : > { %v3868_v50 = vadd.f32 %v820_v21, %v3836_v18  ;;  %v849_v57 = vpop.f32.mrf.mxu3  ;;  %v3874_v47 = vadd.f32 %v765_v62, %v3808_v27  ;;  %v794_v51 = vpop.f32.mrf.mxu1 }
 0x115   : > { %v3871_v8 = vadd.f32 %v849_v57, %v3840_v23  ;;  %v3877_v13 = vadd.f32 %v794_v51, %v3812_v33 }
 0x116   : > { %5106 = vst [vmem:[#allocation36_spill] sm:$0xff] %v3868_v50 }
 0x117   : > { %5107 = vst [vmem:[#allocation37_spill] sm:$0xff] %v3871_v8 }
 0x118   : > { %5108 = vst [vmem:[#allocation38_spill] sm:$0xff] %v3874_v47 }
 0x119   : > { %5109 = vst [vmem:[#allocation39_spill] sm:$0xff] %v3877_v13 }
 0x11b   : > { %v823_v15 = vpop.f32.mrf.mxu2  ;;  %v767_v20 = vpop.f32.mrf.mxu0 }
 0x11c   : > { %v3880_v4 = vadd.f32 %v823_v15, %v3836_v18  ;;  %v852_v17 = vpop.f32.mrf.mxu3  ;;  %v3886_v24 = vadd.f32 %v767_v20, %v3808_v27  ;;  %v796_v25 = vpop.f32.mrf.mxu1 }
 0x11d   : > { %v3883_v22 = vadd.f32 %v852_v17, %v3840_v23  ;;  %v3889_v26 = vadd.f32 %v796_v25, %v3812_v33 }
 0x11e   : > { %5110 = vst [vmem:[#allocation40_spill] sm:$0xff] %v3880_v4 }
 0x11f   : > { %5111 = vst [vmem:[#allocation41_spill] sm:$0xff] %v3883_v22 }
 0x120   : > { %5112 = vst [vmem:[#allocation42_spill] sm:$0xff] %v3886_v24 }
 0x121   : > { %5113 = vst [vmem:[#allocation43_spill] sm:$0xff] %v3889_v26 }
 0x123   : > { %v825_v29 = vpop.f32.mrf.mxu2  ;;  %v770_v38 = vpop.f32.mrf.mxu0 }
 0x124   : > { %v3892_v30 = vadd.f32 %v825_v29, %v3836_v18  ;;  %v854_v34 = vpop.f32.mrf.mxu3  ;;  %v3898_v41 = vadd.f32 %v770_v38, %v3808_v27  ;;  %v799_v44 = vpop.f32.mrf.mxu1 }
 0x125   : > { %v3895_v39 = vadd.f32 %v854_v34, %v3840_v23  ;;  %v3901_v49 = vadd.f32 %v799_v44, %v3812_v33 }
 0x126   : > { %5114 = vst [vmem:[#allocation44_spill] sm:$0xff] %v3892_v30 }
 0x127   : > { %5115 = vst [vmem:[#allocation45_spill] sm:$0xff] %v3895_v39 }
 0x12b   : > { %v828_v21 = vpop.f32.mrf.mxu2  ;;  %v772_v51 = vpop.f32.mrf.mxu0 }
 0x12c   : > { %v3904_v57 = vadd.f32 %v828_v21, %v3836_v18  ;;  %v857_v62 = vpop.f32.mrf.mxu3  ;;  %v3910_v17 = vadd.f32 %v772_v51, %v3808_v27  ;;  %v801_v20 = vpop.f32.mrf.mxu1 }
 0x12d   : > { %v3907_v15 = vadd.f32 %v857_v62, %v3840_v23  ;;  %v3913_v25 = vadd.f32 %v801_v20, %v3812_v33  ;;  %v462_v62 = vld [vmem:[%s4754_s4] sm:$0xf] }
 0x12e   : > { %v3934_v46 = vperm.slane %v462_v62, 1  ;;  %v3944_v9 = vperm.slane %v462_v62, 2  ;;  %v3946_v35 = vperm.slane %v462_v62, 3 }
 0x130   : > { %v584_v48 = vadd.f32 %v5117_v6, %v3934_v46  ;;  %v642_v6 = vadd.f32 %v3657_v52, %v3946_v35 }
 0x133   : > { %v830_v29 = vpop.f32.mrf.mxu2  ;;  %v775_v44 = vpop.f32.mrf.mxu0 }
 0x134   : > { %v3916_v34 = vadd.f32 %v830_v29, %v3836_v18  ;;  %v859_v38 = vpop.f32.mrf.mxu3  ;;  %v804_v8 = vpop.f32.mrf.mxu1  ;;  %v3932_v29 = vperm.slane %v462_v62, 0 }
 0x135   : > { %v3919_v21 = vadd.f32 %v859_v38, %v3840_v23  ;;  %v5116_v38 = vld [vmem:[#allocation85_spill] sm:$0xff] }
 0x136   : > { %v555_v19 = vadd.f32 %v5116_v38, %v3932_v29  ;;  %v613_v38 = vadd.f32 %v3653_v45, %v3944_v9  ;;  %v557_v30 = vadd.f32 %v3659_v43, %v3932_v29  ;;  %v615_v43 = vadd.f32 %v3673_v54, %v3944_v9 }
 0x13b   : > { %v3921_v50 = vpop.f32.mrf.mxu2  ;;  %v3928_v20 = vpop.f32.mrf.mxu0 }
 0x13c   : > { %v3926_v51 = vpop.f32.mrf.mxu3  ;;  %v3930_v42 = vpop.f32.mrf.mxu1 }
 0x143   : > { %v3938_v36 = vpop.f32.mrf.mxu2  ;;  %v1053_v37 = vpop.f32.mrf.mxu0 }
 0x144   : > { %v3942_v40 = vpop.f32.mrf.mxu3  ;;  %v1128_v16 = vadd.f32 %v1053_v37, %v555_v19  ;;  %v1076_v12 = vpop.f32.mrf.mxu1  ;;  %v586_v19 = vadd.f32 %v3663_v53, %v3934_v46 }
 0x145   : > { %v1129_v5 = vadd.f32 %v1076_v12, %v584_v48 }
 0x146   : > { %v1136_v32 = vmul.f32 0.5, %v1128_v16 }
 0x147   : > { %v1137_v39 = vmul.f32 0.5, %v1129_v5 }
 0x148   : > { %2596 = vtanh.f32 %v1136_v32 }
 0x149   : > { %2598 = vtanh.f32 %v1137_v39 }
 0x14b   : > { %v1099_v37 = vpop.f32.mrf.mxu2  ;;  %v1056_v62 = vpop.f32.mrf.mxu0 }
 0x14c   : > { %v1130_v12 = vadd.f32 %v1099_v37, %v613_v38  ;;  %v1122_v48 = vpop.f32.mrf.mxu3  ;;  %v1132_v5 = vadd.f32 %v1056_v62, %v557_v30  ;;  %v1079_v32 = vpop.f32.mrf.mxu1  ;;  %v1022_v38 = vld [vmem:[#allocation3 + $0x8] sm:$0xff]  ;;  %v644_v30 = vadd.f32 %v3677_v55, %v3946_v35 }
 0x14d   : > { %v1131_v16 = vadd.f32 %v1122_v48, %v642_v6  ;;  %v1133_v26 = vadd.f32 %v1079_v32, %v586_v19  ;;  %v776_v6 = vadd.f32 %v775_v44, %v3808_v27  ;;  %v805_v48 = vadd.f32 %v804_v8, %v3812_v33 }
 0x14e   : > { %2600 = vtanh.f32 %v1130_v12  ;;  %v2597_v45 = vpop.eup %2596  ;;  %v1140_v24 = vmul.f32 0.5, %v1132_v5 }
 0x14f   : > { %v1139_v39 = vmul.f32 0.5, %v1131_v16  ;;  %v2599_v22 = vpop.eup %2598  ;;  %v1152_v52 = vmul.f32 0.5, %v2597_v45  ;;  %v1141_v4 = vmul.f32 0.5, %v1133_v26 }
 0x150   : > { %v1153_v13 = vmul.f32 0.5, %v2599_v22 }
 0x151   : > { %2602 = vtanh.f32 %v1139_v39  ;;  %v1160_v53 = vadd.f32 0.5, %v1152_v52 }
 0x152   : > { %2604 = vtanh.f32 %v1140_v24  ;;  %v1161_v37 = vadd.f32 0.5, %v1153_v13 }
 0x153   : > { %2606 = vtanh.f32 %v1141_v4  ;;  %v1102_v19 = vpop.f32.mrf.mxu2  ;;  %v1195_v62 = vpop.f32.mrf.mxu0 }
 0x154   : > { %v2601_v12 = vpop.eup %2600  ;;  %v1134_v26 = vadd.f32 %v1102_v19, %v615_v43  ;;  %v1125_v22 = vpop.f32.mrf.mxu3  ;;  %v1168_v16 = vmul.f32 %v1161_v37, %v1022_v38  ;;  %v1270_v32 = vadd.f32 %v1195_v62, %v776_v6  ;;  %v834_v43 = vadd.f32 %v3921_v50, %v3836_v18  ;;  %v1023_v19 = vld [vmem:[#allocation3] sm:$0xff] }
 0x155   : > { %v1170_v5 = vmul.f32 %v2601_v12, %v1160_v53  ;;  %v1135_v54 = vadd.f32 %v1125_v22, %v644_v30  ;;  %v1218_v45 = vpop.f32.mrf.mxu1  ;;  %v863_v30 = vadd.f32 %v3926_v51, %v3840_v23  ;;  %v778_v6 = vadd.f32 %v3928_v20, %v3808_v27 }
 0x156   : > { %2608 = vtanh.f32 %v1134_v26  ;;  %v1271_v24 = vadd.f32 %v1218_v45, %v805_v48  ;;  %v1278_v13 = vmul.f32 0.5, %v1270_v32  ;;  %v807_v26 = vadd.f32 %v3930_v42, %v3812_v33 }
 0x157   : > { %v2603_v39 = vpop.eup %2602  ;;  %v3962_v55 = vadd.f32 %v1170_v5, %v1168_v16  ;;  %v1143_v44 = vmul.f32 0.5, %v1135_v54 }
 0x158   : > { %v2605_v4 = vpop.eup %2604  ;;  %v1279_v52 = vmul.f32 0.5, %v1271_v24  ;;  %v1155_v53 = vmul.f32 0.5, %v2603_v39 }
 0x159   : > { %v2607_v47 = vpop.eup %2606  ;;  %2610 = vtanh.f32 %v3962_v55  ;;  %v1156_v8 = vmul.f32 0.5, %v2605_v4 }
 0x15a   : > { %v1157_v38 = vmul.f32 0.5, %v2607_v47  ;;  %2612 = vtanh.f32 %v1143_v44  ;;  %v1163_v32 = vadd.f32 0.5, %v1155_v53  ;;  %v865_v53 = vadd.f32 %v3942_v40, %v3840_v23 }
 0x15b   : > { %v1164_v37 = vadd.f32 0.5, %v1156_v8  ;;  %2614 = vtanh.f32 %v1278_v13  ;;  %v1241_v12 = vpop.f32.mrf.mxu2  ;;  %v1198_v47 = vpop.f32.mrf.mxu0  ;;  %v836_v8 = vadd.f32 %v3938_v36, %v3836_v18  ;;  %v1026_v36 = vld [vmem:[#allocation5] sm:$0xff] }
 0x15c   : > { %v2609_v48 = vpop.eup %2608  ;;  %v1165_v22 = vadd.f32 0.5, %v1157_v38  ;;  %2616 = vtanh.f32 %v1279_v52  ;;  %v1272_v50 = vadd.f32 %v1241_v12, %v834_v43  ;;  %v1264_v62 = vpop.f32.mrf.mxu3  ;;  %v1274_v54 = vadd.f32 %v1198_v47, %v778_v6  ;;  %v3998_v47 = vld [vmem:[#allocation10 + $0x1c0] sm:$0xff] }
 0x15d   : > { %v1171_v16 = vmul.f32 %v2609_v48, %v1164_v37  ;;  %v1273_v5 = vadd.f32 %v1264_v62, %v863_v30  ;;  %v1221_v51 = vpop.f32.mrf.mxu1  ;;  %v3986_v48 = vld [vmem:[#allocation10 + $0x1e0] sm:$0xff] }
 0x15e   : > { %v1169_v45 = vmul.f32 %v1165_v22, %v1023_v19  ;;  %2618 = vtanh.f32 %v1272_v50  ;;  %v1275_v27 = vadd.f32 %v1221_v51, %v807_v26  ;;  %v1282_v39 = vmul.f32 0.5, %v1274_v54  ;;  %v3989_v26 = vld [vmem:[#allocation10 + $0x1e8] sm:$0xff]  ;;  %v3992_v22 = vld [vmem:[#allocation10 + $0x1f0] sm:$0xff]  ;;  %v3995_v50 = vld [vmem:[#allocation10 + $0x1f8] sm:$0xff] }
 0x15f   : > { %v2611_v20 = vpop.eup %2610  ;;  %v1281_v24 = vmul.f32 0.5, %v1273_v5 }
 0x160   : > { %v2613_v44 = vpop.eup %2612  ;;  %v3973_v13 = vmul.f32 %v2611_v20, %v1163_v32  ;;  %v3975_v33 = vadd.f32 %v1171_v16, %v1169_v45  ;;  %v1283_v42 = vmul.f32 0.5, %v1275_v27  ;;  %v4001_v16 = vld [vmem:[#allocation10 + $0x1c8] sm:$0xff]  ;;  %v4004_v45 = vld [vmem:[#allocation10 + $0x1d0] sm:$0xff]  ;;  %v4007_v27 = vld [vmem:[#allocation10 + $0x1d8] sm:$0xff] }
 0x161   : > { %v2615_v4 = vpop.eup %2614  ;;  %2620 = vtanh.f32 %v1281_v24  ;;  %v1159_v38 = vmul.f32 0.5, %v2613_v44  ;;  %v4010_v24 = vld [vmem:[#allocation10 + $0x1a0] sm:$0xff] }
 0x162   : > { %v2617_v52 = vpop.eup %2616  ;;  %2622 = vtanh.f32 %v3975_v33  ;;  %v1294_v43 = vmul.f32 0.5, %v2615_v4  ;;  %1344 = vmatmul.f32.vlgmr.msra.gmra.mxu0 %v3973_v13  ;;  %1367 = vmatmul.f32.vlgmr.msra.gmra.mxu1 %v3973_v13 }
 0x163   : > { %v1295_v30 = vmul.f32 0.5, %v2617_v52  ;;  %2624 = vtanh.f32 %v1282_v39  ;;  %1390 = vmatmul.f32.vlgmr.msra.gmra.mxu2 %v3973_v13  ;;  %1413 = vmatmul.f32.vlgmr.msra.gmra.mxu3 %v3973_v13  ;;  %v1244_v6 = vpop.f32.mrf.mxu2  ;;  %v1167_v54 = vadd.f32 0.5, %v1159_v38  ;;  %v4013_v39 = vld [vmem:[#allocation10 + $0x1a8] sm:$0xff]  ;;  %v4020_v52 = vld [vmem:[#allocation10 + $0x1b0] sm:$0xff]  ;;  %v4026_v38 = vld [vmem:[#allocation10 + $0x180] sm:$0xff] }
 0x164   : > { %v2619_v37 = vpop.eup %2618  ;;  %v1302_v18 = vadd.f32 0.5, %v1294_v43  ;;  %2626 = vtanh.f32 %v1283_v42  ;;  %v1276_v19 = vadd.f32 %v1244_v6, %v836_v8  ;;  %v1267_v12 = vpop.f32.mrf.mxu3  ;;  %1620 = vmatpush.msra.mxu0 %v3986_v48  ;;  %1643 = vmatpush.msra.mxu1 %v3989_v26  ;;  %v4023_v8 = vld [vmem:[#allocation10 + $0x1b8] sm:$0xff] }
 0x165   : > { %v1303_v40 = vadd.f32 0.5, %v1295_v30  ;;  %v1277_v23 = vadd.f32 %v1267_v12, %v865_v53  ;;  %1666 = vmatpush.msra.mxu2 %v3992_v22  ;;  %1689 = vmatpush.msra.mxu3 %v3995_v50  ;;  %v4029_v30 = vld [vmem:[#allocation10 + $0x188] sm:$0xff] }
 0x166   : > { %v1312_v62 = vmul.f32 %v2619_v37, %v1302_v18  ;;  %2628 = vtanh.f32 %v1276_v19  ;;  %1621 = vmatpush.msra.mxu0 %v3998_v47  ;;  %1644 = vmatpush.msra.mxu1 %v4001_v16  ;;  %v1027_v19 = vld [vmem:[#allocation5 + $0x8] sm:$0xff] }
 0x167   : > { %v2621_v5 = vpop.eup %2620  ;;  %v1310_v51 = vmul.f32 %v1303_v40, %v1026_v36  ;;  %v1285_v32 = vmul.f32 0.5, %v1277_v23  ;;  %1667 = vmatpush.msra.mxu2 %v4004_v45  ;;  %1690 = vmatpush.msra.mxu3 %v4007_v27  ;;  %v4037_v40 = vld [vmem:[#allocation10 + $0x190] sm:$0xff]  ;;  %v4040_v23 = vld [vmem:[#allocation10 + $0x198] sm:$0xff] }
 0x168   : > { %v2623_v20 = vpop.eup %2622  ;;  %1622 = vmatpush.msra.mxu0 %v4010_v24  ;;  %1645 = vmatpush.msra.mxu1 %v4013_v39  ;;  %v1297_v18 = vmul.f32 0.5, %v2621_v5  ;;  %v4046_v5 = vld [vmem:[#allocation10 + $0x168] sm:$0xff] }
 0x169   : > { %v2625_v44 = vpop.eup %2624  ;;  %v4016_v42 = vmul.f32 %v2623_v20, %v1167_v54  ;;  %v4018_v4 = vadd.f32 %v1312_v62, %v1310_v51  ;;  %1668 = vmatpush.msra.mxu2 %v4020_v52  ;;  %1691 = vmatpush.msra.mxu3 %v4023_v8  ;;  %2630 = vtanh.f32 %v1285_v32  ;;  %v4043_v54 = vld [vmem:[#allocation10 + $0x160] sm:$0xff]  ;;  %v4049_v32 = vld [vmem:[#allocation10 + $0x170] sm:$0xff]  ;;  %v4052_v20 = vld [vmem:[#allocation10 + $0x178] sm:$0xff] }
 0x16a   : > { %v2627_v43 = vpop.eup %2626  ;;  %v1298_v53 = vmul.f32 0.5, %v2625_v44  ;;  %1623 = vmatpush.msra.mxu0 %v4026_v38  ;;  %1646 = vmatpush.msra.mxu1 %v4029_v30 }
 0x16b   : > { %2632 = vtanh.f32 %v4018_v4  ;;  %v1299_v6 = vmul.f32 0.5, %v2627_v43  ;;  %1347 = vmatmul.f32.gmra.mxu0 %v4016_v42  ;;  %1370 = vmatmul.f32.gmra.mxu1 %v4016_v42  ;;  %v1305_v43 = vadd.f32 0.5, %v1297_v18 }
 0x16c   : > { %v2629_v37 = vpop.eup %2628  ;;  %v1306_v36 = vadd.f32 0.5, %v1298_v53  ;;  %1393 = vmatmul.f32.gmra.mxu2 %v4016_v42  ;;  %1416 = vmatmul.f32.gmra.mxu3 %v4016_v42  ;;  %v4055_v53 = vld [vmem:[#allocation10 + $0x140] sm:$0xff] }
 0x16d   : > { %v1307_v12 = vadd.f32 0.5, %v1299_v6  ;;  %1669 = vmatpush.msra.mxu2 %v4037_v40  ;;  %1692 = vmatpush.msra.mxu3 %v4040_v23  ;;  %v4058_v6 = vld [vmem:[#allocation10 + $0x148] sm:$0xff] }
 0x16e   : > { %v1313_v62 = vmul.f32 %v2629_v37, %v1306_v36  ;;  %1624 = vmatpush.msra.mxu0 %v4043_v54  ;;  %1647 = vmatpush.msra.mxu1 %v4046_v5 }
 0x16f   : > { %v1311_v51 = vmul.f32 %v1307_v12, %v1027_v19  ;;  %1670 = vmatpush.msra.mxu2 %v4049_v32  ;;  %1693 = vmatpush.msra.mxu3 %v4052_v20  ;;  %v2631_v44 = vpop.eup %2630  ;;  %v4063_v19 = vld [vmem:[#allocation10 + $0x150] sm:$0xff]  ;;  %v4066_v12 = vld [vmem:[#allocation10 + $0x158] sm:$0xff] }
 0x170   : > { %1625 = vmatpush.msra.mxu0 %v4055_v53  ;;  %1648 = vmatpush.msra.mxu1 %v4058_v6  ;;  %5118 = vst [vmem:[#allocation46_spill] sm:$0xff] %v4063_v19 }
 0x171   : > { %v2633_v37 = vpop.eup %2632  ;;  %v4061_v36 = vadd.f32 %v1313_v62, %v1311_v51  ;;  %1671 = vmatpush.msra.mxu2 %v4063_v19  ;;  %5119 = vst [vmem:[#allocation47_spill] sm:$0xff] %v4066_v12  ;;  %1694 = vmatpush.msra.mxu3 %v4066_v12  ;;  %v4078_v62 = vld [vmem:[#allocation10 + $0x130] sm:$0xff]  ;;  %v4081_v51 = vld [vmem:[#allocation10 + $0x138] sm:$0xff] }
 0x172   : > { %v4069_v18 = vmul.f32 %v2633_v37, %v1305_v43  ;;  %1626 = vmatpush.msra.mxu0 %v4071_v31  ;;  %1649 = vmatpush.msra.mxu1 %v4074_v28  ;;  %5123 = vst [vmem:[#allocation51_spill] sm:$0xff] %v4078_v62  ;;  %v1301_v43 = vmul.f32 0.5, %v2631_v44  ;;  %v4088_v37 = vld [vmem:[#allocation10 + $0x100] sm:$0xff]  ;;  %v4097_v44 = vld [vmem:[#allocation10 + $0x118] sm:$0xff] }
 0x173   : > { %2634 = vtanh.f32 %v4061_v36  ;;  %1672 = vmatpush.msra.mxu2 %v4078_v62  ;;  %5124 = vst [vmem:[#allocation52_spill] sm:$0xff] %v4081_v51  ;;  %1695 = vmatpush.msra.mxu3 %v4081_v51  ;;  %v647_v51 = vadd.f32 %v3697_v60, %v3946_v35 }
 0x174   : > { %5120 = vst [vmem:[#allocation48_spill] sm:$0xff] %v4069_v18  ;;  %1486 = vmatmul.f32.vlgmr.msrb.gmra.mxu0 %v4069_v18  ;;  %1509 = vmatmul.f32.vlgmr.msrb.gmra.mxu1 %v4069_v18  ;;  %v1309_v10 = vadd.f32 0.5, %v1301_v43  ;;  %v4114_v43 = vld [vmem:[#allocation10 + $0xc0] sm:$0xff] }
 0x175   : > { %1532 = vmatmul.f32.vlgmr.msrb.gmra.mxu2 %v4069_v18  ;;  %1555 = vmatmul.f32.vlgmr.msrb.gmra.mxu3 %v4069_v18  ;;  %5125 = vst [vmem:[#allocation53_spill] sm:$0xff] %v4088_v37 }
 0x176   : > { %1627 = vmatpush.msra.mxu0 %v4088_v37  ;;  %1650 = vmatpush.msra.mxu1 %v4091_v14  ;;  %5128 = vst [vmem:[#allocation56_spill] sm:$0xff] %v4097_v44  ;;  %v4106_v37 = vld [vmem:[#allocation10 + $0xf0] sm:$0xff]  ;;  %v4109_v14 = vld [vmem:[#allocation10 + $0xf8] sm:$0xff] }
 0x177   : > { %1673 = vmatpush.msra.mxu2 %v4094_v11  ;;  %1696 = vmatpush.msra.mxu3 %v4097_v44  ;;  %5131 = vst [vmem:[#allocation59_spill] sm:$0xff] %v4106_v37  ;;  %v4123_v44 = vld [vmem:[#allocation10 + $0xd8] sm:$0xff] }
 0x178   : > { %1628 = vmatpush.msra.mxu0 %v4100_v7  ;;  %1651 = vmatpush.msra.mxu1 %v4103_v3  ;;  %5132 = vst [vmem:[#allocation60_spill] sm:$0xff] %v4109_v14  ;;  %v4117_v7 = vld [vmem:[#allocation10 + $0xc8] sm:$0xff]  ;;  %v4120_v3 = vld [vmem:[#allocation10 + $0xd0] sm:$0xff] }
 0x179   : > { %v2635_v2 = vpop.eup %2634  ;;  %1674 = vmatpush.msra.mxu2 %v4106_v37  ;;  %1697 = vmatpush.msra.mxu3 %v4109_v14  ;;  %5134 = vst [vmem:[#allocation62_spill] sm:$0xff] %v4114_v43 }
 0x17a   : > { %v4112_v11 = vmul.f32 %v2635_v2, %v1309_v10  ;;  %1629 = vmatpush.msra.mxu0 %v4114_v43  ;;  %5135 = vst [vmem:[#allocation63_spill] sm:$0xff] %v4117_v7  ;;  %1652 = vmatpush.msra.mxu1 %v4117_v7  ;;  %v4130_v2 = vld [vmem:[#allocation10 + $0xa0] sm:$0xff]  ;;  %v4133_v10 = vld [vmem:[#allocation10 + $0xa8] sm:$0xff] }
 0x17b   : > { %5136 = vst [vmem:[#allocation64_spill] sm:$0xff] %v4120_v3  ;;  %1675 = vmatpush.msra.mxu2 %v4120_v3  ;;  %1698 = vmatpush.msra.mxu3 %v4123_v44  ;;  %v4136_v3 = vld [vmem:[#allocation10 + $0xb0] sm:$0xff]  ;;  %v4142_v7 = vld [vmem:[#allocation10 + $0x80] sm:$0xff] }
 0x17c   : > { %5133 = vst [vmem:[#allocation61_spill] sm:$0xff] %v4112_v11  ;;  %1489 = vmatmul.f32.gmra.mxu0 %v4112_v11  ;;  %1512 = vmatmul.f32.gmra.mxu1 %v4112_v11 }
 0x17d   : > { %5137 = vst [vmem:[#allocation65_spill] sm:$0xff] %v4123_v44  ;;  %1535 = vmatmul.f32.gmra.mxu2 %v4112_v11  ;;  %1558 = vmatmul.f32.gmra.mxu3 %v4112_v11  ;;  %v4139_v44 = vld [vmem:[#allocation10 + $0xb8] sm:$0xff]  ;;  %v4145_v11 = vld [vmem:[#allocation10 + $0x88] sm:$0xff] }
 0x17e   : > { %5138 = vst [vmem:[#allocation66_spill] sm:$0xff] %v4130_v2  ;;  %1630 = vmatpush.msra.mxu0 %v4130_v2  ;;  %1653 = vmatpush.msra.mxu1 %v4133_v10  ;;  %v4148_v2 = vld [vmem:[#allocation10 + $0x90] sm:$0xff] }
 0x17f   : > { %5139 = vst [vmem:[#allocation67_spill] sm:$0xff] %v4133_v10  ;;  %1676 = vmatpush.msra.mxu2 %v4136_v3  ;;  %1699 = vmatpush.msra.mxu3 %v4139_v44  ;;  %v4151_v10 = vld [vmem:[#allocation10 + $0x98] sm:$0xff] }
 0x180   : > { %5140 = vst [vmem:[#allocation68_spill] sm:$0xff] %v4136_v3  ;;  %1631 = vmatpush.msra.mxu0 %v4142_v7  ;;  %1654 = vmatpush.msra.mxu1 %v4145_v11  ;;  %v4154_v3 = vld [vmem:[#allocation10 + $0x60] sm:$0xff] }
 0x181   : > { %5141 = vst [vmem:[#allocation69_spill] sm:$0xff] %v4139_v44  ;;  %1677 = vmatpush.msra.mxu2 %v4148_v2  ;;  %1700 = vmatpush.msra.mxu3 %v4151_v10  ;;  %v4157_v44 = vld [vmem:[#allocation10 + $0x68] sm:$0xff] }
 0x182   : > { %5142 = vst [vmem:[#allocation70_spill] sm:$0xff] %v4142_v7  ;;  %1632 = vmatpush.msra.mxu0 %v4154_v3  ;;  %1655 = vmatpush.msra.mxu1 %v4157_v44  ;;  %v4160_v7 = vld [vmem:[#allocation10 + $0x70] sm:$0xff] }
 0x183   : > { %5143 = vst [vmem:[#allocation71_spill] sm:$0xff] %v4145_v11  ;;  %1678 = vmatpush.msra.mxu2 %v4160_v7  ;;  %v4163_v11 = vld [vmem:[#allocation10 + $0x78] sm:$0xff] }
 0x184   : > { %5144 = vst [vmem:[#allocation72_spill] sm:$0xff] %v4148_v2  ;;  %1701 = vmatpush.msra.mxu3 %v4163_v11  ;;  %v4166_v2 = vld [vmem:[#allocation10 + $0x40] sm:$0xff] }
 0x185   : > { %5145 = vst [vmem:[#allocation73_spill] sm:$0xff] %v4151_v10  ;;  %1633 = vmatpush.msra.mxu0 %v4166_v2  ;;  %v4169_v10 = vld [vmem:[#allocation10 + $0x48] sm:$0xff] }
 0x186   : > { %5146 = vst [vmem:[#allocation74_spill] sm:$0xff] %v4154_v3  ;;  %1656 = vmatpush.msra.mxu1 %v4169_v10  ;;  %v4172_v3 = vld [vmem:[#allocation10 + $0x50] sm:$0xff] }
 0x187   : > { %5147 = vst [vmem:[#allocation75_spill] sm:$0xff] %v4157_v44  ;;  %1679 = vmatpush.msra.mxu2 %v4172_v3  ;;  %v4175_v44 = vld [vmem:[#allocation10 + $0x58] sm:$0xff] }
 0x188   : > { %5148 = vst [vmem:[#allocation76_spill] sm:$0xff] %v4160_v7  ;;  %1702 = vmatpush.msra.mxu3 %v4175_v44  ;;  %v4178_v7 = vld [vmem:[#allocation10 + $0x20] sm:$0xff] }
 0x189   : > { %5149 = vst [vmem:[#allocation77_spill] sm:$0xff] %v4163_v11  ;;  %1634 = vmatpush.msra.mxu0 %v4178_v7  ;;  %v4181_v11 = vld [vmem:[#allocation10 + $0x28] sm:$0xff] }
 0x18a   : > { %5150 = vst [vmem:[#allocation78_spill] sm:$0xff] %v4166_v2  ;;  %1657 = vmatpush.msra.mxu1 %v4181_v11  ;;  %v4184_v2 = vld [vmem:[#allocation10 + $0x30] sm:$0xff] }
 0x18b   : > { %5151 = vst [vmem:[#allocation79_spill] sm:$0xff] %v4169_v10  ;;  %1680 = vmatpush.msra.mxu2 %v4184_v2  ;;  %v4187_v10 = vld [vmem:[#allocation10 + $0x38] sm:$0xff] }
 0x18c   : > { %5152 = vst [vmem:[#allocation80_spill] sm:$0xff] %v4172_v3  ;;  %1703 = vmatpush.msra.mxu3 %v4187_v10  ;;  %v4190_v3 = vld [vmem:[#allocation10] sm:$0xff] }
 0x18d   : > { %5153 = vst [vmem:[#allocation81_spill] sm:$0xff] %v4175_v44  ;;  %1635 = vmatpush.msra.mxu0 %v4190_v3  ;;  %v4193_v44 = vld [vmem:[#allocation10 + $0x8] sm:$0xff] }
 0x18e   : > { %5154 = vst [vmem:[#allocation82_spill] sm:$0xff] %v4178_v7  ;;  %1658 = vmatpush.msra.mxu1 %v4193_v44  ;;  %v4196_v7 = vld [vmem:[#allocation10 + $0x10] sm:$0xff] }
 0x18f   : > { %5155 = vst [vmem:[#allocation83_spill] sm:$0xff] %v4181_v11  ;;  %1681 = vmatpush.msra.mxu2 %v4196_v7  ;;  %v4199_v11 = vld [vmem:[#allocation10 + $0x18] sm:$0xff] }
 0x190   : > { %5156 = vst [vmem:[#allocation84_spill] sm:$0xff] %v4184_v2  ;;  %1704 = vmatpush.msra.mxu3 %v4199_v11  ;;  %v4202_v2 = vld [vmem:[#allocation12 + $0x1e0] sm:$0xff] }
 0x191   : > { %5157 = vst [vmem:[#allocation85_spill] sm:$0xff] %v4187_v10  ;;  %1762 = vmatpush.msrb.mxu0 %v4202_v2  ;;  %v4205_v10 = vld [vmem:[#allocation12 + $0x1e8] sm:$0xff] }
 0x192   : > { %5158 = vst [vmem:[#allocation86_spill] sm:$0xff] %v4190_v3  ;;  %1785 = vmatpush.msrb.mxu1 %v4205_v10  ;;  %v4208_v3 = vld [vmem:[#allocation12 + $0x1f0] sm:$0xff] }
 0x193   : > { %5159 = vst [vmem:[#allocation89_spill] sm:$0xff] %v4193_v44  ;;  %1808 = vmatpush.msrb.mxu2 %v4208_v3  ;;  %v4211_v44 = vld [vmem:[#allocation12 + $0x1f8] sm:$0xff] }
 0x194   : > { %5160 = vst [vmem:[#allocation90_spill] sm:$0xff] %v4196_v7  ;;  %1831 = vmatpush.msrb.mxu3 %v4211_v44  ;;  %v4214_v7 = vld [vmem:[#allocation12 + $0x1c0] sm:$0xff] }
 0x195   : > { %5161 = vst [vmem:[#allocation91_spill] sm:$0xff] %v4199_v11  ;;  %1763 = vmatpush.msrb.mxu0 %v4214_v7  ;;  %v4217_v11 = vld [vmem:[#allocation12 + $0x1c8] sm:$0xff] }
 0x196   : > { %5162 = vst [vmem:[#allocation92_spill] sm:$0xff] %v4202_v2  ;;  %1786 = vmatpush.msrb.mxu1 %v4217_v11  ;;  %v4220_v2 = vld [vmem:[#allocation12 + $0x1d0] sm:$0xff] }
 0x197   : > { %5163 = vst [vmem:[#allocation93_spill] sm:$0xff] %v4205_v10  ;;  %1809 = vmatpush.msrb.mxu2 %v4220_v2  ;;  %v4223_v10 = vld [vmem:[#allocation12 + $0x1d8] sm:$0xff] }
 0x198   : > { %5164 = vst [vmem:[#allocation94_spill] sm:$0xff] %v4208_v3  ;;  %1832 = vmatpush.msrb.mxu3 %v4223_v10  ;;  %v4226_v3 = vld [vmem:[#allocation12 + $0x1a0] sm:$0xff] }
 0x199   : > { %5165 = vst [vmem:[#allocation95_spill] sm:$0xff] %v4211_v44  ;;  %1764 = vmatpush.msrb.mxu0 %v4226_v3  ;;  %v4229_v44 = vld [vmem:[#allocation12 + $0x1a8] sm:$0xff] }
 0x19a   : > { %5166 = vst [vmem:[#allocation96_spill] sm:$0xff] %v4214_v7  ;;  %1787 = vmatpush.msrb.mxu1 %v4229_v44  ;;  %v4232_v7 = vld [vmem:[#allocation12 + $0x1b0] sm:$0xff] }
 0x19b   : > { %5167 = vst [vmem:[#allocation97_spill] sm:$0xff] %v4217_v11  ;;  %1810 = vmatpush.msrb.mxu2 %v4232_v7  ;;  %v4235_v11 = vld [vmem:[#allocation12 + $0x1b8] sm:$0xff] }
 0x19c   : > { %5168 = vst [vmem:[#allocation98_spill] sm:$0xff] %v4220_v2  ;;  %1833 = vmatpush.msrb.mxu3 %v4235_v11  ;;  %v4238_v2 = vld [vmem:[#allocation12 + $0x180] sm:$0xff] }
 0x19d   : > { %5169 = vst [vmem:[#allocation99_spill] sm:$0xff] %v4223_v10  ;;  %1765 = vmatpush.msrb.mxu0 %v4238_v2  ;;  %v4241_v10 = vld [vmem:[#allocation12 + $0x188] sm:$0xff] }
 0x19e   : > { %5170 = vst [vmem:[#allocation100_spill] sm:$0xff] %v4226_v3  ;;  %1788 = vmatpush.msrb.mxu1 %v4241_v10  ;;  %v4244_v3 = vld [vmem:[#allocation12 + $0x190] sm:$0xff] }
 0x19f   : > { %5171 = vst [vmem:[#allocation101_spill] sm:$0xff] %v4229_v44  ;;  %1811 = vmatpush.msrb.mxu2 %v4244_v3  ;;  %v4247_v44 = vld [vmem:[#allocation12 + $0x198] sm:$0xff] }
 0x1a0   : > { %5172 = vst [vmem:[#allocation102_spill] sm:$0xff] %v4232_v7  ;;  %1834 = vmatpush.msrb.mxu3 %v4247_v44  ;;  %v4250_v7 = vld [vmem:[#allocation12 + $0x160] sm:$0xff] }
 0x1a1   : > { %5173 = vst [vmem:[#allocation103_spill] sm:$0xff] %v4235_v11  ;;  %1766 = vmatpush.msrb.mxu0 %v4250_v7  ;;  %v4253_v11 = vld [vmem:[#allocation12 + $0x168] sm:$0xff] }
 0x1a2   : > { %5174 = vst [vmem:[#allocation104_spill] sm:$0xff] %v4238_v2  ;;  %1789 = vmatpush.msrb.mxu1 %v4253_v11  ;;  %v4256_v2 = vld [vmem:[#allocation12 + $0x170] sm:$0xff] }
 0x1a3   : > { %5175 = vst [vmem:[#allocation105_spill] sm:$0xff] %v4241_v10  ;;  %1812 = vmatpush.msrb.mxu2 %v4256_v2  ;;  %v4259_v10 = vld [vmem:[#allocation12 + $0x178] sm:$0xff] }
 0x1a4   : > { %5176 = vst [vmem:[#allocation106_spill] sm:$0xff] %v4244_v3  ;;  %1835 = vmatpush.msrb.mxu3 %v4259_v10  ;;  %v4262_v3 = vld [vmem:[#allocation12 + $0x140] sm:$0xff] }
 0x1a5   : > { %5177 = vst [vmem:[#allocation107_spill] sm:$0xff] %v4247_v44  ;;  %1767 = vmatpush.msrb.mxu0 %v4262_v3  ;;  %v4265_v44 = vld [vmem:[#allocation12 + $0x148] sm:$0xff] }
 0x1a6   : > { %5178 = vst [vmem:[#allocation108_spill] sm:$0xff] %v4250_v7  ;;  %1790 = vmatpush.msrb.mxu1 %v4265_v44  ;;  %v4268_v7 = vld [vmem:[#allocation12 + $0x150] sm:$0xff] }
 0x1a7   : > { %5179 = vst [vmem:[#allocation109_spill] sm:$0xff] %v4253_v11  ;;  %1813 = vmatpush.msrb.mxu2 %v4268_v7  ;;  %v4271_v11 = vld [vmem:[#allocation12 + $0x158] sm:$0xff] }
 0x1a8   : > { %5180 = vst [vmem:[#allocation110_spill] sm:$0xff] %v4256_v2  ;;  %1836 = vmatpush.msrb.mxu3 %v4271_v11  ;;  %v4274_v2 = vld [vmem:[#allocation12 + $0x120] sm:$0xff] }
 0x1a9   : > { %5181 = vst [vmem:[#allocation111_spill] sm:$0xff] %v4259_v10  ;;  %1768 = vmatpush.msrb.mxu0 %v4274_v2  ;;  %v4277_v10 = vld [vmem:[#allocation12 + $0x128] sm:$0xff] }
 0x1aa   : > { %5182 = vst [vmem:[#allocation112_spill] sm:$0xff] %v4262_v3  ;;  %1791 = vmatpush.msrb.mxu1 %v4277_v10  ;;  %v4280_v3 = vld [vmem:[#allocation12 + $0x130] sm:$0xff] }
 0x1ab   : > { %5183 = vst [vmem:[#allocation113_spill] sm:$0xff] %v4265_v44  ;;  %1814 = vmatpush.msrb.mxu2 %v4280_v3  ;;  %v4283_v44 = vld [vmem:[#allocation12 + $0x138] sm:$0xff] }
 0x1ac   : > { %5184 = vst [vmem:[#allocation114_spill] sm:$0xff] %v4268_v7  ;;  %1837 = vmatpush.msrb.mxu3 %v4283_v44  ;;  %v4286_v7 = vld [vmem:[#allocation12 + $0x100] sm:$0xff] }
 0x1ad   : > { %5185 = vst [vmem:[#allocation115_spill] sm:$0xff] %v4271_v11  ;;  %1769 = vmatpush.msrb.mxu0 %v4286_v7  ;;  %v4289_v11 = vld [vmem:[#allocation12 + $0x108] sm:$0xff] }
 0x1ae   : > { %5186 = vst [vmem:[#allocation116_spill] sm:$0xff] %v4274_v2  ;;  %1792 = vmatpush.msrb.mxu1 %v4289_v11  ;;  %v4292_v2 = vld [vmem:[#allocation12 + $0x110] sm:$0xff] }
 0x1af   : > { %5187 = vst [vmem:[#allocation117_spill] sm:$0xff] %v4277_v10  ;;  %1815 = vmatpush.msrb.mxu2 %v4292_v2  ;;  %v4295_v10 = vld [vmem:[#allocation12 + $0x118] sm:$0xff] }
 0x1b0   : > { %5188 = vst [vmem:[#allocation118_spill] sm:$0xff] %v4280_v3  ;;  %1838 = vmatpush.msrb.mxu3 %v4295_v10  ;;  %v4298_v3 = vld [vmem:[#allocation12 + $0xe0] sm:$0xff] }
 0x1b1   : > { %5189 = vst [vmem:[#allocation119_spill] sm:$0xff] %v4283_v44  ;;  %1770 = vmatpush.msrb.mxu0 %v4298_v3  ;;  %v4301_v44 = vld [vmem:[#allocation12 + $0xe8] sm:$0xff] }
 0x1b2   : > { %5190 = vst [vmem:[#allocation120_spill] sm:$0xff] %v4286_v7  ;;  %1793 = vmatpush.msrb.mxu1 %v4301_v44  ;;  %v4304_v7 = vld [vmem:[#allocation12 + $0xf0] sm:$0xff] }
 0x1b3   : > { %5191 = vst [vmem:[#allocation121_spill] sm:$0xff] %v4289_v11  ;;  %1816 = vmatpush.msrb.mxu2 %v4304_v7  ;;  %v4307_v11 = vld [vmem:[#allocation12 + $0xf8] sm:$0xff] }
 0x1b4   : > { %5192 = vst [vmem:[#allocation122_spill] sm:$0xff] %v4292_v2  ;;  %1839 = vmatpush.msrb.mxu3 %v4307_v11  ;;  %v4310_v2 = vld [vmem:[#allocation12 + $0xc0] sm:$0xff] }
 0x1b5   : > { %5193 = vst [vmem:[#allocation123_spill] sm:$0xff] %v4295_v10  ;;  %1771 = vmatpush.msrb.mxu0 %v4310_v2  ;;  %v4313_v10 = vld [vmem:[#allocation12 + $0xc8] sm:$0xff] }
 0x1b6   : > { %5194 = vst [vmem:[#allocation124_spill] sm:$0xff] %v4298_v3  ;;  %1794 = vmatpush.msrb.mxu1 %v4313_v10  ;;  %v4316_v3 = vld [vmem:[#allocation12 + $0xd0] sm:$0xff] }
 0x1b7   : > { %5195 = vst [vmem:[#allocation125_spill] sm:$0xff] %v4301_v44  ;;  %1817 = vmatpush.msrb.mxu2 %v4316_v3  ;;  %v4319_v44 = vld [vmem:[#allocation12 + $0xd8] sm:$0xff] }
 0x1b8   : > { %5196 = vst [vmem:[#allocation126_spill] sm:$0xff] %v4304_v7  ;;  %1840 = vmatpush.msrb.mxu3 %v4319_v44  ;;  %v4322_v7 = vld [vmem:[#allocation12 + $0xa0] sm:$0xff] }
 0x1b9   : > { %5197 = vst [vmem:[#allocation127_spill] sm:$0xff] %v4307_v11  ;;  %1772 = vmatpush.msrb.mxu0 %v4322_v7  ;;  %v4325_v11 = vld [vmem:[#allocation12 + $0xa8] sm:$0xff] }
 0x1ba   : > { %5198 = vst [vmem:[#allocation128_spill] sm:$0xff] %v4310_v2  ;;  %1795 = vmatpush.msrb.mxu1 %v4325_v11  ;;  %v4328_v2 = vld [vmem:[#allocation12 + $0xb0] sm:$0xff] }
 0x1bb   : > { %5199 = vst [vmem:[#allocation129_spill] sm:$0xff] %v4313_v10  ;;  %1818 = vmatpush.msrb.mxu2 %v4328_v2  ;;  %v4331_v10 = vld [vmem:[#allocation12 + $0xb8] sm:$0xff] }
 0x1bc   : > { %5200 = vst [vmem:[#allocation130_spill] sm:$0xff] %v4316_v3  ;;  %1841 = vmatpush.msrb.mxu3 %v4331_v10  ;;  %v4334_v3 = vld [vmem:[#allocation12 + $0x80] sm:$0xff] }
 0x1bd   : > { %5201 = vst [vmem:[#allocation131_spill] sm:$0xff] %v4319_v44  ;;  %1773 = vmatpush.msrb.mxu0 %v4334_v3  ;;  %v4337_v44 = vld [vmem:[#allocation12 + $0x88] sm:$0xff] }
 0x1be   : > { %5202 = vst [vmem:[#allocation132_spill] sm:$0xff] %v4322_v7  ;;  %1796 = vmatpush.msrb.mxu1 %v4337_v44  ;;  %v4340_v7 = vld [vmem:[#allocation12 + $0x90] sm:$0xff] }
 0x1bf   : > { %5203 = vst [vmem:[#allocation133_spill] sm:$0xff] %v4325_v11  ;;  %1819 = vmatpush.msrb.mxu2 %v4340_v7  ;;  %v4343_v11 = vld [vmem:[#allocation12 + $0x98] sm:$0xff] }
 0x1c0   : > { %5204 = vst [vmem:[#allocation134_spill] sm:$0xff] %v4328_v2  ;;  %1842 = vmatpush.msrb.mxu3 %v4343_v11  ;;  %v4346_v2 = vld [vmem:[#allocation12 + $0x60] sm:$0xff] }
 0x1c1   : > { %5205 = vst [vmem:[#allocation135_spill] sm:$0xff] %v4331_v10  ;;  %1774 = vmatpush.msrb.mxu0 %v4346_v2  ;;  %v4349_v10 = vld [vmem:[#allocation12 + $0x68] sm:$0xff] }
 0x1c2   : > { %5206 = vst [vmem:[#allocation136_spill] sm:$0xff] %v4334_v3  ;;  %1797 = vmatpush.msrb.mxu1 %v4349_v10  ;;  %v4352_v3 = vld [vmem:[#allocation12 + $0x70] sm:$0xff] }
 0x1c3   : > { %5207 = vst [vmem:[#allocation137_spill] sm:$0xff] %v4337_v44  ;;  %1820 = vmatpush.msrb.mxu2 %v4352_v3  ;;  %v4355_v44 = vld [vmem:[#allocation12 + $0x78] sm:$0xff] }
 0x1c4   : > { %5208 = vst [vmem:[#allocation138_spill] sm:$0xff] %v4340_v7  ;;  %1843 = vmatpush.msrb.mxu3 %v4355_v44  ;;  %v4358_v7 = vld [vmem:[#allocation12 + $0x40] sm:$0xff] }
 0x1c5   : > { %5209 = vst [vmem:[#allocation139_spill] sm:$0xff] %v4343_v11  ;;  %1775 = vmatpush.msrb.mxu0 %v4358_v7  ;;  %v4361_v11 = vld [vmem:[#allocation12 + $0x48] sm:$0xff] }
 0x1c6   : > { %5210 = vst [vmem:[#allocation140_spill] sm:$0xff] %v4346_v2  ;;  %1798 = vmatpush.msrb.mxu1 %v4361_v11  ;;  %v4364_v2 = vld [vmem:[#allocation12 + $0x50] sm:$0xff] }
 0x1c7   : > { %5211 = vst [vmem:[#allocation141_spill] sm:$0xff] %v4349_v10  ;;  %1821 = vmatpush.msrb.mxu2 %v4364_v2  ;;  %v4367_v10 = vld [vmem:[#allocation12 + $0x58] sm:$0xff] }
 0x1c8   : > { %5212 = vst [vmem:[#allocation142_spill] sm:$0xff] %v4352_v3  ;;  %1844 = vmatpush.msrb.mxu3 %v4367_v10  ;;  %v4370_v3 = vld [vmem:[#allocation12 + $0x20] sm:$0xff] }
 0x1c9   : > { %5213 = vst [vmem:[#allocation143_spill] sm:$0xff] %v4355_v44  ;;  %1776 = vmatpush.msrb.mxu0 %v4370_v3  ;;  %v4373_v44 = vld [vmem:[#allocation12 + $0x28] sm:$0xff] }
 0x1ca   : > { %5214 = vst [vmem:[#allocation144_spill] sm:$0xff] %v4358_v7  ;;  %1799 = vmatpush.msrb.mxu1 %v4373_v44  ;;  %v4376_v7 = vld [vmem:[#allocation12 + $0x30] sm:$0xff] }
 0x1cb   : > { %5215 = vst [vmem:[#allocation145_spill] sm:$0xff] %v4361_v11  ;;  %1822 = vmatpush.msrb.mxu2 %v4376_v7  ;;  %v4379_v11 = vld [vmem:[#allocation12 + $0x38] sm:$0xff] }
 0x1cc   : > { %5216 = vst [vmem:[#allocation146_spill] sm:$0xff] %v4364_v2  ;;  %1845 = vmatpush.msrb.mxu3 %v4379_v11  ;;  %v4382_v2 = vld [vmem:[#allocation12] sm:$0xff] }
 0x1cd   : > { %5217 = vst [vmem:[#allocation147_spill] sm:$0xff] %v4367_v10  ;;  %1777 = vmatpush.msrb.mxu0 %v4382_v2  ;;  %v4385_v10 = vld [vmem:[#allocation12 + $0x8] sm:$0xff] }
 0x1ce   : > { %5218 = vst [vmem:[#allocation148_spill] sm:$0xff] %v4370_v3  ;;  %1800 = vmatpush.msrb.mxu1 %v4385_v10  ;;  %v4388_v3 = vld [vmem:[#allocation12 + $0x10] sm:$0xff] }
 0x1cf   : > { %5219 = vst [vmem:[#allocation149_spill] sm:$0xff] %v4373_v44  ;;  %1823 = vmatpush.msrb.mxu2 %v4388_v3  ;;  %v4391_v44 = vld [vmem:[#allocation12 + $0x18] sm:$0xff] }
 0x1d0   : > { %5220 = vst [vmem:[#allocation150_spill] sm:$0xff] %v4376_v7  ;;  %1846 = vmatpush.msrb.mxu3 %v4391_v44  ;;  %v560_v7 = vadd.f32 %v3679_v56, %v3932_v29  ;;  %v562_v56 = vadd.f32 %v3699_v61, %v3932_v29  ;;  %v620_v61 = vadd.f32 %v3713_v0, %v3944_v9 }
 0x1d1   : > { %5221 = vst [vmem:[#allocation151_spill] sm:$0xff] %v4379_v11  ;;  %v589_v11 = vadd.f32 %v3683_v58, %v3934_v46  ;;  %v591_v58 = vadd.f32 %v3703_v63, %v3934_v46  ;;  %v649_v63 = vadd.f32 %v3717_v1, %v3946_v35 }
 0x1d2   : > { %5222 = vst [vmem:[#allocation152_spill] sm:$0xff] %v4382_v2 }
 0x1d3   : > { %5223 = vst [vmem:[#allocation153_spill] sm:$0xff] %v4385_v10 }
 0x1d4   : > { %5224 = vst [vmem:[#allocation154_spill] sm:$0xff] %v4388_v3  ;;  %v618_v3 = vadd.f32 %v3693_v59, %v3944_v9 }
 0x1d5   : > { %5225 = vst [vmem:[#allocation155_spill] sm:$0xff] %v4391_v44 }
 0x1df   : > { %v1345_v43 = vpop.f32.mrf.mxu0  ;;  %v1368_v2 = vpop.f32.mrf.mxu1 }
 0x1e0   : > { %v1420_v14 = vadd.f32 %v1345_v43, %v560_v7  ;;  %v1421_v37 = vadd.f32 %v1368_v2, %v589_v11 }
 0x1e2   : > { %v1428_v18 = vmul.f32 0.5, %v1420_v14  ;;  %v1429_v10 = vmul.f32 0.5, %v1421_v37 }
 0x1e4   : > { %2636 = vtanh.f32 %v1428_v18 }
 0x1e5   : > { %2638 = vtanh.f32 %v1429_v10 }
 0x1e6   : > { %v1391_v44 = vpop.f32.mrf.mxu2  ;;  %v1414_v62 = vpop.f32.mrf.mxu3 }
 0x1e7   : > { %v1422_v7 = vadd.f32 %v1391_v44, %v618_v3  ;;  %v1423_v11 = vadd.f32 %v1414_v62, %v647_v51 }
 0x1e8   : > { %v1348_v14 = vpop.f32.mrf.mxu0  ;;  %v1371_v37 = vpop.f32.mrf.mxu1 }
 0x1e9   : > { %2640 = vtanh.f32 %v1422_v7  ;;  %v1431_v18 = vmul.f32 0.5, %v1423_v11  ;;  %v1424_v43 = vadd.f32 %v1348_v14, %v562_v56  ;;  %v1425_v59 = vadd.f32 %v1371_v37, %v591_v58 }
 0x1ea   : > { %v2637_v2 = vpop.eup %2636 }
 0x1eb   : > { %v2639_v28 = vpop.eup %2638  ;;  %v1444_v60 = vmul.f32 0.5, %v2637_v2  ;;  %2642 = vtanh.f32 %v1431_v18  ;;  %v1432_v10 = vmul.f32 0.5, %v1424_v43  ;;  %v1433_v31 = vmul.f32 0.5, %v1425_v59 }
 0x1ec   : > { %v1445_v12 = vmul.f32 0.5, %v2639_v28 }
 0x1ed   : > { %v1452_v19 = vadd.f32 0.5, %v1444_v60  ;;  %2644 = vtanh.f32 %v1432_v10 }
 0x1ee   : > { %v1453_v3 = vadd.f32 0.5, %v1445_v12  ;;  %2646 = vtanh.f32 %v1433_v31 }
 0x1ef   : > { %v2641_v62 = vpop.eup %2640  ;;  %v1394_v51 = vpop.f32.mrf.mxu2 }
 0x1f0   : > { %v1417_v44 = vpop.f32.mrf.mxu3  ;;  %v1460_v56 = vmul.f32 %v1453_v3, %v3962_v55  ;;  %v1462_v58 = vmul.f32 %v2641_v62, %v1452_v19  ;;  %v1426_v7 = vadd.f32 %v1394_v51, %v620_v61  ;;  %v1032_v3 = vld [vmem:[#allocation8] sm:$0xff] }
 0x1f1   : > { %v1427_v11 = vadd.f32 %v1417_v44, %v649_v63  ;;  %v2643_v14 = vpop.eup %2642  ;;  %v1487_v28 = vpop.f32.mrf.mxu0  ;;  %v1028_v63 = vld [vmem:[#allocation6] sm:$0xff] }
 0x1f2   : > { %v1510_v37 = vpop.f32.mrf.mxu1  ;;  %v4411_v18 = vadd.f32 %v1462_v58, %v1460_v56  ;;  %2648 = vtanh.f32 %v1426_v7  ;;  %v1562_v1 = vadd.f32 %v1487_v28, %v3898_v41  ;;  %v1447_v59 = vmul.f32 0.5, %v2643_v14 }
 0x1f3   : > { %v1435_v0 = vmul.f32 0.5, %v1427_v11  ;;  %v2645_v43 = vpop.eup %2644  ;;  %v1563_v31 = vadd.f32 %v1510_v37, %v3901_v49 }
 0x1f4   : > { %v2647_v12 = vpop.eup %2646  ;;  %2650 = vtanh.f32 %v4411_v18  ;;  %v1448_v55 = vmul.f32 0.5, %v2645_v43  ;;  %v1570_v2 = vmul.f32 0.5, %v1562_v1  ;;  %v1455_v51 = vadd.f32 0.5, %v1447_v59 }
 0x1f5   : > { %v1449_v19 = vmul.f32 0.5, %v2647_v12  ;;  %2652 = vtanh.f32 %v1435_v0  ;;  %v1571_v60 = vmul.f32 0.5, %v1563_v31  ;;  %v1320_v43 = vadd.f32 %v3973_v13, %v1028_v63 }
 0x1f6   : > { %v1456_v10 = vadd.f32 0.5, %v1448_v55  ;;  %2654 = vtanh.f32 %v1570_v2  ;;  %v1324_v1 = vmax.f32 %v1032_v3, %v3973_v13 }
 0x1f7   : > { %v1457_v61 = vadd.f32 0.5, %v1449_v19  ;;  %2656 = vtanh.f32 %v1571_v60 }
 0x1f8   : > { %v2649_v62 = vpop.eup %2648  ;;  %v1533_v41 = vpop.f32.mrf.mxu2 }
 0x1f9   : > { %v1556_v44 = vpop.f32.mrf.mxu3  ;;  %v1461_v49 = vmul.f32 %v1457_v61, %v3975_v33  ;;  %v1463_v56 = vmul.f32 %v2649_v62, %v1456_v10  ;;  %v1564_v58 = vadd.f32 %v1533_v41, %v3904_v57  ;;  %v1490_v11 = vpop.f32.mrf.mxu0 }
 0x1fa   : > { %v1565_v7 = vadd.f32 %v1556_v44, %v3907_v15  ;;  %v1513_v14 = vpop.f32.mrf.mxu1  ;;  %v2651_v28 = vpop.eup %2650  ;;  %v1566_v37 = vadd.f32 %v1490_v11, %v3910_v17 }
 0x1fb   : > { %v1567_v0 = vadd.f32 %v1513_v14, %v3913_v25  ;;  %v2653_v31 = vpop.eup %2652  ;;  %v1468_v12 = vmul.f32 %v2651_v28, %v1455_v51  ;;  %v4423_v59 = vadd.f32 %v1463_v56, %v1461_v49  ;;  %2658 = vtanh.f32 %v1564_v58  ;;  %v1034_v14 = vld [vmem:[#allocation9] sm:$0xff] }
 0x1fc   : > { %v1573_v33 = vmul.f32 0.5, %v1565_v7  ;;  %v1574_v57 = vmul.f32 0.5, %v1566_v37  ;;  %v2655_v15 = vpop.eup %2654  ;;  %v1451_v2 = vmul.f32 0.5, %v2653_v31  ;;  %v5226_v37 = vld [vmem:[#allocation46_spill] sm:$0xff] }
 0x1fd   : > { %v1575_v55 = vmul.f32 0.5, %v1567_v0  ;;  %2660 = vtanh.f32 %v4423_v59  ;;  %1636 = vmatmul.f32.vlgmr.msra.gmra.mxu0 %v1468_v12  ;;  %1659 = vmatmul.f32.vlgmr.msra.gmra.mxu1 %v1468_v12  ;;  %v4426_v17 = vadd.f32 %v1468_v12, %v1320_v43  ;;  %v4428_v25 = vmax.f32 %v1324_v1, %v1468_v12  ;;  %v2657_v19 = vpop.eup %2656  ;;  %v5230_v43 = vld [vmem:[#allocation51_spill] sm:$0xff] }
 0x1fe   : > { %v1586_v13 = vmul.f32 0.5, %v2655_v15  ;;  %2662 = vtanh.f32 %v1573_v33  ;;  %1682 = vmatmul.f32.vlgmr.msra.gmra.mxu2 %v1468_v12  ;;  %1705 = vmatmul.f32.vlgmr.msra.gmra.mxu3 %v1468_v12  ;;  %v1587_v60 = vmul.f32 0.5, %v2657_v19  ;;  %v1459_v44 = vadd.f32 0.5, %v1451_v2  ;;  %v5233_v12 = vld [vmem:[#allocation53_spill] sm:$0xff]  ;;  %v5234_v33 = vld [vmem:[#allocation54_spill] sm:$0xff]  ;;  %v5235_v19 = vld [vmem:[#allocation55_spill] sm:$0xff] }
 0x1ff   : > { %2664 = vtanh.f32 %v1574_v57  ;;  %1912 = vmatpush.msra.mxu0 %v3986_v48  ;;  %1935 = vmatpush.msra.mxu1 %v3989_v26  ;;  %v1029_v48 = vld [vmem:[#allocation6 + $0x8] sm:$0xff]  ;;  %v5236_v2 = vld [vmem:[#allocation56_spill] sm:$0xff] }
 0x200   : > { %v1594_v10 = vadd.f32 0.5, %v1586_v13  ;;  %2666 = vtanh.f32 %v1575_v55  ;;  %v1536_v61 = vpop.f32.mrf.mxu2  ;;  %1958 = vmatpush.msra.mxu2 %v3992_v22  ;;  %1981 = vmatpush.msra.mxu3 %v3995_v50  ;;  %v1595_v62 = vadd.f32 0.5, %v1587_v60  ;;  %v1033_v26 = vld [vmem:[#allocation8 + $0x8] sm:$0xff]  ;;  %v5238_v60 = vld [vmem:[#allocation58_spill] sm:$0xff] }
 0x201   : > { %v1559_v63 = vpop.f32.mrf.mxu3  ;;  %v2659_v3 = vpop.eup %2658  ;;  %v1568_v51 = vadd.f32 %v1536_v61, %v3916_v34  ;;  %1913 = vmatpush.msra.mxu0 %v3998_v47  ;;  %1936 = vmatpush.msra.mxu1 %v4001_v16  ;;  %v1321_v47 = vadd.f32 %v4016_v42, %v1029_v48  ;;  %v1325_v16 = vmax.f32 %v1033_v26, %v4016_v42  ;;  %v5237_v13 = vld [vmem:[#allocation57_spill] sm:$0xff]  ;;  %v1035_v61 = vld [vmem:[#allocation9 + $0x8] sm:$0xff] }
 0x202   : > { %v1569_v41 = vadd.f32 %v1559_v63, %v3919_v21  ;;  %v1604_v49 = vmul.f32 %v2659_v3, %v1594_v10  ;;  %1959 = vmatpush.msra.mxu2 %v4004_v45  ;;  %1982 = vmatpush.msra.mxu3 %v4007_v27  ;;  %v1602_v50 = vmul.f32 %v1595_v62, %v4018_v4  ;;  %v1031_v10 = vld [vmem:[#allocation7] sm:$0xff]  ;;  %v5239_v3 = vld [vmem:[#allocation59_spill] sm:$0xff]  ;;  %v5240_v62 = vld [vmem:[#allocation60_spill] sm:$0xff] }
 0x203   : > { %v2661_v22 = vpop.eup %2660  ;;  %2668 = vtanh.f32 %v1568_v51  ;;  %1914 = vmatpush.msra.mxu0 %v4010_v24  ;;  %1937 = vmatpush.msra.mxu1 %v4013_v39  ;;  %v5242_v48 = vld [vmem:[#allocation63_spill] sm:$0xff] }
 0x204   : > { %v1577_v56 = vmul.f32 0.5, %v1569_v41  ;;  %v2663_v34 = vpop.eup %2662  ;;  %v1469_v21 = vmul.f32 %v2661_v22, %v1459_v44  ;;  %1960 = vmatpush.msra.mxu2 %v4020_v52  ;;  %1983 = vmatpush.msra.mxu3 %v4023_v8  ;;  %v4447_v27 = vadd.f32 %v1604_v49, %v1602_v50  ;;  %v5241_v41 = vld [vmem:[#allocation62_spill] sm:$0xff]  ;;  %v5243_v44 = vld [vmem:[#allocation64_spill] sm:$0xff]  ;;  %v5244_v49 = vld [vmem:[#allocation65_spill] sm:$0xff] }
 0x205   : > { %v2665_v45 = vpop.eup %2664  ;;  %1915 = vmatpush.msra.mxu0 %v4026_v38  ;;  %1938 = vmatpush.msra.mxu1 %v4029_v30  ;;  %v1589_v42 = vmul.f32 0.5, %v2663_v34  ;;  %v5245_v22 = vld [vmem:[#allocation61_spill] sm:$0xff]  ;;  %v5246_v34 = vld [vmem:[#allocation66_spill] sm:$0xff] }
 0x206   : > { %v2667_v24 = vpop.eup %2666  ;;  %v1590_v4 = vmul.f32 0.5, %v2665_v45  ;;  %2670 = vtanh.f32 %v1577_v56  ;;  %1639 = vmatmul.f32.gmra.mxu0 %v1469_v21  ;;  %1662 = vmatmul.f32.gmra.mxu1 %v1469_v21  ;;  %v4451_v39 = vadd.f32 %v1469_v21, %v1321_v47  ;;  %v4453_v52 = vmax.f32 %v1325_v16, %v1469_v21  ;;  %v5248_v45 = vld [vmem:[#allocation68_spill] sm:$0xff] }
 0x207   : > { %2672 = vtanh.f32 %v4447_v27  ;;  %v1591_v8 = vmul.f32 0.5, %v2667_v24  ;;  %1685 = vmatmul.f32.gmra.mxu2 %v1469_v21  ;;  %1708 = vmatmul.f32.gmra.mxu3 %v1469_v21  ;;  %v1597_v28 = vadd.f32 0.5, %v1589_v42  ;;  %v1323_v50 = vadd.f32 %v5245_v22, %v1031_v10  ;;  %v5247_v21 = vld [vmem:[#allocation67_spill] sm:$0xff]  ;;  %v5249_v24 = vld [vmem:[#allocation69_spill] sm:$0xff]  ;;  %v5252_v42 = vld [vmem:[#allocation72_spill] sm:$0xff] }
 0x208   : > { %v1598_v58 = vadd.f32 0.5, %v1590_v4  ;;  %1961 = vmatpush.msra.mxu2 %v4037_v40  ;;  %1984 = vmatpush.msra.mxu3 %v4040_v23  ;;  %v1030_v40 = vld [vmem:[#allocation7 + $0x8] sm:$0xff]  ;;  %v1327_v56 = vmax.f32 %v1035_v61, %v5245_v22  ;;  %v5250_v4 = vld [vmem:[#allocation70_spill] sm:$0xff]  ;;  %v5291_v22 = vld [vmem:[#allocation113_spill] sm:$0xff] }
 0x209   : > { %v2669_v38 = vpop.eup %2668  ;;  %v1599_v30 = vadd.f32 0.5, %v1591_v8  ;;  %1916 = vmatpush.msra.mxu0 %v4043_v54  ;;  %1939 = vmatpush.msra.mxu1 %v4046_v5  ;;  %v5227_v54 = vld [vmem:[#allocation47_spill] sm:$0xff]  ;;  %v5280_v10 = vld [vmem:[#allocation102_spill] sm:$0xff] }
 0x20a   : > { %v1605_v7 = vmul.f32 %v2669_v38, %v1598_v58  ;;  %1962 = vmatpush.msra.mxu2 %v4049_v32  ;;  %1985 = vmatpush.msra.mxu3 %v4052_v20  ;;  %v5228_v32 = vld [vmem:[#allocation49_spill] sm:$0xff]  ;;  %v5229_v20 = vld [vmem:[#allocation50_spill] sm:$0xff]  ;;  %v5251_v8 = vld [vmem:[#allocation71_spill] sm:$0xff] }
 0x20b   : > { %v1603_v11 = vmul.f32 %v1599_v30, %v4061_v36  ;;  %1917 = vmatpush.msra.mxu0 %v4055_v53  ;;  %1940 = vmatpush.msra.mxu1 %v4058_v6  ;;  %v5231_v53 = vld [vmem:[#allocation52_spill] sm:$0xff]  ;;  %v5253_v58 = vld [vmem:[#allocation73_spill] sm:$0xff]  ;;  %v5254_v38 = vld [vmem:[#allocation74_spill] sm:$0xff] }
 0x20c   : > { %v2671_v23 = vpop.eup %2670  ;;  %1963 = vmatpush.msra.mxu2 %v5226_v37  ;;  %1986 = vmatpush.msra.mxu3 %v5227_v54  ;;  %v5232_v6 = vld [vmem:[#allocation48_spill] sm:$0xff]  ;;  %v5255_v30 = vld [vmem:[#allocation75_spill] sm:$0xff]  ;;  %v5262_v37 = vld [vmem:[#allocation82_spill] sm:$0xff] }
 0x20d   : > { %v2673_v5 = vpop.eup %2672  ;;  %v4467_v0 = vadd.f32 %v1605_v7, %v1603_v11  ;;  %1918 = vmatpush.msra.mxu0 %v5228_v32  ;;  %1941 = vmatpush.msra.mxu1 %v5229_v20  ;;  %v1322_v1 = vadd.f32 %v5232_v6, %v1030_v40  ;;  %v1326_v31 = vmax.f32 %v1034_v14, %v5232_v6  ;;  %v1593_v57 = vmul.f32 0.5, %v2671_v23  ;;  %v5256_v7 = vld [vmem:[#allocation76_spill] sm:$0xff]  ;;  %v5257_v11 = vld [vmem:[#allocation77_spill] sm:$0xff]  ;;  %v5258_v40 = vld [vmem:[#allocation78_spill] sm:$0xff] }
 0x20e   : > { %v1610_v36 = vmul.f32 %v2673_v5, %v1597_v28  ;;  %1964 = vmatpush.msra.mxu2 %v5230_v43  ;;  %1987 = vmatpush.msra.mxu3 %v5231_v53  ;;  %v5259_v14 = vld [vmem:[#allocation79_spill] sm:$0xff]  ;;  %v5260_v23 = vld [vmem:[#allocation80_spill] sm:$0xff]  ;;  %v5261_v28 = vld [vmem:[#allocation81_spill] sm:$0xff] }
 0x20f   : > { %2674 = vtanh.f32 %v4467_v0  ;;  %1919 = vmatpush.msra.mxu0 %v5233_v12  ;;  %1942 = vmatpush.msra.mxu1 %v5234_v33  ;;  %v1601_v63 = vadd.f32 0.5, %v1593_v57  ;;  %v5263_v54 = vld [vmem:[#allocation83_spill] sm:$0xff]  ;;  %v5264_v5 = vld [vmem:[#allocation84_spill] sm:$0xff]  ;;  %v5265_v32 = vld [vmem:[#allocation85_spill] sm:$0xff] }
 0x210   : > { %1778 = vmatmul.f32.vlgmr.msrb.gmra.mxu0 %v1610_v36  ;;  %1801 = vmatmul.f32.vlgmr.msrb.gmra.mxu1 %v1610_v36  ;;  %v4478_v55 = vadd.f32 %v1610_v36, %v1322_v1  ;;  %v4480_v15 = vmax.f32 %v1326_v31, %v1610_v36  ;;  %v5266_v20 = vld [vmem:[#allocation86_spill] sm:$0xff]  ;;  %v5269_v53 = vld [vmem:[#allocation91_spill] sm:$0xff]  ;;  %v5270_v6 = vld [vmem:[#allocation92_spill] sm:$0xff] }
 0x211   : > { %1824 = vmatmul.f32.vlgmr.msrb.gmra.mxu2 %v1610_v36  ;;  %1847 = vmatmul.f32.vlgmr.msrb.gmra.mxu3 %v1610_v36  ;;  %v5267_v36 = vld [vmem:[#allocation89_spill] sm:$0xff]  ;;  %v5268_v43 = vld [vmem:[#allocation90_spill] sm:$0xff]  ;;  %v5273_v12 = vld [vmem:[#allocation95_spill] sm:$0xff] }
 0x212   : > { %1965 = vmatpush.msra.mxu2 %v5235_v19  ;;  %1988 = vmatpush.msra.mxu3 %v5236_v2  ;;  %v5271_v1 = vld [vmem:[#allocation93_spill] sm:$0xff]  ;;  %v5272_v31 = vld [vmem:[#allocation94_spill] sm:$0xff]  ;;  %v5274_v33 = vld [vmem:[#allocation96_spill] sm:$0xff] }
 0x213   : > { %1920 = vmatpush.msra.mxu0 %v5237_v13  ;;  %1943 = vmatpush.msra.mxu1 %v5238_v60  ;;  %v5275_v57 = vld [vmem:[#allocation97_spill] sm:$0xff]  ;;  %v5276_v19 = vld [vmem:[#allocation98_spill] sm:$0xff]  ;;  %v5277_v2 = vld [vmem:[#allocation99_spill] sm:$0xff] }
 0x214   : > { %1966 = vmatpush.msra.mxu2 %v5239_v3  ;;  %1989 = vmatpush.msra.mxu3 %v5240_v62  ;;  %v5278_v13 = vld [vmem:[#allocation100_spill] sm:$0xff]  ;;  %v5279_v60 = vld [vmem:[#allocation101_spill] sm:$0xff]  ;;  %v5281_v61 = vld [vmem:[#allocation103_spill] sm:$0xff] }
 0x215   : > { %v2675_v51 = vpop.eup %2674  ;;  %1921 = vmatpush.msra.mxu0 %v5241_v41  ;;  %1944 = vmatpush.msra.mxu1 %v5242_v48  ;;  %v5283_v3 = vld [vmem:[#allocation105_spill] sm:$0xff]  ;;  %v5284_v62 = vld [vmem:[#allocation106_spill] sm:$0xff]  ;;  %v5286_v41 = vld [vmem:[#allocation108_spill] sm:$0xff] }
 0x216   : > { %v1611_v26 = vmul.f32 %v2675_v51, %v1601_v63  ;;  %1967 = vmatpush.msra.mxu2 %v5243_v44  ;;  %1990 = vmatpush.msra.mxu3 %v5244_v49  ;;  %v5282_v63 = vld [vmem:[#allocation104_spill] sm:$0xff]  ;;  %v5285_v51 = vld [vmem:[#allocation107_spill] sm:$0xff]  ;;  %v5287_v48 = vld [vmem:[#allocation109_spill] sm:$0xff] }
 0x217   : > { %1922 = vmatpush.msra.mxu0 %v5246_v34  ;;  %1945 = vmatpush.msra.mxu1 %v5247_v21  ;;  %v5289_v44 = vld [vmem:[#allocation111_spill] sm:$0xff]  ;;  %v5290_v49 = vld [vmem:[#allocation112_spill] sm:$0xff]  ;;  %v5295_v21 = vld [vmem:[#allocation117_spill] sm:$0xff] }
 0x218   : > { %1781 = vmatmul.f32.gmra.mxu0 %v1611_v26  ;;  %1804 = vmatmul.f32.gmra.mxu1 %v1611_v26  ;;  %v4496_v47 = vadd.f32 %v1611_v26, %v1323_v50  ;;  %v4498_v16 = vmax.f32 %v1327_v56, %v1611_v26  ;;  %v5292_v50 = vld [vmem:[#allocation114_spill] sm:$0xff]  ;;  %v5293_v56 = vld [vmem:[#allocation115_spill] sm:$0xff]  ;;  %v5294_v34 = vld [vmem:[#allocation116_spill] sm:$0xff] }
 0x219   : > { %1827 = vmatmul.f32.gmra.mxu2 %v1611_v26  ;;  %1850 = vmatmul.f32.gmra.mxu3 %v1611_v26  ;;  %v5288_v26 = vld [vmem:[#allocation110_spill] sm:$0xff] }
 0x21a   : > { %1968 = vmatpush.msra.mxu2 %v5248_v45  ;;  %1991 = vmatpush.msra.mxu3 %v5249_v24  ;;  %v5296_v45 = vld [vmem:[#allocation118_spill] sm:$0xff]  ;;  %v5297_v24 = vld [vmem:[#allocation119_spill] sm:$0xff] }
 0x21b   : > { %1923 = vmatpush.msra.mxu0 %v5250_v4  ;;  %1946 = vmatpush.msra.mxu1 %v5251_v8  ;;  %v5298_v4 = vld [vmem:[#allocation120_spill] sm:$0xff]  ;;  %v5299_v8 = vld [vmem:[#allocation121_spill] sm:$0xff] }
 0x21c   : > { %1969 = vmatpush.msra.mxu2 %v5252_v42  ;;  %1992 = vmatpush.msra.mxu3 %v5253_v58  ;;  %v5300_v42 = vld [vmem:[#allocation122_spill] sm:$0xff]  ;;  %v5301_v58 = vld [vmem:[#allocation123_spill] sm:$0xff] }
 0x21d   : > { %1924 = vmatpush.msra.mxu0 %v5254_v38  ;;  %1947 = vmatpush.msra.mxu1 %v5255_v30  ;;  %v5302_v38 = vld [vmem:[#allocation124_spill] sm:$0xff]  ;;  %v5303_v30 = vld [vmem:[#allocation125_spill] sm:$0xff] }
 0x21e   : > { %1970 = vmatpush.msra.mxu2 %v5256_v7  ;;  %1993 = vmatpush.msra.mxu3 %v5257_v11  ;;  %v5304_v7 = vld [vmem:[#allocation126_spill] sm:$0xff]  ;;  %v5305_v11 = vld [vmem:[#allocation127_spill] sm:$0xff] }
 0x21f   : > { %1925 = vmatpush.msra.mxu0 %v5258_v40  ;;  %1948 = vmatpush.msra.mxu1 %v5259_v14  ;;  %v5306_v40 = vld [vmem:[#allocation128_spill] sm:$0xff]  ;;  %v5307_v14 = vld [vmem:[#allocation129_spill] sm:$0xff] }
 0x220   : > { %1971 = vmatpush.msra.mxu2 %v5260_v23  ;;  %1994 = vmatpush.msra.mxu3 %v5261_v28  ;;  %v5308_v23 = vld [vmem:[#allocation130_spill] sm:$0xff]  ;;  %v5309_v28 = vld [vmem:[#allocation131_spill] sm:$0xff] }
 0x221   : > { %1926 = vmatpush.msra.mxu0 %v5262_v37  ;;  %1949 = vmatpush.msra.mxu1 %v5263_v54  ;;  %v5310_v37 = vld [vmem:[#allocation132_spill] sm:$0xff]  ;;  %v5311_v54 = vld [vmem:[#allocation133_spill] sm:$0xff] }
 0x222   : > { %1972 = vmatpush.msra.mxu2 %v5264_v5  ;;  %1995 = vmatpush.msra.mxu3 %v5265_v32  ;;  %v5312_v5 = vld [vmem:[#allocation134_spill] sm:$0xff]  ;;  %v5313_v32 = vld [vmem:[#allocation135_spill] sm:$0xff] }
 0x223   : > { %1927 = vmatpush.msra.mxu0 %v5266_v20  ;;  %1950 = vmatpush.msra.mxu1 %v5267_v36  ;;  %v5314_v20 = vld [vmem:[#allocation136_spill] sm:$0xff]  ;;  %v5315_v36 = vld [vmem:[#allocation137_spill] sm:$0xff] }
 0x224   : > { %1973 = vmatpush.msra.mxu2 %v5268_v43  ;;  %1996 = vmatpush.msra.mxu3 %v5269_v53  ;;  %v5316_v43 = vld [vmem:[#allocation138_spill] sm:$0xff]  ;;  %v5317_v53 = vld [vmem:[#allocation139_spill] sm:$0xff] }
 0x225   : > { %2054 = vmatpush.msrb.mxu0 %v5270_v6  ;;  %2077 = vmatpush.msrb.mxu1 %v5271_v1  ;;  %v5318_v6 = vld [vmem:[#allocation140_spill] sm:$0xff]  ;;  %v5319_v1 = vld [vmem:[#allocation141_spill] sm:$0xff] }
 0x226   : > { %2100 = vmatpush.msrb.mxu2 %v5272_v31  ;;  %2123 = vmatpush.msrb.mxu3 %v5273_v12  ;;  %v5320_v31 = vld [vmem:[#allocation142_spill] sm:$0xff]  ;;  %v5321_v12 = vld [vmem:[#allocation143_spill] sm:$0xff] }
 0x227   : > { %2055 = vmatpush.msrb.mxu0 %v5274_v33  ;;  %2078 = vmatpush.msrb.mxu1 %v5275_v57  ;;  %v5322_v33 = vld [vmem:[#allocation144_spill] sm:$0xff]  ;;  %v5323_v57 = vld [vmem:[#allocation145_spill] sm:$0xff] }
 0x228   : > { %2101 = vmatpush.msrb.mxu2 %v5276_v19  ;;  %2124 = vmatpush.msrb.mxu3 %v5277_v2  ;;  %v5324_v19 = vld [vmem:[#allocation146_spill] sm:$0xff]  ;;  %v5325_v2 = vld [vmem:[#allocation147_spill] sm:$0xff] }
 0x229   : > { %2056 = vmatpush.msrb.mxu0 %v5278_v13  ;;  %2079 = vmatpush.msrb.mxu1 %v5279_v60  ;;  %v5326_v13 = vld [vmem:[#allocation148_spill] sm:$0xff]  ;;  %v5327_v60 = vld [vmem:[#allocation149_spill] sm:$0xff] }
 0x22a   : > { %2102 = vmatpush.msrb.mxu2 %v5280_v10  ;;  %2125 = vmatpush.msrb.mxu3 %v5281_v61  ;;  %v5328_v10 = vld [vmem:[#allocation150_spill] sm:$0xff]  ;;  %v5329_v61 = vld [vmem:[#allocation151_spill] sm:$0xff] }
 0x22b   : > { %2057 = vmatpush.msrb.mxu0 %v5282_v63  ;;  %2080 = vmatpush.msrb.mxu1 %v5283_v3  ;;  %v5330_v63 = vld [vmem:[#allocation152_spill] sm:$0xff]  ;;  %v5331_v3 = vld [vmem:[#allocation153_spill] sm:$0xff] }
 0x22c   : > { %2103 = vmatpush.msrb.mxu2 %v5284_v62  ;;  %2126 = vmatpush.msrb.mxu3 %v5285_v51  ;;  %v5332_v62 = vld [vmem:[#allocation154_spill] sm:$0xff]  ;;  %v5333_v51 = vld [vmem:[#allocation155_spill] sm:$0xff] }
 0x22d   : > { %2058 = vmatpush.msrb.mxu0 %v5286_v41  ;;  %2081 = vmatpush.msrb.mxu1 %v5287_v48  ;;  %v5334_v41 = vld [vmem:[#allocation87_spill] sm:$0xff] }
 0x22e   : > { %2104 = vmatpush.msrb.mxu2 %v5288_v26  ;;  %2127 = vmatpush.msrb.mxu3 %v5289_v44  ;;  %v565_v48 = vadd.f32 %v5334_v41, %v3932_v29  ;;  %v5335_v26 = vld [vmem:[#allocation88_spill] sm:$0xff] }
 0x22f   : > { %2059 = vmatpush.msrb.mxu0 %v5290_v49  ;;  %2082 = vmatpush.msrb.mxu1 %v5291_v22  ;;  %v594_v44 = vadd.f32 %v5335_v26, %v3934_v46 }
 0x230   : > { %2105 = vmatpush.msrb.mxu2 %v5292_v50  ;;  %2128 = vmatpush.msrb.mxu3 %v5293_v56 }
 0x231   : > { %2060 = vmatpush.msrb.mxu0 %v5294_v34  ;;  %2083 = vmatpush.msrb.mxu1 %v5295_v21 }
 0x232   : > { %2106 = vmatpush.msrb.mxu2 %v5296_v45  ;;  %2129 = vmatpush.msrb.mxu3 %v5297_v24  ;;  %v5336_v45 = vld [vmem:[#allocation16_spill] sm:$0xff] }
 0x233   : > { %2061 = vmatpush.msrb.mxu0 %v5298_v4  ;;  %2084 = vmatpush.msrb.mxu1 %v5299_v8  ;;  %v623_v24 = vadd.f32 %v5336_v45, %v3944_v9  ;;  %v5337_v4 = vld [vmem:[#allocation17_spill] sm:$0xff] }
 0x234   : > { %2107 = vmatpush.msrb.mxu2 %v5300_v42  ;;  %2130 = vmatpush.msrb.mxu3 %v5301_v58  ;;  %v652_v8 = vadd.f32 %v5337_v4, %v3946_v35 }
 0x235   : > { %2062 = vmatpush.msrb.mxu0 %v5302_v38  ;;  %2085 = vmatpush.msrb.mxu1 %v5303_v30  ;;  %v5338_v38 = vld [vmem:[#allocation20_spill] sm:$0xff] }
 0x236   : > { %2108 = vmatpush.msrb.mxu2 %v5304_v7  ;;  %2131 = vmatpush.msrb.mxu3 %v5305_v11  ;;  %v567_v30 = vadd.f32 %v5338_v38, %v3932_v29  ;;  %v5339_v7 = vld [vmem:[#allocation18_spill] sm:$0xff] }
 0x237   : > { %2063 = vmatpush.msrb.mxu0 %v5306_v40  ;;  %2086 = vmatpush.msrb.mxu1 %v5307_v14  ;;  %v596_v11 = vadd.f32 %v5339_v7, %v3934_v46 }
 0x238   : > { %2109 = vmatpush.msrb.mxu2 %v5308_v23  ;;  %2132 = vmatpush.msrb.mxu3 %v5309_v28 }
 0x239   : > { %2064 = vmatpush.msrb.mxu0 %v5310_v37  ;;  %2087 = vmatpush.msrb.mxu1 %v5311_v54 }
 0x23a   : > { %2110 = vmatpush.msrb.mxu2 %v5312_v5  ;;  %2133 = vmatpush.msrb.mxu3 %v5313_v32 }
 0x23b   : > { %2065 = vmatpush.msrb.mxu0 %v5314_v20  ;;  %2088 = vmatpush.msrb.mxu1 %v5315_v36 }
 0x23c   : > { %2111 = vmatpush.msrb.mxu2 %v5316_v43  ;;  %2134 = vmatpush.msrb.mxu3 %v5317_v53 }
 0x23d   : > { %2066 = vmatpush.msrb.mxu0 %v5318_v6  ;;  %2089 = vmatpush.msrb.mxu1 %v5319_v1 }
 0x23e   : > { %2112 = vmatpush.msrb.mxu2 %v5320_v31  ;;  %2135 = vmatpush.msrb.mxu3 %v5321_v12  ;;  %v5340_v31 = vld [vmem:[#allocation19_spill] sm:$0xff] }
 0x23f   : > { %2067 = vmatpush.msrb.mxu0 %v5322_v33  ;;  %2090 = vmatpush.msrb.mxu1 %v5323_v57  ;;  %v625_v12 = vadd.f32 %v5340_v31, %v3944_v9  ;;  %v5341_v33 = vld [vmem:[#allocation21_spill] sm:$0xff] }
 0x240   : > { %2113 = vmatpush.msrb.mxu2 %v5324_v19  ;;  %2136 = vmatpush.msrb.mxu3 %v5325_v2  ;;  %v654_v57 = vadd.f32 %v5341_v33, %v3946_v35 }
 0x241   : > { %2068 = vmatpush.msrb.mxu0 %v5326_v13  ;;  %2091 = vmatpush.msrb.mxu1 %v5327_v60 }
 0x242   : > { %2114 = vmatpush.msrb.mxu2 %v5328_v10  ;;  %2137 = vmatpush.msrb.mxu3 %v5329_v61 }
 0x243   : > { %2069 = vmatpush.msrb.mxu0 %v5330_v63  ;;  %2092 = vmatpush.msrb.mxu1 %v5331_v3 }
 0x244   : > { %2115 = vmatpush.msrb.mxu2 %v5332_v62  ;;  %2138 = vmatpush.msrb.mxu3 %v5333_v51 }
 0x27a   : > { %v1637_v49 = vpop.f32.mrf.mxu0  ;;  %v1660_v22 = vpop.f32.mrf.mxu1 }
 0x27b   : > { %v1712_v50 = vadd.f32 %v1637_v49, %v565_v48  ;;  %v1713_v56 = vadd.f32 %v1660_v22, %v594_v44  ;;  %v5342_v49 = vld [vmem:[#allocation38_spill] sm:$0xff] }
 0x27d   : > { %v1720_v34 = vmul.f32 0.5, %v1712_v50  ;;  %v1721_v21 = vmul.f32 0.5, %v1713_v56  ;;  %v5343_v50 = vld [vmem:[#allocation39_spill] sm:$0xff] }
 0x27f   : > { %2676 = vtanh.f32 %v1720_v34 }
 0x280   : > { %2678 = vtanh.f32 %v1721_v21 }
 0x281   : > { %v1683_v42 = vpop.f32.mrf.mxu2  ;;  %v1706_v58 = vpop.f32.mrf.mxu3 }
 0x282   : > { %v1714_v40 = vadd.f32 %v1683_v42, %v623_v24  ;;  %v1715_v14 = vadd.f32 %v1706_v58, %v652_v8 }
 0x283   : > { %v1640_v23 = vpop.f32.mrf.mxu0  ;;  %v1663_v28 = vpop.f32.mrf.mxu1 }
 0x284   : > { %2680 = vtanh.f32 %v1714_v40  ;;  %v1723_v37 = vmul.f32 0.5, %v1715_v14  ;;  %v1716_v54 = vadd.f32 %v1640_v23, %v567_v30  ;;  %v1717_v5 = vadd.f32 %v1663_v28, %v596_v11  ;;  %v5344_v23 = vld [vmem:[#allocation40_spill] sm:$0xff] }
 0x285   : > { %v2677_v32 = vpop.eup %2676 }
 0x286   : > { %v2679_v20 = vpop.eup %2678  ;;  %v1736_v36 = vmul.f32 0.5, %v2677_v32  ;;  %2682 = vtanh.f32 %v1723_v37  ;;  %v1724_v43 = vmul.f32 0.5, %v1716_v54  ;;  %v1725_v53 = vmul.f32 0.5, %v1717_v5  ;;  %v5345_v37 = vld [vmem:[#allocation41_spill] sm:$0xff] }
 0x287   : > { %v1737_v6 = vmul.f32 0.5, %v2679_v20 }
 0x288   : > { %v1744_v1 = vadd.f32 0.5, %v1736_v36  ;;  %2684 = vtanh.f32 %v1724_v43 }
 0x289   : > { %v1745_v19 = vadd.f32 0.5, %v1737_v6  ;;  %2686 = vtanh.f32 %v1725_v53  ;;  %v5346_v53 = vld [vmem:[#allocation42_spill] sm:$0xff] }
 0x28a   : > { %v2681_v2 = vpop.eup %2680  ;;  %v1686_v13 = vpop.f32.mrf.mxu2 }
 0x28b   : > { %v1709_v60 = vpop.f32.mrf.mxu3  ;;  %v1752_v10 = vmul.f32 %v1745_v19, %v4411_v18  ;;  %v1754_v61 = vmul.f32 %v2681_v2, %v1744_v1  ;;  %v1718_v63 = vadd.f32 %v1686_v13, %v625_v12  ;;  %v5347_v1 = vld [vmem:[#allocation43_spill] sm:$0xff] }
 0x28c   : > { %v1719_v3 = vadd.f32 %v1709_v60, %v654_v57  ;;  %v2683_v62 = vpop.eup %2682 }
 0x28d   : > { %v4603_v51 = vadd.f32 %v1754_v61, %v1752_v10  ;;  %2688 = vtanh.f32 %v1718_v63  ;;  %v1779_v48 = vpop.f32.mrf.mxu0  ;;  %v1802_v26 = vpop.f32.mrf.mxu1  ;;  %v1739_v21 = vmul.f32 0.5, %v2683_v62 }
 0x28e   : > { %v1727_v41 = vmul.f32 0.5, %v1719_v3  ;;  %v2685_v44 = vpop.eup %2684  ;;  %v1854_v22 = vadd.f32 %v1779_v48, %v5342_v49  ;;  %v1855_v56 = vadd.f32 %v1802_v26, %v5343_v50  ;;  %v5348_v26 = vld [vmem:[#allocation44_spill] sm:$0xff]  ;;  %v5349_v49 = vld [vmem:[#allocation45_spill] sm:$0xff] }
 0x28f   : > { %v2687_v34 = vpop.eup %2686  ;;  %2690 = vtanh.f32 %v4603_v51  ;;  %v1740_v18 = vmul.f32 0.5, %v2685_v44  ;;  %v1747_v38 = vadd.f32 0.5, %v1739_v21 }
 0x290   : > { %v1741_v45 = vmul.f32 0.5, %v2687_v34  ;;  %2692 = vtanh.f32 %v1727_v41  ;;  %v1862_v24 = vmul.f32 0.5, %v1854_v22  ;;  %v1863_v4 = vmul.f32 0.5, %v1855_v56 }
 0x291   : > { %v1748_v8 = vadd.f32 0.5, %v1740_v18 }
 0x292   : > { %v1749_v42 = vadd.f32 0.5, %v1741_v45  ;;  %2694 = vtanh.f32 %v1862_v24 }
 0x293   : > { %v2689_v58 = vpop.eup %2688  ;;  %2696 = vtanh.f32 %v1863_v4 }
 0x294   : > { %v1753_v30 = vmul.f32 %v1749_v42, %v4423_v59  ;;  %v1755_v7 = vmul.f32 %v2689_v58, %v1748_v8  ;;  %v1825_v11 = vpop.f32.mrf.mxu2  ;;  %v1848_v40 = vpop.f32.mrf.mxu3 }
 0x295   : > { %v2691_v14 = vpop.eup %2690  ;;  %v1856_v28 = vadd.f32 %v1825_v11, %v5344_v23  ;;  %v1857_v54 = vadd.f32 %v1848_v40, %v5345_v37  ;;  %v1782_v5 = vpop.f32.mrf.mxu0 }
 0x296   : > { %v1805_v32 = vpop.f32.mrf.mxu1  ;;  %v2693_v20 = vpop.eup %2692  ;;  %v4611_v36 = vmul.f32 %v2691_v14, %v1747_v38  ;;  %v4613_v43 = vadd.f32 %v1755_v7, %v1753_v30  ;;  %v1858_v6 = vadd.f32 %v1782_v5, %v5346_v53 }
 0x297   : > { %v1859_v31 = vadd.f32 %v1805_v32, %v5347_v1  ;;  %2698 = vtanh.f32 %v1856_v28  ;;  %v1865_v59 = vmul.f32 0.5, %v1857_v54  ;;  %v1743_v13 = vmul.f32 0.5, %v2693_v20 }
 0x298   : > { %v2695_v12 = vpop.eup %2694  ;;  %2700 = vtanh.f32 %v4613_v43  ;;  %v1866_v33 = vmul.f32 0.5, %v1858_v6  ;;  %1928 = vmatmul.f32.vlgmr.msra.gmra.mxu0 %v4611_v36  ;;  %1951 = vmatmul.f32.vlgmr.msra.gmra.mxu1 %v4611_v36  ;;  %v4622_v19 = vadd.f32 %v4611_v36, %v4426_v17  ;;  %v1908_v10 = vmax.f32 %v4428_v25, %v4611_v36 }
 0x299   : > { %v1867_v57 = vmul.f32 0.5, %v1859_v31  ;;  %v2697_v2 = vpop.eup %2696  ;;  %v1878_v60 = vmul.f32 0.5, %v2695_v12  ;;  %2702 = vtanh.f32 %v1865_v59  ;;  %1974 = vmatmul.f32.vlgmr.msra.gmra.mxu2 %v4611_v36  ;;  %1997 = vmatmul.f32.vlgmr.msra.gmra.mxu3 %v4611_v36  ;;  %v1751_v48 = vadd.f32 0.5, %v1743_v13  ;;  %v5350_v59 = vld [vmem:[#allocation22_spill] sm:$0xff] }
 0x29a   : > { %v1879_v61 = vmul.f32 0.5, %v2697_v2  ;;  %2704 = vtanh.f32 %v1866_v33  ;;  %v570_v12 = vadd.f32 %v5350_v59, %v3932_v29  ;;  %v5351_v33 = vld [vmem:[#allocation23_spill] sm:$0xff] }
 0x29b   : > { %v1886_v63 = vadd.f32 0.5, %v1878_v60  ;;  %2706 = vtanh.f32 %v1867_v57  ;;  %v599_v57 = vadd.f32 %v5351_v33, %v3934_v46 }
 0x29c   : > { %v1887_v3 = vadd.f32 0.5, %v1879_v61  ;;  %v1828_v62 = vpop.f32.mrf.mxu2  ;;  %v1851_v41 = vpop.f32.mrf.mxu3 }
 0x29d   : > { %v2699_v17 = vpop.eup %2698  ;;  %v1860_v44 = vadd.f32 %v1828_v62, %v5348_v26  ;;  %v1861_v22 = vadd.f32 %v1851_v41, %v5349_v49  ;;  %v5353_v41 = vld [vmem:[#allocation25_spill] sm:$0xff] }
 0x29e   : > { %v2701_v50 = vpop.eup %2700  ;;  %v1894_v56 = vmul.f32 %v1887_v3, %v4447_v27  ;;  %v1896_v34 = vmul.f32 %v2699_v17, %v1886_v63  ;;  %v5352_v3 = vld [vmem:[#allocation24_spill] sm:$0xff]  ;;  %v657_v17 = vadd.f32 %v5353_v41, %v3946_v35 }
 0x29f   : > { %v2703_v21 = vpop.eup %2702  ;;  %v4631_v18 = vmul.f32 %v2701_v50, %v1751_v48  ;;  %2708 = vtanh.f32 %v1860_v44  ;;  %v1869_v45 = vmul.f32 0.5, %v1861_v22  ;;  %v628_v62 = vadd.f32 %v5352_v3, %v3944_v9  ;;  %v5354_v44 = vld [vmem:[#allocation26_spill] sm:$0xff]  ;;  %v5355_v22 = vld [vmem:[#allocation27_spill] sm:$0xff] }
 0x2a0   : > { %v2705_v24 = vpop.eup %2704  ;;  %v4633_v4 = vadd.f32 %v1896_v34, %v1894_v56  ;;  %v1881_v30 = vmul.f32 0.5, %v2703_v21  ;;  %v572_v49 = vadd.f32 %v5354_v44, %v3932_v29  ;;  %v601_v50 = vadd.f32 %v5355_v22, %v3934_v46  ;;  %v5356_v29 = vld [vmem:[#allocation28_spill] sm:$0xff] }
 0x2a1   : > { %v2707_v8 = vpop.eup %2706  ;;  %v1882_v42 = vmul.f32 0.5, %v2705_v24  ;;  %2710 = vtanh.f32 %v1869_v45  ;;  %1931 = vmatmul.f32.gmra.mxu0 %v4631_v18  ;;  %1954 = vmatmul.f32.gmra.mxu1 %v4631_v18  ;;  %v4639_v58 = vadd.f32 %v4631_v18, %v4451_v39  ;;  %v1909_v27 = vmax.f32 %v4453_v52, %v4631_v18 }
 0x2a2   : > { %2712 = vtanh.f32 %v4633_v4  ;;  %v1883_v38 = vmul.f32 0.5, %v2707_v8  ;;  %1977 = vmatmul.f32.gmra.mxu2 %v4631_v18  ;;  %2000 = vmatmul.f32.gmra.mxu3 %v4631_v18  ;;  %v1889_v39 = vadd.f32 0.5, %v1881_v30  ;;  %v630_v46 = vadd.f32 %v5356_v29, %v3944_v9 }
 0x2a3   : > { %v1890_v7 = vadd.f32 0.5, %v1882_v42 }
 0x2a4   : > { %v1891_v11 = vadd.f32 0.5, %v1883_v38 }
 0x2a5   : > { %v2709_v40 = vpop.eup %2708 }
 0x2a6   : > { %v1895_v14 = vmul.f32 %v1891_v11, %v4467_v0  ;;  %v1897_v23 = vmul.f32 %v2709_v40, %v1890_v7 }
 0x2a7   : > { %v2711_v28 = vpop.eup %2710 }
 0x2a8   : > { %v2713_v37 = vpop.eup %2712  ;;  %v4647_v54 = vadd.f32 %v1897_v23, %v1895_v14  ;;  %v1885_v32 = vmul.f32 0.5, %v2711_v28  ;;  %v5357_v28 = vld [vmem:[#allocation29_spill] sm:$0xff] }
 0x2a9   : > { %v4649_v5 = vmul.f32 %v2713_v37, %v1889_v39  ;;  %v659_v39 = vadd.f32 %v5357_v28, %v3946_v35  ;;  %v5359_v35 = vld [vmem:[#allocation31_spill] sm:$0xff] }
 0x2aa   : > { %2714 = vtanh.f32 %v4647_v54  ;;  %v1893_v53 = vadd.f32 0.5, %v1885_v32 }
 0x2ab   : > { %2070 = vmatmul.f32.vlgmr.msrb.gmra.mxu0 %v4649_v5  ;;  %2093 = vmatmul.f32.vlgmr.msrb.gmra.mxu1 %v4649_v5  ;;  %v4656_v20 = vadd.f32 %v4649_v5, %v4478_v55  ;;  %v1910_v0 = vmax.f32 %v4480_v15, %v4649_v5 }
 0x2ac   : > { %2116 = vmatmul.f32.vlgmr.msrb.gmra.mxu2 %v4649_v5  ;;  %2139 = vmatmul.f32.vlgmr.msrb.gmra.mxu3 %v4649_v5 }
 0x2b0   : > { %v2715_v6 = vpop.eup %2714 }
 0x2b1   : > { %v4662_v1 = vmul.f32 %v2715_v6, %v1893_v53 }
 0x2b3   : > { %2073 = vmatmul.f32.gmra.mxu0 %v4662_v1  ;;  %2096 = vmatmul.f32.gmra.mxu1 %v4662_v1  ;;  %v4668_v31 = vadd.f32 %v4662_v1, %v4496_v47  ;;  %v1911_v55 = vmax.f32 %v4498_v16, %v4662_v1 }
 0x2b4   : > { %2119 = vmatmul.f32.gmra.mxu2 %v4662_v1  ;;  %2142 = vmatmul.f32.gmra.mxu3 %v4662_v1 }
 0x315   : > { %v1929_v2 = vpop.f32.mrf.mxu0  ;;  %v1952_v13 = vpop.f32.mrf.mxu1 }
 0x316   : > { %v2004_v60 = vadd.f32 %v1929_v2, %v570_v12  ;;  %v2005_v61 = vadd.f32 %v1952_v13, %v599_v57 }
 0x318   : > { %v2012_v63 = vmul.f32 0.5, %v2004_v60  ;;  %v2013_v47 = vmul.f32 0.5, %v2005_v61 }
 0x31a   : > { %2716 = vtanh.f32 %v2012_v63 }
 0x31b   : > { %2718 = vtanh.f32 %v2013_v47  ;;  %v5358_v47 = vld [vmem:[#allocation30_spill] sm:$0xff] }
 0x31c   : > { %v1975_v48 = vpop.f32.mrf.mxu2  ;;  %v1998_v26 = vpop.f32.mrf.mxu3 }
 0x31d   : > { %v2006_v56 = vadd.f32 %v1975_v48, %v628_v62  ;;  %v2007_v34 = vadd.f32 %v1998_v26, %v657_v17 }
 0x31e   : > { %v1932_v21 = vpop.f32.mrf.mxu0  ;;  %v1955_v45 = vpop.f32.mrf.mxu1 }
 0x31f   : > { %2720 = vtanh.f32 %v2006_v56  ;;  %v2015_v24 = vmul.f32 0.5, %v2007_v34  ;;  %v2008_v8 = vadd.f32 %v1932_v21, %v572_v49  ;;  %v2009_v42 = vadd.f32 %v1955_v45, %v601_v50 }
 0x320   : > { %v2717_v38 = vpop.eup %2716 }
 0x321   : > { %v2719_v30 = vpop.eup %2718  ;;  %v2028_v7 = vmul.f32 0.5, %v2717_v38  ;;  %2722 = vtanh.f32 %v2015_v24  ;;  %v2016_v11 = vmul.f32 0.5, %v2008_v8  ;;  %v2017_v40 = vmul.f32 0.5, %v2009_v42  ;;  %v5360_v42 = vld [vmem:[#allocation32_spill] sm:$0xff] }
 0x322   : > { %v2029_v14 = vmul.f32 0.5, %v2719_v30  ;;  %v5361_v30 = vld [vmem:[#allocation33_spill] sm:$0xff] }
 0x323   : > { %v2036_v23 = vadd.f32 0.5, %v2028_v7  ;;  %2724 = vtanh.f32 %v2016_v11 }
 0x324   : > { %v2037_v37 = vadd.f32 0.5, %v2029_v14  ;;  %2726 = vtanh.f32 %v2017_v40 }
 0x325   : > { %v2721_v32 = vpop.eup %2720  ;;  %v1978_v53 = vpop.f32.mrf.mxu2 }
 0x326   : > { %v2001_v6 = vpop.f32.mrf.mxu3  ;;  %v2044_v59 = vmul.f32 %v2037_v37, %v4603_v51  ;;  %v2046_v12 = vmul.f32 %v2721_v32, %v2036_v23  ;;  %v2010_v33 = vadd.f32 %v1978_v53, %v630_v46  ;;  %v5362_v46 = vld [vmem:[#allocation34_spill] sm:$0xff] }
 0x327   : > { %v2011_v57 = vadd.f32 %v2001_v6, %v659_v39  ;;  %v2723_v2 = vpop.eup %2722  ;;  %v5363_v39 = vld [vmem:[#allocation35_spill] sm:$0xff] }
 0x328   : > { %v2048_v13 = vadd.f32 %v2046_v12, %v2044_v59  ;;  %2728 = vtanh.f32 %v2010_v33  ;;  %v2071_v61 = vpop.f32.mrf.mxu0  ;;  %v2094_v63 = vpop.f32.mrf.mxu1  ;;  %v2031_v17 = vmul.f32 0.5, %v2723_v2 }
 0x329   : > { %v2019_v60 = vmul.f32 0.5, %v2011_v57  ;;  %v2725_v9 = vpop.eup %2724  ;;  %v2146_v3 = vadd.f32 %v2071_v61, %v5358_v47  ;;  %v2147_v62 = vadd.f32 %v2094_v63, %v5359_v35  ;;  %v5364_v63 = vld [vmem:[#allocation36_spill] sm:$0xff]  ;;  %v5365_v47 = vld [vmem:[#allocation37_spill] sm:$0xff] }
 0x32a   : > { %v2727_v41 = vpop.eup %2726  ;;  %2730 = vtanh.f32 %v2048_v13  ;;  %2206 = vst [vmem:[#allocation3 + $0x8] sm:$0xff] %v2048_v13  ;;  %v2032_v48 = vmul.f32 0.5, %v2725_v9  ;;  %v2039_v56 = vadd.f32 0.5, %v2031_v17 }
 0x32b   : > { %v2033_v51 = vmul.f32 0.5, %v2727_v41  ;;  %2732 = vtanh.f32 %v2019_v60  ;;  %v2154_v26 = vmul.f32 0.5, %v2146_v3  ;;  %v2155_v44 = vmul.f32 0.5, %v2147_v62 }
 0x32c   : > { %v2040_v49 = vadd.f32 0.5, %v2032_v48 }
 0x32d   : > { %v2041_v22 = vadd.f32 0.5, %v2033_v51  ;;  %2734 = vtanh.f32 %v2154_v26 }
 0x32e   : > { %v2729_v50 = vpop.eup %2728  ;;  %2736 = vtanh.f32 %v2155_v44 }
 0x32f   : > { %v2045_v34 = vmul.f32 %v2041_v22, %v4613_v43  ;;  %v2047_v21 = vmul.f32 %v2729_v50, %v2040_v49  ;;  %v2117_v45 = vpop.f32.mrf.mxu2  ;;  %v2140_v24 = vpop.f32.mrf.mxu3 }
 0x330   : > { %v2731_v8 = vpop.eup %2730  ;;  %v2148_v38 = vadd.f32 %v2117_v45, %v5360_v42  ;;  %v2149_v7 = vadd.f32 %v2140_v24, %v5361_v30  ;;  %v2074_v11 = vpop.f32.mrf.mxu0 }
 0x331   : > { %v2097_v40 = vpop.f32.mrf.mxu1  ;;  %v2733_v14 = vpop.eup %2732  ;;  %v2052_v23 = vmul.f32 %v2731_v8, %v2039_v56  ;;  %v2049_v29 = vadd.f32 %v2047_v21, %v2045_v34  ;;  %v2150_v28 = vadd.f32 %v2074_v11, %v5362_v46 }
 0x332   : > { %v2151_v37 = vadd.f32 %v2097_v40, %v5363_v39  ;;  %2738 = vtanh.f32 %v2148_v38  ;;  %v2157_v32 = vmul.f32 0.5, %v2149_v7  ;;  %v2035_v33 = vmul.f32 0.5, %v2733_v14 }
 0x333   : > { %v2735_v43 = vpop.eup %2734  ;;  %v4699_v53 = vadd.f32 %v2052_v23, %v4622_v19  ;;  %v4704_v6 = vmax.f32 %v1908_v10, %v2052_v23  ;;  %2204 = vst [vmem:[#allocation2] sm:$0xff] %v2052_v23  ;;  %2740 = vtanh.f32 %v2049_v29  ;;  %v2158_v59 = vmul.f32 0.5, %v2150_v28 }
 0x334   : > { %v2737_v12 = vpop.eup %2736  ;;  %2207 = vst [vmem:[#allocation3] sm:$0xff] %v2049_v29  ;;  %v2170_v57 = vmul.f32 0.5, %v2735_v43  ;;  %2742 = vtanh.f32 %v2157_v32  ;;  %v2159_v2 = vmul.f32 0.5, %v2151_v37  ;;  %v2043_v61 = vadd.f32 0.5, %v2035_v33 }
 0x335   : > { %2212 = vst [vmem:[#allocation6] sm:$0xff] %v4699_v53  ;;  %v2171_v13 = vmul.f32 0.5, %v2737_v12  ;;  %2744 = vtanh.f32 %v2158_v59 }
 0x336   : > { %2216 = vst [vmem:[#allocation8] sm:$0xff] %v4704_v6  ;;  %v2178_v19 = vadd.f32 0.5, %v2170_v57  ;;  %2746 = vtanh.f32 %v2159_v2 }
 0x337   : > { %v2179_v25 = vadd.f32 0.5, %v2171_v13  ;;  %v2120_v36 = vpop.f32.mrf.mxu2  ;;  %v2143_v10 = vpop.f32.mrf.mxu3 }
 0x338   : > { %v2739_v60 = vpop.eup %2738  ;;  %v2152_v9 = vadd.f32 %v2120_v36, %v5364_v63  ;;  %v2153_v3 = vadd.f32 %v2143_v10, %v5365_v47 }
 0x339   : > { %v2741_v35 = vpop.eup %2740  ;;  %v2186_v62 = vmul.f32 %v2179_v25, %v4633_v4  ;;  %v2188_v41 = vmul.f32 %v2739_v60, %v2178_v19 }
 0x33a   : > { %v2743_v17 = vpop.eup %2742  ;;  %v2053_v48 = vmul.f32 %v2741_v35, %v2043_v61  ;;  %2748 = vtanh.f32 %v2152_v9  ;;  %v2161_v51 = vmul.f32 0.5, %v2153_v3 }
 0x33b   : > { %v2745_v26 = vpop.eup %2744  ;;  %v2190_v44 = vadd.f32 %v2188_v41, %v2186_v62  ;;  %v2173_v34 = vmul.f32 0.5, %v2743_v17 }
 0x33c   : > { %v2747_v49 = vpop.eup %2746  ;;  %v2197_v22 = vadd.f32 %v2053_v48, %v4639_v58  ;;  %v2201_v50 = vmax.f32 %v1909_v27, %v2053_v48  ;;  %2205 = vst [vmem:[#allocation2 + $0x8] sm:$0xff] %v2053_v48  ;;  %v2174_v56 = vmul.f32 0.5, %v2745_v26  ;;  %2750 = vtanh.f32 %v2161_v51 }
 0x33d   : > { %2752 = vtanh.f32 %v2190_v44  ;;  %2210 = vst [vmem:[#allocation5] sm:$0xff] %v2190_v44  ;;  %v2175_v4 = vmul.f32 0.5, %v2747_v49  ;;  %v2181_v38 = vadd.f32 0.5, %v2173_v34 }
 0x33e   : > { %2213 = vst [vmem:[#allocation6 + $0x8] sm:$0xff] %v2197_v22  ;;  %v2182_v21 = vadd.f32 0.5, %v2174_v56 }
 0x33f   : > { %2217 = vst [vmem:[#allocation8 + $0x8] sm:$0xff] %v2201_v50  ;;  %v2183_v45 = vadd.f32 0.5, %v2175_v4 }
 0x340   : > { %v2749_v24 = vpop.eup %2748 }
 0x341   : > { %v2187_v8 = vmul.f32 %v2183_v45, %v4647_v54  ;;  %v2189_v42 = vmul.f32 %v2749_v24, %v2182_v21 }
 0x342   : > { %v2751_v58 = vpop.eup %2750 }
 0x343   : > { %v2753_v30 = vpop.eup %2752  ;;  %v2191_v52 = vadd.f32 %v2189_v42, %v2187_v8  ;;  %v2177_v11 = vmul.f32 0.5, %v2751_v58 }
 0x344   : > { %v2194_v18 = vmul.f32 %v2753_v30, %v2181_v38 }
 0x345   : > { %2754 = vtanh.f32 %v2191_v52  ;;  %2211 = vst [vmem:[#allocation5 + $0x8] sm:$0xff] %v2191_v52  ;;  %v2185_v40 = vadd.f32 0.5, %v2177_v11 }
 0x346   : > { %v2198_v27 = vadd.f32 %v2194_v18, %v4656_v20  ;;  %v2202_v7 = vmax.f32 %v1910_v0, %v2194_v18  ;;  %2208 = vst [vmem:[#allocation4 + $0x8] sm:$0xff] %v2194_v18 }
 0x348   : > { %2214 = vst [vmem:[#allocation7 + $0x8] sm:$0xff] %v2198_v27 }
 0x349   : > { %2218 = vst [vmem:[#allocation9] sm:$0xff] %v2202_v7 }
 0x34b   : > { %v2755_v54 = vpop.eup %2754 }
 0x34c   : > { %v2195_v14 = vmul.f32 %v2755_v54, %v2185_v40 }
 0x34d   : > { %2223 = sbr.rel (%p2503_p12) target bundleno = 858 (0x35a), region = 68 }
 0x34e   : > { %v2199_v23 = vadd.f32 %v2195_v14, %v4668_v31  ;;  %v2203_v29 = vmax.f32 %v1911_v55, %v2195_v14  ;;  %2209 = vst [vmem:[#allocation4] sm:$0xff] %v2195_v14 }
 0x350   : > { %2215 = vst [vmem:[#allocation7] sm:$0xff] %v2199_v23 }
 0x351   : > { %2219 = vst [vmem:[#allocation9 + $0x8] sm:$0xff] %v2203_v29 }
 0x352   : > { %v2224_v15 = vmul.f32 0.125, %v4699_v53  ;;  %v2226_v5 = vmul.f32 0.125, %v2198_v27  ;;  %2230 = vst [vmem:[%s3113_s22 + $0x10] sm:$0xff] %v4704_v6  ;;  %v2225_v16 = vmul.f32 0.125, %v2197_v22  ;;  %v2227_v20 = vmul.f32 0.125, %v2199_v23 }
 0x353   : > { %2231 = vst [vmem:[%s3113_s22 + $0x18] sm:$0xff] %v2202_v7 }
 0x354   : > { %2228 = vst [vmem:[%s3113_s22] sm:$0xff] %v2224_v15 }
 0x355   : > { %2229 = vst [vmem:[%s3113_s22 + $0x8] sm:$0xff] %v2226_v5 }
 0x356   : > { %2232 = vst [vmem:[%s3113_s22 + $0x20] sm:$0xff] %v2225_v16 }
 0x357   : > { %2233 = vst [vmem:[%s3113_s22 + $0x28] sm:$0xff] %v2227_v20 }
 0x358   : > { %2234 = vst [vmem:[%s3113_s22 + $0x30] sm:$0xff] %v2201_v50 }
 0x359   : > { %2235 = vst [vmem:[%s3113_s22 + $0x38] sm:$0xff] %v2203_v29 }
 0x35a PF: > { %s20_s9 = sadd.s32 1, %s2990_s9   ;;  %s5366_s27 = smov %s2982_s29 }
 0x35b   : > { %p17_p13 = scmp.ge.s32.totalorder %s20_s9, 6   ;;  %s5367_s28 = smov %s2986_s30 }
 0x35c   : > { %s5368_s29 = smov %s5371_s11  ;;  %s5369_s30 = smov %s5375_s12 }
 0x35d   :  { %19 = sbr.rel (!%p17_p13) target bundleno = 7 (0x7), region = 102 }
 0x362   :  { %2257 = vsyncpa [#allocation11], 1 }
 0x363   :  { %2259 = vsyncpa [#allocation11 + $0x1], 1 }
 0x364   :  { %2260 = vsyncpa [#allocation13], 1 }

</bundles_post_ra>
